<compile_context>
chip_gen: v7x
topology: tpu7x:2x2x1
jax: 0.10.0
libtpu: 0.0.40
codegen_flags: <defaults>
</compile_context>

<pallas_src>
import functools
import math

import jax
import jax.numpy as jnp
from jax.experimental import pallas as pl
from jax.experimental.pallas import tpu as pltpu

TOKEN_DIM = 128      # lane-friendly small config; module default is 512
DEPTH = 3
NUM_HEADS = 8
MLP_RATIO = 4
LN_EPS = 1e-5

_CompilerParams = (getattr(pltpu, "CompilerParams", None)
                   or getattr(pltpu, "TPUCompilerParams", None))


def _swap01(x):
    """(A, B, C) -> (B, A, C); lane-layout-aware path when pltpu.einshape is available."""
    if hasattr(pltpu, "einshape"):
        return pltpu.einshape("mhd->hmd", x)
    return jnp.swapaxes(x, 0, 1)


def _layer_norm(x, g, b):
    # x: (rows, D) f32; g/b: (1, D) f32
    mu = jnp.mean(x, axis=-1, keepdims=True)
    var = jnp.mean((x - mu) ** 2, axis=-1, keepdims=True)
    return (x - mu) * jax.lax.rsqrt(var + LN_EPS) * g + b


def _stack_kernel(x_ref, mask_ref,
                  ln1g_ref, ln1b_ref, wqkv_ref, bqkv_ref, wo_ref, bo_ref,
                  ln2g_ref, ln2b_ref, w1_ref, b1_ref, w2_ref, b2_ref,
                  o_ref, x_scr, *, heads):
    d = pl.program_id(1)
    bb, T, D = x_scr.shape
    r = bb * T
    hd = D // heads

    # Load the activations into the depth-resident scratch at the first block.
    @pl.when(d == 0)
    def _load():
        x_scr[...] = x_ref[...].astype(jnp.float32)

    x = x_scr[...]                                   # (bb, T, D) f32 residual stream

    # ---------------- self-attention sub-block (pre-norm) ----------------
    xn = _layer_norm(x.reshape(r, D), ln1g_ref[0], ln1b_ref[0])
    # 1/sqrt(hd) is pre-folded into the Q columns of w_qkv host-side -> no score scaling.
    qkv = jnp.dot(xn.astype(jnp.bfloat16), wqkv_ref[0],
                  preferred_element_type=jnp.float32) + bqkv_ref[0]      # (r, 3D) f32

    # ONE bulk head split: (r, 3D) -> (3*heads, r, hd); heads become a batch dimension.
    qkv_h = _swap01(qkv.reshape(r, 3 * heads, hd))                       # (3*heads, r, hd)
    q = qkv_h[:heads].reshape(heads * bb, T, hd).astype(jnp.bfloat16)
    k = qkv_h[heads:2 * heads].reshape(heads * bb, T, hd).astype(jnp.bfloat16)
    v = qkv_h[2 * heads:].reshape(heads * bb, T, hd).astype(jnp.bfloat16)

    # Additive key mask, broadcast over heads ONCE per layer (batch index = h*bb + b).
    mask_hb = jnp.broadcast_to(mask_ref[...][None], (heads, bb, 1, T)
                               ).reshape(heads * bb, 1, T)

    s = jnp.einsum('bqd,bkd->bqk', q, k,
                   preferred_element_type=jnp.float32) + mask_hb        # (heads*bb, T, T)
    s = s - jnp.max(s, axis=-1, keepdims=True)
    p = jnp.exp(s)
    p = p * pl.reciprocal(jnp.sum(p, axis=-1, keepdims=True), approx=True)

    a = jnp.einsum('bqk,bkd->bqd', p.astype(jnp.bfloat16), v,
                   preferred_element_type=jnp.float32)                  # (heads*bb, T, hd)
    # Fold heads back into the feature dim and run ONE K=D output projection.
    a = _swap01(a.reshape(heads, r, hd)).reshape(r, D)
    proj = jnp.dot(a.astype(jnp.bfloat16), wo_ref[0],
                   preferred_element_type=jnp.float32) + bo_ref[0]
    x = x + proj.reshape(bb, T, D)

    # ---------------- MLP sub-block (pre-norm) ----------------
    xn2 = _layer_norm(x.reshape(r, D), ln2g_ref[0], ln2b_ref[0])
    h1 = jnp.dot(xn2.astype(jnp.bfloat16), w1_ref[0],
                 preferred_element_type=jnp.float32) + b1_ref[0]
    # TODO(synk): PyTorch nn.GELU default is exact (erf); tanh approximation used here.
    h1 = jax.nn.gelu(h1, approximate=True)
    h2 = jnp.dot(h1.astype(jnp.bfloat16), w2_ref[0],
                 preferred_element_type=jnp.float32) + b2_ref[0]
    x = x + h2.reshape(bb, T, D)

    x_scr[...] = x

    @pl.when(d == pl.num_programs(1) - 1)
    def _store():
        o_ref[...] = x.astype(o_ref.dtype)


# ---------------- generation-aware tile / VMEM selection ----------------
def _generation_config():
    kind = ""
    try:
        kind = jax.devices()[0].device_kind.lower()
    except Exception:
        pass
    vmem_cap = 128 * 1024 * 1024
    try:
        vmem_cap = int(pltpu.get_tpu_info().vmem_capacity_bytes)
    except Exception:
        pass

    if ("v7" in kind) or ("7x" in kind) or vmem_cap <= 64 * 1024 * 1024:
        # v7x: 64 MiB VMEM/TC but ~3.2 TB/s HBM -> ~384-512 rows hide the weight DMA;
        # keep grid dim 0 >= 2 so both TensorCores get work.
        cfg = dict(rows_target=512, vmem_limit=48 * 1024 * 1024, min_grid0=2)
    elif "v6" in kind:
        # v6e: 918 TF/s vs ~1.3 TB/s -> need ~768-1024 rows to hide the weight stream.
        cfg = dict(rows_target=1024, vmem_limit=100 * 1024 * 1024, min_grid0=1)
    elif "v5" in kind:
        # v5e: 197 TF/s vs ~0.8 TB/s -> ~256 rows already compute-bound.
        cfg = dict(rows_target=256, vmem_limit=64 * 1024 * 1024, min_grid0=1)
    else:
        cfg = dict(rows_target=512, vmem_limit=64 * 1024 * 1024, min_grid0=1)
    cfg["vmem_limit"] = min(cfg["vmem_limit"], int(vmem_cap * 0.75))
    return cfg


def _vmem_bytes_estimate(bb, T, D, hidden):
    r = bb * T
    io = 4 * bb * T * D * 4                                             # x in + out, 2x buffered, f32
    scratch = bb * T * D * 4                                            # residual stream
    weights = 2 * 2 * (3 * D * D + D * D + D * hidden + hidden * D)     # bf16, double-buffered
    acts = r * 4 * (3 * D + hidden + 4 * D)                             # qkv + h1 + headroom, f32
    return io + scratch + weights + acts


def _pick_bb(B, T, D, hidden, cfg):
    divisors = [c for c in range(1, B + 1) if B % c == 0]
    fit = [c for c in divisors if c * T <= cfg["rows_target"]] or [1]
    if cfg["min_grid0"] > 1:
        par = [c for c in fit if B // c >= cfg["min_grid0"]]
        if par:
            fit = par
    bb = max(fit)
    while bb > 1 and _vmem_bytes_estimate(bb, T, D, hidden) > 0.7 * cfg["vmem_limit"]:
        bb = max(c for c in divisors if c < bb)
    return bb


def encoder_stack(x, key_mask, p, *, heads=NUM_HEADS):
    """Run all `depth` transformer blocks in one fused pallas_call."""
    B, T, D = x.shape
    depth = p["w_qkv"].shape[0]
    hidden = p["w_1"].shape[-1]

    cfg = _generation_config()
    bb = _pick_bb(B, T, D, hidden, cfg)
    grid = (B // bb, depth)

    def wspec(arr):
        shp = (1,) + arr.shape[1:]
        return pl.BlockSpec(shp, lambda i, d, _n=len(shp): (d,) + (0,) * (_n - 1))

    in_specs = [
        pl.BlockSpec((bb, T, D), lambda i, d: (i, 0, 0)),   # x (aliased to the output)
        pl.BlockSpec((bb, 1, T), lambda i, d: (i, 0, 0)),   # additive key mask
        wspec(p["ln1_g"]), wspec(p["ln1_b"]),
        wspec(p["w_qkv"]), wspec(p["b_qkv"]),
        wspec(p["w_o"]), wspec(p["b_o"]),
        wspec(p["ln2_g"]), wspec(p["ln2_b"]),
        wspec(p["w_1"]), wspec(p["b_1"]),
        wspec(p["w_2"]), wspec(p["b_2"]),
    ]

    # Advisory cost so XLA overlaps the surrounding pos-emb / mask ops with the kernel.
    w_bytes = depth * (3 * D * D + D * D + D * hidden + hidden * D) * 2
    flops = 2 * B * T * depth * (3 * D * D + D * D + D * hidden + hidden * D + 2 * T * D)
    cost = None
    if hasattr(pl, "CostEstimate"):
        cost = pl.CostEstimate(
            flops=flops,
            transcendentals=B * T * depth * (heads * T + hidden),
            bytes_accessed=w_bytes * (B // bb) + 2 * B * T * D * 4 + B * T * 4)

    kernel = functools.partial(_stack_kernel, heads=heads)
    return pl.pallas_call(
        kernel,
        out_shape=jax.ShapeDtypeStruct((B, T, D), x.dtype),
        grid=grid,
        in_specs=in_specs,
        out_specs=pl.BlockSpec((bb, T, D), lambda i, d: (i, 0, 0)),
        scratch_shapes=[pltpu.VMEM((bb, T, D), jnp.float32)],
        input_output_aliases={0: 0},   # x read only at d==0, output written at d==depth-1
        cost_estimate=cost,
        compiler_params=_CompilerParams(
            dimension_semantics=("parallel", "arbitrary"),
            vmem_limit_bytes=cfg["vmem_limit"],
        ),
    )(x, key_mask,
      p["ln1_g"], p["ln1_b"], p["w_qkv"], p["b_qkv"], p["w_o"], p["b_o"],
      p["ln2_g"], p["ln2_b"], p["w_1"], p["b_1"], p["w_2"], p["b_2"])


# ---------------- parameter init (deterministic, mirrors _init_weights) ----------------
def _xavier_uniform(key, fan_in, fan_out, shape):
    bound = math.sqrt(6.0 / (fan_in + fan_out))
    return jax.random.uniform(key, shape, jnp.float32, -bound, bound)


def init_encoder2_params(key, dim=TOKEN_DIM, depth=DEPTH, heads=NUM_HEADS,
                         mlp_ratio=MLP_RATIO):
    hidden = dim * mlp_ratio
    keys = jax.random.split(key, depth * 4 + 1)

    w_qkv = jnp.stack([_xavier_uniform(keys[i * 4 + 0], dim, 3 * dim, (dim, 3 * dim))
                       for i in range(depth)])
    # Fold the 1/sqrt(head_dim) attention scale into the Q columns (free at run time).
    # b_qkv is zero-initialized, so its Q part needs no scaling.
    scale = 1.0 / math.sqrt(dim // heads)
    col_scale = jnp.concatenate([jnp.full((dim,), scale, jnp.float32),
                                 jnp.ones((2 * dim,), jnp.float32)])
    w_qkv = w_qkv * col_scale

    w_o = jnp.stack([_xavier_uniform(keys[i * 4 + 1], dim, dim, (dim, dim))
                     for i in range(depth)])
    w_1 = jnp.stack([_xavier_uniform(keys[i * 4 + 2], dim, hidden, (dim, hidden))
                     for i in range(depth)])
    w_2 = jnp.stack([_xavier_uniform(keys[i * 4 + 3], hidden, dim, (hidden, dim))
                     for i in range(depth)])

    return {
        # nn.init.normal_(std=0.02); present in the module but unused in forward()
        "cls_token": 0.02 * jax.random.normal(keys[-1], (1, 1, dim), jnp.float32),
        "ln1_g": jnp.ones((depth, 1, dim), jnp.float32),
        "ln1_b": jnp.zeros((depth, 1, dim), jnp.float32),
        # big weights in bf16 (MXU rate, half the DMA bytes); accumulation stays f32
        "w_qkv": w_qkv.astype(jnp.bfloat16),
        "b_qkv": jnp.zeros((depth, 1, 3 * dim), jnp.float32),
        "w_o": w_o.astype(jnp.bfloat16),
        "b_o": jnp.zeros((depth, 1, dim), jnp.float32),
        "ln2_g": jnp.ones((depth, 1, dim), jnp.float32),
        "ln2_b": jnp.zeros((depth, 1, dim), jnp.float32),
        "w_1": w_1.astype(jnp.bfloat16),
        "b_1": jnp.zeros((depth, 1, hidden), jnp.float32),
        "w_2": w_2.astype(jnp.bfloat16),
        "b_2": jnp.zeros((depth, 1, dim), jnp.float32),
    }


def create_self_attn_mask(padding_mask):
    # padding_mask: (B, T) bool, True = padded token -> additive mask blocking those keys
    if padding_mask is None:
        return None
    neg = jnp.where(padding_mask, jnp.float32(-1e9), jnp.float32(0.0))   # (B, T)
    return neg[:, None, :]                                               # (B, 1, T)


def encoder2_forward(params, x, pos_embs=None, padding_mask=None):
    B, T, D = x.shape
    if pos_embs is not None:
        x = x + pos_embs
    key_mask = create_self_attn_mask(padding_mask)
    if key_mask is None:
        key_mask = jnp.zeros((B, 1, T), jnp.float32)
    return encoder_stack(x, key_mask, params)


if __name__ == "__main__":
    key = jax.random.PRNGKey(0)
    kp, kx, kpos = jax.random.split(key, 3)

    B, T, D = 2, 8, TOKEN_DIM
    params = init_encoder2_params(kp)

    x = jax.random.normal(kx, (B, T, D), jnp.float32)
    pos_embs = 0.02 * jax.random.normal(kpos, (B, T, D), jnp.float32)
    padding_mask = jnp.zeros((B, T), jnp.bool_).at[:, T - 2:].set(True)  # last 2 padded

    out = encoder2_forward(params, x, pos_embs=pos_embs, padding_mask=padding_mask)
    out = jax.block_until_ready(out)
    assert out.shape == (B, T, D) and bool(jnp.all(jnp.isfinite(out)))
    print("KERNEL_OK")
</pallas_src>

<mosaic_0001>
module attributes {stable_mosaic.version = 11 : i64} {
  func.func @_stack_kernel(%arg0: i32, %arg1: i32, %arg2: memref<2x8x128xf32, #tpu.memory_space<vmem>>, %arg3: memref<2x1x8xf32, #tpu.memory_space<vmem>>, %arg4: memref<1x1x128xf32, #tpu.memory_space<vmem>>, %arg5: memref<1x1x128xf32, #tpu.memory_space<vmem>>, %arg6: memref<1x128x384xbf16, #tpu.memory_space<vmem>>, %arg7: memref<1x1x384xf32, #tpu.memory_space<vmem>>, %arg8: memref<1x128x128xbf16, #tpu.memory_space<vmem>>, %arg9: memref<1x1x128xf32, #tpu.memory_space<vmem>>, %arg10: memref<1x1x128xf32, #tpu.memory_space<vmem>>, %arg11: memref<1x1x128xf32, #tpu.memory_space<vmem>>, %arg12: memref<1x128x512xbf16, #tpu.memory_space<vmem>>, %arg13: memref<1x1x512xf32, #tpu.memory_space<vmem>>, %arg14: memref<1x512x128xbf16, #tpu.memory_space<vmem>>, %arg15: memref<1x1x128xf32, #tpu.memory_space<vmem>>, %arg16: memref<2x8x128xf32, #tpu.memory_space<vmem>>, %arg17: memref<2x8x128xf32, #tpu.memory_space<vmem>>) attributes {dimension_semantics = [#tpu.dimension_semantics<parallel>, #tpu.dimension_semantics<arbitrary>], iteration_bounds = array<i64: 1, 3>, scalar_prefetch = 0 : i64, scratch_operands = 1 : i64, tpu.core_type = #tpu.core_type<tc>, window_params = [{transform_indices = @transform_0, window_bounds = array<i64: 2, 8, 128>}, {transform_indices = @transform_1, window_bounds = array<i64: 2, 1, 8>}, {transform_indices = @transform_2, window_bounds = array<i64: 1, 1, 128>}, {transform_indices = @transform_3, window_bounds = array<i64: 1, 1, 128>}, {transform_indices = @transform_4, window_bounds = array<i64: 1, 128, 384>}, {transform_indices = @transform_5, window_bounds = array<i64: 1, 1, 384>}, {transform_indices = @transform_6, window_bounds = array<i64: 1, 128, 128>}, {transform_indices = @transform_7, window_bounds = array<i64: 1, 1, 128>}, {transform_indices = @transform_8, window_bounds = array<i64: 1, 1, 128>}, {transform_indices = @transform_9, window_bounds = array<i64: 1, 1, 128>}, {transform_indices = @transform_10, window_bounds = array<i64: 1, 128, 512>}, {transform_indices = @transform_11, window_bounds = array<i64: 1, 1, 512>}, {transform_indices = @transform_12, window_bounds = array<i64: 1, 512, 128>}, {transform_indices = @transform_13, window_bounds = array<i64: 1, 1, 128>}, {transform_indices = @transform_14, window_bounds = array<i64: 2, 8, 128>}]} {
    %c0_i32 = arith.constant 0 : i32
    %0 = arith.cmpi eq, %arg1, %c0_i32 : i32
    %1 = arith.extui %0 : i1 to i32
    %c0_i32_0 = arith.constant 0 : i32
    %2 = arith.cmpi ne, %1, %c0_i32_0 : i32
    scf.if %2 {
      %c0_67 = arith.constant 0 : index
      %c0_68 = arith.constant 0 : index
      %c0_69 = arith.constant 0 : index
      %145 = vector.load %arg2[%c0_67, %c0_68, %c0_69] : memref<2x8x128xf32, #tpu.memory_space<vmem>>, vector<2x8x128xf32>
      %c0_70 = arith.constant 0 : index
      %c0_71 = arith.constant 0 : index
      %c0_72 = arith.constant 0 : index
      %146 = vector.load %arg17[%c0_70, %c0_71, %c0_72] : memref<2x8x128xf32, #tpu.memory_space<vmem>>, vector<2x8x128xf32>
      tpu.vector_store %arg17[%c0_70, %c0_71, %c0_72], %145 {strides = array<i32>} : memref<2x8x128xf32, #tpu.memory_space<vmem>>, vector<2x8x128xf32>,
    } else {
    }
    %c0 = arith.constant 0 : index
    %c0_1 = arith.constant 0 : index
    %c0_2 = arith.constant 0 : index
    %3 = vector.load %arg17[%c0, %c0_1, %c0_2] : memref<2x8x128xf32, #tpu.memory_space<vmem>>, vector<2x8x128xf32>
    %4 = vector.shape_cast %3 : vector<2x8x128xf32> to vector<16x128xf32>
    %c0_3 = arith.constant 0 : index
    %c0_4 = arith.constant 0 : index
    %c0_5 = arith.constant 0 : index
    %5 = vector.load %arg4[%c0_3, %c0_4, %c0_5] : memref<1x1x128xf32, #tpu.memory_space<vmem>>, vector<1x1x128xf32>
    %6 = vector.shape_cast %5 : vector<1x1x128xf32> to vector<1x128xf32>
    %c0_6 = arith.constant 0 : index
    %c0_7 = arith.constant 0 : index
    %c0_8 = arith.constant 0 : index
    %7 = vector.load %arg5[%c0_6, %c0_7, %c0_8] : memref<1x1x128xf32, #tpu.memory_space<vmem>>, vector<1x1x128xf32>
    %8 = vector.shape_cast %7 : vector<1x1x128xf32> to vector<1x128xf32>
    %cst = arith.constant dense<0.000000e+00> : vector<16xf32>
    %9 = vector.multi_reduction <add>, %4, %cst [1] : vector<16x128xf32> to vector<16xf32>
    %10 = vector.shape_cast %9 : vector<16xf32> to vector<16x1xf32>
    %cst_9 = arith.constant 1.280000e+02 : f32
    %11 = vector.broadcast %cst_9 : f32 to vector<16x1xf32>
    %12 = arith.divf %10, %11 : vector<16x1xf32>
    %13 = vector.broadcast %12 : vector<16x1xf32> to vector<16x128xf32>
    %14 = arith.subf %4, %13 : vector<16x128xf32>
    %15 = arith.mulf %14, %14 : vector<16x128xf32>
    %cst_10 = arith.constant dense<0.000000e+00> : vector<16xf32>
    %16 = vector.multi_reduction <add>, %15, %cst_10 [1] : vector<16x128xf32> to vector<16xf32>
    %17 = vector.shape_cast %16 : vector<16xf32> to vector<16x1xf32>
    %cst_11 = arith.constant 1.280000e+02 : f32
    %18 = vector.broadcast %cst_11 : f32 to vector<16x1xf32>
    %19 = arith.divf %17, %18 : vector<16x1xf32>
    %20 = vector.broadcast %12 : vector<16x1xf32> to vector<16x128xf32>
    %21 = arith.subf %4, %20 : vector<16x128xf32>
    %cst_12 = arith.constant 9.99999974E-6 : f32
    %22 = vector.broadcast %cst_12 : f32 to vector<16x1xf32>
    %23 = arith.addf %19, %22 : vector<16x1xf32>
    %24 = math.rsqrt %23 : vector<16x1xf32>
    %25 = vector.broadcast %24 : vector<16x1xf32> to vector<16x128xf32>
    %26 = arith.mulf %21, %25 : vector<16x128xf32>
    %27 = vector.broadcast %6 : vector<1x128xf32> to vector<16x128xf32>
    %28 = arith.mulf %26, %27 : vector<16x128xf32>
    %29 = vector.broadcast %8 : vector<1x128xf32> to vector<16x128xf32>
    %30 = arith.addf %28, %29 : vector<16x128xf32>
    %31 = arith.truncf %30 : vector<16x128xf32> to vector<16x128xbf16>
    %c0_13 = arith.constant 0 : index
    %c0_14 = arith.constant 0 : index
    %c0_15 = arith.constant 0 : index
    %32 = vector.load %arg6[%c0_13, %c0_14, %c0_15] : memref<1x128x384xbf16, #tpu.memory_space<vmem>>, vector<1x128x384xbf16>
    %33 = vector.shape_cast %32 : vector<1x128x384xbf16> to vector<128x384xbf16>
    %cst_16 = arith.constant dense<0.000000e+00> : vector<16x384xf32>
    %34 = tpu.matmul %31, %33, %cst_16 {dimension_numbers = #tpu.dot_dimension_numbers<[1], [0], [0], [1], [0, 0, 1, 1], [], []>} : vector<16x128xbf16>, vector<128x384xbf16>, vector<16x384xf32> -> vector<16x384xf32>
    %c0_17 = arith.constant 0 : index
    %c0_18 = arith.constant 0 : index
    %c0_19 = arith.constant 0 : index
    %35 = vector.load %arg7[%c0_17, %c0_18, %c0_19] : memref<1x1x384xf32, #tpu.memory_space<vmem>>, vector<1x1x384xf32>
    %36 = vector.shape_cast %35 : vector<1x1x384xf32> to vector<1x384xf32>
    %37 = vector.broadcast %36 : vector<1x384xf32> to vector<16x384xf32>
    %38 = arith.addf %34, %37 : vector<16x384xf32>
    %39 = vector.shape_cast %38 : vector<16x384xf32> to vector<16x24x16xf32>
    %40 = tpu.transpose %39, [1, 0, 2] : vector<16x24x16xf32> -> vector<24x16x16xf32>
    %41 = vector.extract_strided_slice %40 {offsets = [0, 0, 0], sizes = [8, 16, 16], strides = [1, 1, 1]} : vector<24x16x16xf32> to vector<8x16x16xf32>
    %42 = vector.shape_cast %41 : vector<8x16x16xf32> to vector<16x8x16xf32>
    %43 = arith.truncf %42 : vector<16x8x16xf32> to vector<16x8x16xbf16>
    %44 = vector.extract_strided_slice %40 {offsets = [8, 0, 0], sizes = [8, 16, 16], strides = [1, 1, 1]} : vector<24x16x16xf32> to vector<8x16x16xf32>
    %45 = vector.shape_cast %44 : vector<8x16x16xf32> to vector<16x8x16xf32>
    %46 = arith.truncf %45 : vector<16x8x16xf32> to vector<16x8x16xbf16>
    %47 = vector.extract_strided_slice %40 {offsets = [16, 0, 0], sizes = [8, 16, 16], strides = [1, 1, 1]} : vector<24x16x16xf32> to vector<8x16x16xf32>
    %48 = vector.shape_cast %47 : vector<8x16x16xf32> to vector<16x8x16xf32>
    %49 = arith.truncf %48 : vector<16x8x16xf32> to vector<16x8x16xbf16>
    %c0_20 = arith.constant 0 : index
    %c0_21 = arith.constant 0 : index
    %c0_22 = arith.constant 0 : index
    %50 = vector.load %arg3[%c0_20, %c0_21, %c0_22] : memref<2x1x8xf32, #tpu.memory_space<vmem>>, vector<2x1x8xf32>
    %51 = vector.shape_cast %50 : vector<2x1x8xf32> to vector<1x2x1x8xf32>
    %52 = vector.shape_cast %51 : vector<1x2x1x8xf32> to vector<1x2x1x8xf32>
    %53 = vector.broadcast %52 : vector<1x2x1x8xf32> to vector<8x2x1x8xf32>
    %54 = vector.shape_cast %53 : vector<8x2x1x8xf32> to vector<16x1x8xf32>
    "tpu.trace_start"() <{level = 10 : i32, message = "bqd,bkd->bqk"}> : () -> ()
    %cst_23 = arith.constant dense<0.000000e+00> : vector<16x8x8xf32>
    %55 = tpu.matmul %43, %46, %cst_23 {dimension_numbers = #tpu.dot_dimension_numbers<[2], [2], [1], [1], [0, 0, 0, 1, 1, 1], [0], [0]>} : vector<16x8x16xbf16>, vector<16x8x16xbf16>, vector<16x8x8xf32> -> vector<16x8x8xf32>
    "tpu.trace_stop"() : () -> ()
    %56 = vector.broadcast %54 : vector<16x1x8xf32> to vector<16x8x8xf32>
    %57 = arith.addf %55, %56 : vector<16x8x8xf32>
    %cst_24 = arith.constant dense<0xFF800000> : vector<16x8xf32>
    %58 = vector.multi_reduction <maximumf>, %57, %cst_24 [2] : vector<16x8x8xf32> to vector<16x8xf32>
    %59 = vector.shape_cast %58 : vector<16x8xf32> to vector<16x8x1xf32>
    %60 = vector.broadcast %59 : vector<16x8x1xf32> to vector<16x8x8xf32>
    %61 = arith.subf %57, %60 : vector<16x8x8xf32>
    %62 = math.exp %61 : vector<16x8x8xf32>
    %cst_25 = arith.constant dense<0.000000e+00> : vector<16x8xf32>
    %63 = vector.multi_reduction <add>, %62, %cst_25 [2] : vector<16x8x8xf32> to vector<16x8xf32>
    %64 = vector.shape_cast %63 : vector<16x8xf32> to vector<16x8x1xf32>
    %65 = tpu.reciprocal %64 {approx = true} : vector<16x8x1xf32> -> vector<16x8x1xf32>
    %66 = vector.broadcast %65 : vector<16x8x1xf32> to vector<16x8x8xf32>
    %67 = arith.mulf %62, %66 : vector<16x8x8xf32>
    %68 = arith.truncf %67 : vector<16x8x8xf32> to vector<16x8x8xbf16>
    "tpu.trace_start"() <{level = 10 : i32, message = "bqk,bkd->bqd"}> : () -> ()
    %cst_26 = arith.constant dense<0.000000e+00> : vector<16x8x16xf32>
    %69 = tpu.matmul %68, %49, %cst_26 {dimension_numbers = #tpu.dot_dimension_numbers<[2], [1], [1], [2], [0, 0, 0, 1, 1, 2], [0], [0]>} : vector<16x8x8xbf16>, vector<16x8x16xbf16>, vector<16x8x16xf32> -> vector<16x8x16xf32>
    "tpu.trace_stop"() : () -> ()
    %70 = vector.shape_cast %69 : vector<16x8x16xf32> to vector<8x16x16xf32>
    %71 = tpu.transpose %70, [1, 0, 2] : vector<8x16x16xf32> -> vector<16x8x16xf32>
    %72 = vector.shape_cast %71 : vector<16x8x16xf32> to vector<16x128xf32>
    %73 = arith.truncf %72 : vector<16x128xf32> to vector<16x128xbf16>
    %c0_27 = arith.constant 0 : index
    %c0_28 = arith.constant 0 : index
    %c0_29 = arith.constant 0 : index
    %74 = vector.load %arg8[%c0_27, %c0_28, %c0_29] : memref<1x128x128xbf16, #tpu.memory_space<vmem>>, vector<1x128x128xbf16>
    %75 = vector.shape_cast %74 : vector<1x128x128xbf16> to vector<128x128xbf16>
    %cst_30 = arith.constant dense<0.000000e+00> : vector<16x128xf32>
    %76 = tpu.matmul %73, %75, %cst_30 {dimension_numbers = #tpu.dot_dimension_numbers<[1], [0], [0], [1], [0, 0, 1, 1], [], []>} : vector<16x128xbf16>, vector<128x128xbf16>, vector<16x128xf32> -> vector<16x128xf32>
    %c0_31 = arith.constant 0 : index
    %c0_32 = arith.constant 0 : index
    %c0_33 = arith.constant 0 : index
    %77 = vector.load %arg9[%c0_31, %c0_32, %c0_33] : memref<1x1x128xf32, #tpu.memory_space<vmem>>, vector<1x1x128xf32>
    %78 = vector.shape_cast %77 : vector<1x1x128xf32> to vector<1x128xf32>
    %79 = vector.broadcast %78 : vector<1x128xf32> to vector<16x128xf32>
    %80 = arith.addf %76, %79 : vector<16x128xf32>
    %81 = vector.shape_cast %80 : vector<16x128xf32> to vector<2x8x128xf32>
    %82 = arith.addf %3, %81 : vector<2x8x128xf32>
    %83 = vector.shape_cast %82 : vector<2x8x128xf32> to vector<16x128xf32>
    %c0_34 = arith.constant 0 : index
    %c0_35 = arith.constant 0 : index
    %c0_36 = arith.constant 0 : index
    %84 = vector.load %arg10[%c0_34, %c0_35, %c0_36] : memref<1x1x128xf32, #tpu.memory_space<vmem>>, vector<1x1x128xf32>
    %85 = vector.shape_cast %84 : vector<1x1x128xf32> to vector<1x128xf32>
    %c0_37 = arith.constant 0 : index
    %c0_38 = arith.constant 0 : index
    %c0_39 = arith.constant 0 : index
    %86 = vector.load %arg11[%c0_37, %c0_38, %c0_39] : memref<1x1x128xf32, #tpu.memory_space<vmem>>, vector<1x1x128xf32>
    %87 = vector.shape_cast %86 : vector<1x1x128xf32> to vector<1x128xf32>
    %cst_40 = arith.constant dense<0.000000e+00> : vector<16xf32>
    %88 = vector.multi_reduction <add>, %83, %cst_40 [1] : vector<16x128xf32> to vector<16xf32>
    %89 = vector.shape_cast %88 : vector<16xf32> to vector<16x1xf32>
    %cst_41 = arith.constant 1.280000e+02 : f32
    %90 = vector.broadcast %cst_41 : f32 to vector<16x1xf32>
    %91 = arith.divf %89, %90 : vector<16x1xf32>
    %92 = vector.broadcast %91 : vector<16x1xf32> to vector<16x128xf32>
    %93 = arith.subf %83, %92 : vector<16x128xf32>
    %94 = arith.mulf %93, %93 : vector<16x128xf32>
    %cst_42 = arith.constant dense<0.000000e+00> : vector<16xf32>
    %95 = vector.multi_reduction <add>, %94, %cst_42 [1] : vector<16x128xf32> to vector<16xf32>
    %96 = vector.shape_cast %95 : vector<16xf32> to vector<16x1xf32>
    %cst_43 = arith.constant 1.280000e+02 : f32
    %97 = vector.broadcast %cst_43 : f32 to vector<16x1xf32>
    %98 = arith.divf %96, %97 : vector<16x1xf32>
    %99 = vector.broadcast %91 : vector<16x1xf32> to vector<16x128xf32>
    %100 = arith.subf %83, %99 : vector<16x128xf32>
    %cst_44 = arith.constant 9.99999974E-6 : f32
    %101 = vector.broadcast %cst_44 : f32 to vector<16x1xf32>
    %102 = arith.addf %98, %101 : vector<16x1xf32>
    %103 = math.rsqrt %102 : vector<16x1xf32>
    %104 = vector.broadcast %103 : vector<16x1xf32> to vector<16x128xf32>
    %105 = arith.mulf %100, %104 : vector<16x128xf32>
    %106 = vector.broadcast %85 : vector<1x128xf32> to vector<16x128xf32>
    %107 = arith.mulf %105, %106 : vector<16x128xf32>
    %108 = vector.broadcast %87 : vector<1x128xf32> to vector<16x128xf32>
    %109 = arith.addf %107, %108 : vector<16x128xf32>
    %110 = arith.truncf %109 : vector<16x128xf32> to vector<16x128xbf16>
    %c0_45 = arith.constant 0 : index
    %c0_46 = arith.constant 0 : index
    %c0_47 = arith.constant 0 : index
    %111 = vector.load %arg12[%c0_45, %c0_46, %c0_47] : memref<1x128x512xbf16, #tpu.memory_space<vmem>>, vector<1x128x512xbf16>
    %112 = vector.shape_cast %111 : vector<1x128x512xbf16> to vector<128x512xbf16>
    %cst_48 = arith.constant dense<0.000000e+00> : vector<16x512xf32>
    %113 = tpu.matmul %110, %112, %cst_48 {dimension_numbers = #tpu.dot_dimension_numbers<[1], [0], [0], [1], [0, 0, 1, 1], [], []>} : vector<16x128xbf16>, vector<128x512xbf16>, vector<16x512xf32> -> vector<16x512xf32>
    %c0_49 = arith.constant 0 : index
    %c0_50 = arith.constant 0 : index
    %c0_51 = arith.constant 0 : index
    %114 = vector.load %arg13[%c0_49, %c0_50, %c0_51] : memref<1x1x512xf32, #tpu.memory_space<vmem>>, vector<1x1x512xf32>
    %115 = vector.shape_cast %114 : vector<1x1x512xf32> to vector<1x512xf32>
    %116 = vector.broadcast %115 : vector<1x512xf32> to vector<16x512xf32>
    %117 = arith.addf %113, %116 : vector<16x512xf32>
    %118 = arith.mulf %117, %117 : vector<16x512xf32>
    %119 = arith.mulf %117, %118 : vector<16x512xf32>
    %cst_52 = arith.constant 4.471500e-02 : f32
    %120 = vector.broadcast %cst_52 : f32 to vector<16x512xf32>
    %121 = arith.mulf %120, %119 : vector<16x512xf32>
    %122 = arith.addf %117, %121 : vector<16x512xf32>
    %cst_53 = arith.constant 0.797884583 : f32
    %123 = vector.broadcast %cst_53 : f32 to vector<16x512xf32>
    %124 = arith.mulf %123, %122 : vector<16x512xf32>
    %125 = math.tanh %124 : vector<16x512xf32>
    %cst_54 = arith.constant 1.000000e+00 : f32
    %126 = vector.broadcast %cst_54 : f32 to vector<16x512xf32>
    %127 = arith.addf %126, %125 : vector<16x512xf32>
    %cst_55 = arith.constant 5.000000e-01 : f32
    %128 = vector.broadcast %cst_55 : f32 to vector<16x512xf32>
    %129 = arith.mulf %128, %127 : vector<16x512xf32>
    %130 = arith.mulf %117, %129 : vector<16x512xf32>
    %131 = arith.truncf %130 : vector<16x512xf32> to vector<16x512xbf16>
    %c0_56 = arith.constant 0 : index
    %c0_57 = arith.constant 0 : index
    %c0_58 = arith.constant 0 : index
    %132 = vector.load %arg14[%c0_56, %c0_57, %c0_58] : memref<1x512x128xbf16, #tpu.memory_space<vmem>>, vector<1x512x128xbf16>
    %133 = vector.shape_cast %132 : vector<1x512x128xbf16> to vector<512x128xbf16>
    %cst_59 = arith.constant dense<0.000000e+00> : vector<16x128xf32>
    %134 = tpu.matmul %131, %133, %cst_59 {dimension_numbers = #tpu.dot_dimension_numbers<[1], [0], [0], [1], [0, 0, 1, 1], [], []>} : vector<16x512xbf16>, vector<512x128xbf16>, vector<16x128xf32> -> vector<16x128xf32>
    %c0_60 = arith.constant 0 : index
    %c0_61 = arith.constant 0 : index
    %c0_62 = arith.constant 0 : index
    %135 = vector.load %arg15[%c0_60, %c0_61, %c0_62] : memref<1x1x128xf32, #tpu.memory_space<vmem>>, vector<1x1x128xf32>
    %136 = vector.shape_cast %135 : vector<1x1x128xf32> to vector<1x128xf32>
    %137 = vector.broadcast %136 : vector<1x128xf32> to vector<16x128xf32>
    %138 = arith.addf %134, %137 : vector<16x128xf32>
    %139 = vector.shape_cast %138 : vector<16x128xf32> to vector<2x8x128xf32>
    %140 = arith.addf %82, %139 : vector<2x8x128xf32>
    %c0_63 = arith.constant 0 : index
    %c0_64 = arith.constant 0 : index
    %c0_65 = arith.constant 0 : index
    %141 = vector.load %arg17[%c0_63, %c0_64, %c0_65] : memref<2x8x128xf32, #tpu.memory_space<vmem>>, vector<2x8x128xf32>
    tpu.vector_store %arg17[%c0_63, %c0_64, %c0_65], %140 {strides = array<i32>} : memref<2x8x128xf32, #tpu.memory_space<vmem>>, vector<2x8x128xf32>,
    %c2_i32 = arith.constant 2 : i32
    %142 = arith.cmpi eq, %arg1, %c2_i32 : i32
    %143 = arith.extui %142 : i1 to i32
    %c0_i32_66 = arith.constant 0 : i32
    %144 = arith.cmpi ne, %143, %c0_i32_66 : i32
    scf.if %144 {
      %c0_67 = arith.constant 0 : index
      %c0_68 = arith.constant 0 : index
      %c0_69 = arith.constant 0 : index
      %145 = vector.load %arg16[%c0_67, %c0_68, %c0_69] : memref<2x8x128xf32, #tpu.memory_space<vmem>>, vector<2x8x128xf32>
      tpu.vector_store %arg16[%c0_67, %c0_68, %c0_69], %140 {strides = array<i32>} : memref<2x8x128xf32, #tpu.memory_space<vmem>>, vector<2x8x128xf32>,
    } else {
    }
    return
  }
  func.func @transform_0(%arg0: i32, %arg1: i32) -> (i32, i32, i32) {
    %c0_i32 = arith.constant 0 : i32
    %c0_i32_0 = arith.constant 0 : i32
    %c0_i32_1 = arith.constant 0 : i32
    return %arg0, %c0_i32, %c0_i32_0 : i32, i32, i32
  }
  func.func @transform_1(%arg0: i32, %arg1: i32) -> (i32, i32, i32) {
    %c0_i32 = arith.constant 0 : i32
    %c0_i32_0 = arith.constant 0 : i32
    %c0_i32_1 = arith.constant 0 : i32
    return %arg0, %c0_i32, %c0_i32_0 : i32, i32, i32
  }
  func.func @transform_2(%arg0: i32, %arg1: i32) -> (i32, i32, i32) {
    %c0_i32 = arith.constant 0 : i32
    %c0_i32_0 = arith.constant 0 : i32
    %c0_i32_1 = arith.constant 0 : i32
    return %arg1, %c0_i32, %c0_i32_0 : i32, i32, i32
  }
  func.func @transform_3(%arg0: i32, %arg1: i32) -> (i32, i32, i32) {
    %c0_i32 = arith.constant 0 : i32
    %c0_i32_0 = arith.constant 0 : i32
    %c0_i32_1 = arith.constant 0 : i32
    return %arg1, %c0_i32, %c0_i32_0 : i32, i32, i32
  }
  func.func @transform_4(%arg0: i32, %arg1: i32) -> (i32, i32, i32) {
    %c0_i32 = arith.constant 0 : i32
    %c0_i32_0 = arith.constant 0 : i32
    %c0_i32_1 = arith.constant 0 : i32
    return %arg1, %c0_i32, %c0_i32_0 : i32, i32, i32
  }
  func.func @transform_5(%arg0: i32, %arg1: i32) -> (i32, i32, i32) {
    %c0_i32 = arith.constant 0 : i32
    %c0_i32_0 = arith.constant 0 : i32
    %c0_i32_1 = arith.constant 0 : i32
    return %arg1, %c0_i32, %c0_i32_0 : i32, i32, i32
  }
  func.func @transform_6(%arg0: i32, %arg1: i32) -> (i32, i32, i32) {
    %c0_i32 = arith.constant 0 : i32
    %c0_i32_0 = arith.constant 0 : i32
    %c0_i32_1 = arith.constant 0 : i32
    return %arg1, %c0_i32, %c0_i32_0 : i32, i32, i32
  }
  func.func @transform_7(%arg0: i32, %arg1: i32) -> (i32, i32, i32) {
    %c0_i32 = arith.constant 0 : i32
    %c0_i32_0 = arith.constant 0 : i32
    %c0_i32_1 = arith.constant 0 : i32
    return %arg1, %c0_i32, %c0_i32_0 : i32, i32, i32
  }
  func.func @transform_8(%arg0: i32, %arg1: i32) -> (i32, i32, i32) {
    %c0_i32 = arith.constant 0 : i32
    %c0_i32_0 = arith.constant 0 : i32
    %c0_i32_1 = arith.constant 0 : i32
    return %arg1, %c0_i32, %c0_i32_0 : i32, i32, i32
  }
  func.func @transform_9(%arg0: i32, %arg1: i32) -> (i32, i32, i32) {
    %c0_i32 = arith.constant 0 : i32
    %c0_i32_0 = arith.constant 0 : i32
    %c0_i32_1 = arith.constant 0 : i32
    return %arg1, %c0_i32, %c0_i32_0 : i32, i32, i32
  }
  func.func @transform_10(%arg0: i32, %arg1: i32) -> (i32, i32, i32) {
    %c0_i32 = arith.constant 0 : i32
    %c0_i32_0 = arith.constant 0 : i32
    %c0_i32_1 = arith.constant 0 : i32
    return %arg1, %c0_i32, %c0_i32_0 : i32, i32, i32
  }
  func.func @transform_11(%arg0: i32, %arg1: i32) -> (i32, i32, i32) {
    %c0_i32 = arith.constant 0 : i32
    %c0_i32_0 = arith.constant 0 : i32
    %c0_i32_1 = arith.constant 0 : i32
    return %arg1, %c0_i32, %c0_i32_0 : i32, i32, i32
  }
  func.func @transform_12(%arg0: i32, %arg1: i32) -> (i32, i32, i32) {
    %c0_i32 = arith.constant 0 : i32
    %c0_i32_0 = arith.constant 0 : i32
    %c0_i32_1 = arith.constant 0 : i32
    return %arg1, %c0_i32, %c0_i32_0 : i32, i32, i32
  }
  func.func @transform_13(%arg0: i32, %arg1: i32) -> (i32, i32, i32) {
    %c0_i32 = arith.constant 0 : i32
    %c0_i32_0 = arith.constant 0 : i32
    %c0_i32_1 = arith.constant 0 : i32
    return %arg1, %c0_i32, %c0_i32_0 : i32, i32, i32
  }
  func.func @transform_14(%arg0: i32, %arg1: i32) -> (i32, i32, i32) {
    %c0_i32 = arith.constant 0 : i32
    %c0_i32_0 = arith.constant 0 : i32
    %c0_i32_1 = arith.constant 0 : i32
    return %arg0, %c0_i32, %c0_i32_0 : i32, i32, i32
  }
}

</mosaic_0001>

<bundles_post_ra>
// kernel: tpu_custom_call.1
= control target key start
LH: loop header
LB: loop body
LE: loop exit
PB: predicated region body
PF: predicated region fallthrough
CT: control target
= control target key end

     0   :  { %s10083_s0 = inlined_call_operand.hbm [shape: f32[2,8,128], index: 0, kind: input, shape index: {}, may-alias: {0,14}]   ;;  %s10084_s1 = inlined_call_operand.hbm [shape: f32[2,1,8], index: 1, kind: input, shape index: {}]   ;;  %s10085_s2 = inlined_call_operand.hbm [shape: f32[3,1,128], index: 2, kind: input, shape index: {}]   ;;  %s10086_s3 = inlined_call_operand.hbm [shape: f32[3,1,128], index: 3, kind: input, shape index: {}]   ;;  %s10087_s4 = inlined_call_operand.hbm [shape: bf16[3,128,384], index: 4, kind: input, shape index: {}]   ;;  %s10088_s5 = inlined_call_operand.hbm [shape: f32[3,1,384], index: 5, kind: input, shape index: {}]   ;;  %s10089_s6 = inlined_call_operand.hbm [shape: bf16[3,128,128], index: 6, kind: input, shape index: {}]   ;;  %s10090_s7 = inlined_call_operand.hbm [shape: f32[3,1,128], index: 7, kind: input, shape index: {}]   ;;  %s10091_s8 = inlined_call_operand.hbm [shape: f32[3,1,128], index: 8, kind: input, shape index: {}]   ;;  %s10092_s9 = inlined_call_operand.hbm [shape: f32[3,1,128], index: 9, kind: input, shape index: {}]   ;;  %s10093_s10 = inlined_call_operand.hbm [shape: bf16[3,128,512], index: 10, kind: input, shape index: {}]   ;;  %s10094_s11 = inlined_call_operand.hbm [shape: f32[3,1,512], index: 11, kind: input, shape index: {}]   ;;  %s10095_s12 = inlined_call_operand.hbm [shape: bf16[3,512,128], index: 12, kind: input, shape index: {}]   ;;  %s10096_s13 = inlined_call_operand.hbm [shape: f32[3,1,128], index: 13, kind: input, shape index: {}]   ;;  %s10097_s14 = inlined_call_operand.hbm [shape: f32[2,8,128], index: 14, kind: output, shape index: {}, may-alias: {0,14}]  }
   0x1   :  { %10127 = sst [smem:[#allocation34_spill]] %s10083_s0 }
   0x2   :  { %10128 = sst [smem:[#allocation35_spill]] %s10085_s2 }
   0x3   :  { %10129 = sst [smem:[#allocation36_spill]] %s10086_s3 }
   0x4   :  { %10130 = sst [smem:[#allocation37_spill]] %s10087_s4 }
   0x5   :  { %10131 = sst [smem:[#allocation38_spill]] %s10096_s13 }
   0x6   :  { %10132 = sst [smem:[#allocation39_spill]] %s10097_s14 }
   0x7   :  { %19 = vsyncpa [#allocation4], 0 }
   0x8   :  { %20 = vsyncpa [#allocation7], 0 }
   0x9   :  { %21 = vsyncpa [#allocation5], 0  ;;  %s8147_s29 = smov 0   ;;  %s8149_s30 = smov 0  }
   0xa   :  { %s8151_s15 = smov 0   ;;  %s8153_s16 = smov 0  }
   0xb   :  { %s8155_s17 = smov 0   ;;  %s8157_s18 = smov 0  }
   0xc LB: > { %10133 = sst [smem:[#allocation25_spill]] %s8016_s30  ;;  %s8176_s19 = sadd.s32 4294967295, %s8032_s18   ;;  %s8032_s18 = sphi %s8157_s18, %s27_s18   ;;  %s8028_s17 = sphi %s8155_s17, %s10190_s17   ;;  %s8024_s16 = sphi %s8153_s16, %s10189_s16   ;;  %s8020_s15 = sphi %s8151_s15, %s10187_s15   ;;  %s8016_s30 = sphi %s8149_s30, %s10186_s30   ;;  %s8012_s29 = sphi %s8147_s29, %s10185_s29  }
   0xd   : > { %10134 = sst [smem:[#allocation26_spill]] %s8020_s15  ;;  %s36_s20 = sadd.s32 1, %s8028_s17 }
   0xe   : > { %10135 = sst [smem:[#allocation27_spill]] %s8024_s16  ;;  %p37_p0 = scmp.ge.s32.totalorder %s36_s20, 3 }
   0xf   : > { %10136 = sst [smem:[#allocation28_spill]] %s8032_s18  ;;  %s98_s21 = sadd.s32 1, %s8020_s15 }
  0x10   : > { %10137 = sst [smem:[#allocation29_spill]] %s8176_s19  ;;  %p105_p1 = scmp.ne.s32.totalorder %s8020_s15, %s8016_s30 }
  0x11   : > { %p106_p2 = scmp.eq.s32.totalorder %s8032_s18, 0  ;;  %s10192_s20 = smov (%p37_p0, %s36_s20), 0 }
  0x12   : > { %10138 = sst [smem:[#allocation30_spill]] %s10192_s20  ;;  %p111_p4 = scmp.ne.s32.totalorder %s8016_s30, %s8012_s29 }
  0x13   : > { %p8185_p3 = por %p106_p2, %p105_p1  ;;  %s95_s23 = ssub.s32 %s8028_s17, %s10192_s20 }
  0x14   : > { %p10102_p5 = scmp.eq.s32.totalorder %s8176_s19, 0  ;;  %p96_p6 = scmp.eq.s32.totalorder %s95_s23, 0 }
  0x15   : > { %s10139_s22 = scalar_select %p8185_p3, 1, 0 }
  0x16   : > { %p6517_p7 = scmp.ge.s32.totalorder %s8032_s18, 1  ;;  %p8196_p8 = por %p10102_p5, %p111_p4 }
  0x17   : > { %p434_p9 = scmp.lt.s32.totalorder %s8032_s18, 4  ;;  %s8034_s27 = smov [#allocation3]  }
  0x18   : > { %s10140_s24 = scalar_select %p8196_p8, 1, 0 }
  0x19   : > { %s8202_s25 = scalar_select %p96_p6, %s8020_s15, %s98_s21  }
  0x1a   : > { %10141 = sst [smem:[#allocation31_spill]] %s10140_s24  ;;  %p8204_p10 = pnand %p6517_p7, %p434_p9 }
  0x1b   : > { %10142 = sst [smem:[#allocation32_spill]] %s8202_s25  ;;  %s449_s28 = sshll.u32 %s8034_s27, 4  ;;  %s450_s28 = int_to_ptr.vmem [resolvable:$true] %s449_s28 }
  0x1c   : > { %s10143_s26 = scalar_select %p8204_p10, 1, 0 }
  0x1d   : > { %p7158_p11 = pneg %p8204_p10  ;;  %s10146_s0 = sld [smem:[#allocation34_spill]] }
  0x1e   : > { %10144 = sst [smem:[#allocation33_spill]] %s10143_s26 }
  0x1f   : > { %p8212_p12 = pnand %p7158_p11, %p10102_p5 }
  0x21   : > { %s10145_s29 = scalar_select %p8212_p12, 1, 0 }
  0x22   : > { %p10111_p1 = pneg %p8212_p12 }
  0x23   : > { %s7528_s25 = scalar_lea.hbm %s10146_s0, 256 }
  0x24   : > { %p7529_p0 = scmp.ne.s32.totalorder %s10146_s0, %s7528_s25  ;;  %p7535_p6 = scmp.lt.u32.totalorder %s7528_s25, %s10146_s0 }
  0x26   : > { %p7531_p2 = pnand %p10111_p1, %p7529_p0 }
  0x28   : > { %p7532_p4 = pneg %p7531_p2 }
  0x2a   : > { %p7537_p7 = pnand %p7535_p6, %p7532_p4 }
  0x2c   : > { %7540 = shalt.err (!%p7537_p7)
}
  0x2d   : > { %s7541_s21 = scalar_lea.vmem %s450_s28, 256  ;;  %p7549_p13 = scmp.lt.s32.totalorder %s450_s28, %s450_s28 }
  0x2e   : > { %p7542_p9 = scmp.ne.s32.totalorder %s450_s28, %s7541_s21  ;;  %p7550_p8 = scmp.lt.s32.totalorder %s7541_s21, %s7541_s21 }
  0x30   : > { %p7544_p11 = pnand %p7542_p9, %p10111_p1  ;;  %p7551_p10 = por %p7550_p8, %p7549_p13 }
  0x32   : > { %p7545_p5 = pneg %p7544_p11 }
  0x34   : > { %p7552_p3 = pnand %p7551_p10, %p7545_p5 }
  0x36   : > { %7555 = shalt.err (!%p7552_p3)
}
  0x37   : > { %s8035_s14 = smov 128   ;;  %s8036_s16 = smov 8  }
  0x38   : > { %7161 = dma.hbm_to_vmem [thread:$0]  (!%p8212_p12), %s10146_s0, 256, %s450_s28, [#allocation4], %s8035_s14, %s8035_s14, %s8036_s16  }
  0x39   : > { %s8241_s25 = sand.u32 1, %s8020_s15   ;;  %p10147_p0 = scmp.ne.s32.totalorder %s10139_s22, 0 }
  0x3a   : > { %p10148_p2 = scmp.lt.s32.totalorder %s8032_s18, 3  ;;  %s8252_s23 = sshll.u32 %s8028_s17, 4 }
  0x3b   : > { %s10150_s2 = sld [smem:[#allocation35_spill]]  ;;  %s482_s22 = scalar_lea.vmem [#allocation8], %s8241_s25 }
  0x3c   : > { %p8247_p5 = pnand %p10148_p2, %p10147_p0  ;;  %s489_s28 = sshll.u32 %s482_s22, 4  ;;  %s8261_s28 = int_to_ptr.vmem [resolvable:$true] %s489_s28 }
  0x3d   : > { %s10151_s3 = sld [smem:[#allocation36_spill]]  ;;  %s10152_s24 = sand.u32 1, %s8032_s18  }
  0x3e   : > { %s10149_s21 = scalar_select %p8247_p5, 1, 0 }
  0x3f   : > { %s8271_s0 = scalar_lea.sflag [#allocation4], %s10152_s24  ;;  %p8277_p8 = pneg %p8247_p5 }
  0x41   : > { %s8258_s19 = scalar_lea.hbm %s10150_s2, %s8252_s23  ;;  %s7561_s14 = scalar_lea.hbm %s10150_s2, 48 }
  0x42   : > { %s7556_s30 = scalar_lea.hbm %s8258_s19, 16  ;;  %p7562_p4 = scmp.lt.u32.totalorder %s8258_s19, %s10150_s2 }
  0x43   : > { %s8267_s20 = scalar_lea.hbm %s10151_s3, %s8252_s23  ;;  %p7557_p3 = scmp.ne.s32.totalorder %s8258_s19, %s7556_s30 }
  0x44   : > { %s10153_s27 = scalar_select %p8277_p8, 1, 0 }
  0x45   : > { %p7559_p10 = pnand %p8277_p8, %p7557_p3  ;;  %p7563_p6 = scmp.lt.u32.totalorder %s7561_s14, %s7556_s30 }
  0x46   : > { %p7565_p9 = scmp.lt.u32.totalorder %s7556_s30, %s8258_s19 }
  0x47   : > { %p7560_p13 = pneg %p7559_p10  ;;  %p7564_p7 = por %p7563_p6, %p7562_p4 }
  0x49   : > { %p7566_p11 = por %p7565_p9, %p7564_p7 }
  0x4b   : > { %p7567_p0 = pnand %p7566_p11, %p7560_p13 }
  0x4d   : > { %7570 = shalt.err (!%p7567_p0)
}
  0x4e   : > { %s7571_s24 = scalar_lea.vmem %s8261_s28, 16  ;;  %s8037_s15 = smov [#allocation8]  }
  0x4f   : > { %p7572_p2 = scmp.ne.s32.totalorder %s8261_s28, %s7571_s24  ;;  %s7576_s22 = sshll.u32 %s8037_s15, 4  ;;  %s7577_s22 = int_to_ptr.vmem [resolvable:$false] %s7576_s22 }
  0x50   : > { %s7578_s26 = scalar_lea.vmem %s7577_s22, 32  ;;  %p7579_p1 = scmp.lt.s32.totalorder %s8261_s28, %s7577_s22 }
  0x51   : > { %p7574_p3 = pnand %p7572_p2, %p8277_p8  ;;  %p7580_p12 = scmp.lt.s32.totalorder %s7578_s26, %s7571_s24 }
  0x53   : > { %p7575_p10 = pneg %p7574_p3  ;;  %p7581_p4 = por %p7580_p12, %p7579_p1 }
  0x55   : > { %p7582_p6 = pnand %p7581_p4, %p7575_p10 }
  0x57   : > { %7585 = shalt.err (!%p7582_p6)
}
  0x58   : > { %7168 = dma.hbm_to_vmem [thread:$0]  (!%p8247_p5), %s8258_s19, 16, %s8261_s28, %s8271_s0  }
  0x59   : > { %s499_s30 = scalar_lea.vmem [#allocation9], %s8241_s25  ;;  %s7116_s16 = smul.u32 192, %s8241_s25 }
  0x5a   : > { %s506_s14 = sshll.u32 %s499_s30, 4  ;;  %s7117_s24 = smul.u32 3072, %s8028_s17  ;;  %s507_s14 = int_to_ptr.vmem [resolvable:$true] %s506_s14 }
  0x5b   : > { %s7586_s15 = scalar_lea.hbm %s8267_s20, 16  ;;  %s7591_s2 = scalar_lea.hbm %s10151_s3, 48 }
  0x5c   : > { %p7587_p12 = scmp.ne.s32.totalorder %s8267_s20, %s7586_s15  ;;  %p7592_p7 = scmp.lt.u32.totalorder %s8267_s20, %s10151_s3 }
  0x5d   : > { %p7593_p9 = scmp.lt.u32.totalorder %s7591_s2, %s7586_s15  ;;  %p7595_p0 = scmp.lt.u32.totalorder %s7586_s15, %s8267_s20 }
  0x5e   : > { %p7589_p1 = pnand %p7587_p12, %p8277_p8 }
  0x5f   : > { %p7594_p11 = por %p7593_p9, %p7592_p7 }
  0x60   : > { %p7590_p13 = pneg %p7589_p1 }
  0x61   : > { %p7596_p2 = por %p7595_p0, %p7594_p11 }
  0x63   : > { %p7597_p3 = pnand %p7596_p2, %p7590_p13 }
  0x65   : > { %7600 = shalt.err (!%p7597_p3)
}
  0x66   : > { %s7601_s19 = scalar_lea.vmem %s507_s14, 16  ;;  %s8038_s28 = smov [#allocation9]  }
  0x67   : > { %p7602_p10 = scmp.ne.s32.totalorder %s507_s14, %s7601_s19  ;;  %s7606_s30 = sshll.u32 %s8038_s28, 4  ;;  %s7607_s30 = int_to_ptr.vmem [resolvable:$false] %s7606_s30 }
  0x68   : > { %s7608_s22 = scalar_lea.vmem %s7607_s30, 32  ;;  %p7609_p12 = scmp.lt.s32.totalorder %s507_s14, %s7607_s30 }
  0x69   : > { %p7604_p4 = pnand %p7602_p10, %p8277_p8  ;;  %p7610_p1 = scmp.lt.s32.totalorder %s7608_s22, %s7601_s19 }
  0x6b   : > { %p7605_p6 = pneg %p7604_p4  ;;  %p7611_p5 = por %p7610_p1, %p7609_p12 }
  0x6d   : > { %p7612_p7 = pnand %p7611_p5, %p7605_p6 }
  0x6f   : > { %7615 = shalt.err (!%p7612_p7)
}
  0x70   : > { %p10154_p9 = scmp.ne.s32.totalorder %s10149_s21, 0  ;;  %s10155_s4 = sld [smem:[#allocation37_spill]] }
  0x71   : > { %s517_s15 = scalar_lea.vmem [#allocation10], %s7116_s16 }
  0x72   : > { %7171 = dma.hbm_to_vmem [thread:$0]  (!%p10154_p9), %s8267_s20, 16, %s507_s14, %s8271_s0  }
  0x73   : > { %s524_s26 = sshll.u32 %s517_s15, 4  ;;  %s8329_s26 = int_to_ptr.vmem [resolvable:$true] %s524_s26 }
  0x76   : > { %s8325_s18 = scalar_lea.hbm %s10155_s4, %s7117_s24  ;;  %s7621_s28 = scalar_lea.hbm %s10155_s4, 9216 }
  0x77   : > { %s7616_s19 = scalar_lea.hbm %s8325_s18, 3072  ;;  %p7622_p0 = scmp.lt.u32.totalorder %s8325_s18, %s10155_s4 }
  0x78   : > { %p7617_p5 = scmp.ne.s32.totalorder %s8325_s18, %s7616_s19  ;;  %p7623_p2 = scmp.lt.u32.totalorder %s7621_s28, %s7616_s19 }
  0x79   : > { %p7625_p10 = scmp.lt.u32.totalorder %s7616_s19, %s8325_s18 }
  0x7a   : > { %p7619_p13 = pnand %p7617_p5, %p8277_p8  ;;  %p7624_p3 = por %p7623_p2, %p7622_p0 }
  0x7c   : > { %p7620_p11 = pneg %p7619_p13  ;;  %p7626_p4 = por %p7625_p10, %p7624_p3 }
  0x7e   : > { %p7627_p6 = pnand %p7626_p4, %p7620_p11 }
  0x80   : > { %7630 = shalt.err (!%p7627_p6)
}
  0x81   : > { %s7631_s16 = scalar_lea.vmem %s8329_s26, 3072  ;;  %s8039_s22 = smov [#allocation10]  }
  0x82   : > { %p7632_p12 = scmp.ne.s32.totalorder %s8329_s26, %s7631_s16  ;;  %s7636_s2 = sshll.u32 %s8039_s22, 4  ;;  %s7637_s2 = int_to_ptr.vmem [resolvable:$false] %s7636_s2 }
  0x83   : > { %s7638_s13 = scalar_lea.vmem %s7637_s2, 6144  ;;  %p7639_p5 = scmp.lt.s32.totalorder %s8329_s26, %s7637_s2 }
  0x84   : > { %p7634_p1 = pnand %p7632_p12, %p8277_p8  ;;  %p7640_p13 = scmp.lt.s32.totalorder %s7638_s13, %s7631_s16 }
  0x86   : > { %p7635_p7 = pneg %p7634_p1  ;;  %p7641_p0 = por %p7640_p13, %p7639_p5 }
  0x88   : > { %p7642_p2 = pnand %p7641_p0, %p7635_p7 }
  0x8a   : > { %7645 = shalt.err (!%p7642_p2)
}
  0x8b   : > { %s8040_s15 = smov 192   ;;  %s8041_s19 = smov 12  }
  0x8c   : > { %7174 = dma.hbm_to_vmem [thread:$0]  (!%p10154_p9), %s8325_s18, 3072, %s8329_s26, %s8271_s0, %s8040_s15, %s8040_s15, %s8041_s19  }
  0x8d   : > { %s7118_s20 = smul.u32 3, %s8241_s25  ;;  %s6525_s14 = sshll.u32 %s8241_s25, 6 }
  0x8e   : > { %s7119_s28 = smul.u32 48, %s8028_s17  ;;  %s6754_s24 = sshll.u32 %s8028_s17, 10 }
  0x8f   : > { %s538_s2 = scalar_lea.vmem [#allocation11], %s7118_s20  ;;  %s8365_s18 = scalar_lea.hbm %s10089_s6, %s6754_s24 }
  0x90   : > { %s8360_s22 = scalar_lea.hbm %s10088_s5, %s7119_s28  ;;  %s546_s13 = sshll.u32 %s538_s2, 4  ;;  %s547_s13 = int_to_ptr.vmem [resolvable:$true] %s546_s13 }
  0x91   : > { %s7646_s26 = scalar_lea.hbm %s8360_s22, 48  ;;  %s7651_s28 = scalar_lea.hbm %s10088_s5, 144 }
  0x92   : > { %p7647_p11 = scmp.ne.s32.totalorder %s8360_s22, %s7646_s26  ;;  %p7652_p4 = scmp.lt.u32.totalorder %s8360_s22, %s10088_s5 }
  0x93   : > { %p7653_p6 = scmp.lt.u32.totalorder %s7651_s28, %s7646_s26  ;;  %p7655_p1 = scmp.lt.u32.totalorder %s7646_s26, %s8360_s22 }
  0x94   : > { %p7649_p3 = pnand %p7647_p11, %p8277_p8 }
  0x95   : > { %p7654_p12 = por %p7653_p6, %p7652_p4 }
  0x96   : > { %p7650_p10 = pneg %p7649_p3 }
  0x97   : > { %p7656_p7 = por %p7655_p1, %p7654_p12 }
  0x99   : > { %p7657_p5 = pnand %p7656_p7, %p7650_p10 }
  0x9b   : > { %7660 = shalt.err (!%p7657_p5)
}
  0x9c   : > { %s7661_s3 = scalar_lea.vmem %s547_s13, 48  ;;  %s8042_s4 = smov [#allocation11]  }
  0x9d   : > { %p7662_p13 = scmp.ne.s32.totalorder %s547_s13, %s7661_s3  ;;  %s7666_s20 = sshll.u32 %s8042_s4, 4  ;;  %s7667_s20 = int_to_ptr.vmem [resolvable:$false] %s7666_s20 }
  0x9e   : > { %s7668_s24 = scalar_lea.vmem %s7667_s20, 96  ;;  %p7669_p11 = scmp.lt.s32.totalorder %s547_s13, %s7667_s20 }
  0x9f   : > { %p7664_p0 = pnand %p7662_p13, %p8277_p8  ;;  %p7670_p3 = scmp.lt.s32.totalorder %s7668_s24, %s7661_s3 }
  0xa1   : > { %p7665_p2 = pneg %p7664_p0  ;;  %p7671_p9 = por %p7670_p3, %p7669_p11 }
  0xa3   : > { %p7672_p4 = pnand %p7671_p9, %p7665_p2 }
  0xa5   : > { %7675 = shalt.err (!%p7672_p4)
}
  0xa6   : > { %p10156_p6 = scmp.ne.s32.totalorder %s10149_s21, 0  ;;  %s557_s2 = scalar_lea.vmem [#allocation12], %s6525_s14 }
  0xa7   : > { %s564_s26 = sshll.u32 %s557_s2, 4  ;;  %s7676_s15 = scalar_lea.hbm %s8365_s18, 1024  ;;  %s8387_s26 = int_to_ptr.vmem [resolvable:$true] %s564_s26 }
  0xa8   : > { %7177 = dma.hbm_to_vmem [thread:$0]  (!%p10156_p6), %s8360_s22, 48, %s547_s13, %s8271_s0  }
  0xa9   : > { %p7677_p10 = scmp.ne.s32.totalorder %s8365_s18, %s7676_s15  ;;  %s7681_s30 = scalar_lea.hbm %s10089_s6, 3072 }
  0xaa   : > { %p7682_p1 = scmp.lt.u32.totalorder %s8365_s18, %s10089_s6  ;;  %p7683_p7 = scmp.lt.u32.totalorder %s7681_s30, %s7676_s15 }
  0xab   : > { %p7679_p9 = pnand %p7677_p10, %p8277_p8  ;;  %p7685_p13 = scmp.lt.u32.totalorder %s7676_s15, %s8365_s18 }
  0xac   : > { %p7684_p5 = por %p7683_p7, %p7682_p1 }
  0xad   : > { %p7680_p12 = pneg %p7679_p9 }
  0xae   : > { %p7686_p0 = por %p7685_p13, %p7684_p5 }
  0xb0   : > { %p7687_p2 = pnand %p7686_p0, %p7680_p12 }
  0xb2   : > { %7690 = shalt.err (!%p7687_p2)
}
  0xb3   : > { %s7691_s14 = scalar_lea.vmem %s8387_s26, 1024  ;;  %s8043_s22 = smov [#allocation12]  }
  0xb4   : > { %p7692_p11 = scmp.ne.s32.totalorder %s8387_s26, %s7691_s14  ;;  %s7696_s13 = sshll.u32 %s8043_s22, 4  ;;  %s7697_s13 = int_to_ptr.vmem [resolvable:$false] %s7696_s13 }
  0xb5   : > { %s7698_s4 = scalar_lea.vmem %s7697_s13, 2048  ;;  %p7699_p10 = scmp.lt.s32.totalorder %s8387_s26, %s7697_s13 }
  0xb6   : > { %p7694_p3 = pnand %p7692_p11, %p8277_p8  ;;  %p7700_p9 = scmp.lt.s32.totalorder %s7698_s4, %s7691_s14 }
  0xb8   : > { %p7695_p4 = pneg %p7694_p3  ;;  %p7701_p1 = por %p7700_p9, %p7699_p10 }
  0xba   : > { %p7702_p7 = pnand %p7701_p1, %p7695_p4 }
  0xbc   : > { %7705 = shalt.err (!%p7702_p7)
}
  0xbd   : > { %s10120_s20 = smov 64   ;;  %s10121_s24 = smov 4  }
  0xbe   : > { %7180 = dma.hbm_to_vmem [thread:$0]  (!%p10156_p6), %s8365_s18, 1024, %s8387_s26, %s8271_s0, %s10120_s20, %s10120_s20, %s10121_s24  }
  0xbf   : > { %s8418_s19 = scalar_lea.hbm %s10090_s7, %s8252_s23  ;;  %s577_s28 = scalar_lea.vmem [#allocation13], %s8241_s25 }
  0xc0   : > { %s584_s30 = sshll.u32 %s577_s28, 4  ;;  %s8425_s14 = scalar_lea.hbm %s10091_s8, %s8252_s23  ;;  %s585_s30 = int_to_ptr.vmem [resolvable:$true] %s584_s30 }
  0xc1   : > { %s7706_s22 = scalar_lea.hbm %s8418_s19, 16  ;;  %s7711_s13 = scalar_lea.hbm %s10090_s7, 48 }
  0xc2   : > { %p7707_p12 = scmp.ne.s32.totalorder %s8418_s19, %s7706_s22  ;;  %p7712_p0 = scmp.lt.u32.totalorder %s8418_s19, %s10090_s7 }
  0xc3   : > { %p7713_p2 = scmp.lt.u32.totalorder %s7711_s13, %s7706_s22  ;;  %p7715_p3 = scmp.lt.u32.totalorder %s7706_s22, %s8418_s19 }
  0xc4   : > { %p7709_p5 = pnand %p7707_p12, %p8277_p8 }
  0xc5   : > { %p7714_p11 = por %p7713_p2, %p7712_p0 }
  0xc6   : > { %p7710_p13 = pneg %p7709_p5 }
  0xc7   : > { %p7716_p4 = por %p7715_p3, %p7714_p11 }
  0xc9   : > { %p7717_p10 = pnand %p7716_p4, %p7710_p13 }
  0xcb   : > { %7720 = shalt.err (!%p7717_p10)
}
  0xcc   : > { %s7721_s15 = scalar_lea.vmem %s585_s30, 16  ;;  %s8046_s28 = smov [#allocation13]  }
  0xcd   : > { %p7722_p9 = scmp.ne.s32.totalorder %s585_s30, %s7721_s15  ;;  %s7726_s16 = sshll.u32 %s8046_s28, 4  ;;  %s7727_s16 = int_to_ptr.vmem [resolvable:$false] %s7726_s16 }
  0xce   : > { %s7728_s3 = scalar_lea.vmem %s7727_s16, 32  ;;  %p7729_p12 = scmp.lt.s32.totalorder %s585_s30, %s7727_s16 }
  0xcf   : > { %p7724_p1 = pnand %p7722_p9, %p8277_p8  ;;  %p7730_p5 = scmp.lt.s32.totalorder %s7728_s3, %s7721_s15 }
  0xd1   : > { %p7725_p7 = pneg %p7724_p1  ;;  %p7731_p6 = por %p7730_p5, %p7729_p12 }
  0xd3   : > { %p7732_p0 = pnand %p7731_p6, %p7725_p7 }
  0xd5   : > { %7735 = shalt.err (!%p7732_p0)
}
  0xd6   : > { %p10157_p2 = scmp.ne.s32.totalorder %s10149_s21, 0  ;;  %s594_s22 = scalar_lea.vmem [#allocation14], %s8241_s25 }
  0xd7   : > { %s601_s18 = sshll.u32 %s594_s22, 4  ;;  %s8450_s4 = scalar_lea.hbm %s10092_s9, %s8252_s23  ;;  %s602_s18 = int_to_ptr.vmem [resolvable:$true] %s601_s18 }
  0xd8   : > { %7183 = dma.hbm_to_vmem [thread:$0]  (!%p10157_p2), %s8418_s19, 16, %s585_s30, %s8271_s0  }
  0xd9   : > { %s7736_s2 = scalar_lea.hbm %s8425_s14, 16  ;;  %s7741_s16 = scalar_lea.hbm %s10091_s8, 48 }
  0xda   : > { %p7737_p6 = scmp.ne.s32.totalorder %s8425_s14, %s7736_s2  ;;  %p7742_p3 = scmp.lt.u32.totalorder %s8425_s14, %s10091_s8 }
  0xdb   : > { %p7743_p4 = scmp.lt.u32.totalorder %s7741_s16, %s7736_s2  ;;  %p7745_p9 = scmp.lt.u32.totalorder %s7736_s2, %s8425_s14 }
  0xdc   : > { %p7739_p13 = pnand %p7737_p6, %p8277_p8 }
  0xdd   : > { %p7744_p10 = por %p7743_p4, %p7742_p3 }
  0xde   : > { %p7740_p11 = pneg %p7739_p13 }
  0xdf   : > { %p7746_p1 = por %p7745_p9, %p7744_p10 }
  0xe1   : > { %p7747_p7 = pnand %p7746_p1, %p7740_p11 }
  0xe3   : > { %7750 = shalt.err (!%p7747_p7)
}
  0xe4   : > { %s7751_s19 = scalar_lea.vmem %s602_s18, 16  ;;  %s8047_s30 = smov [#allocation14]  }
  0xe5   : > { %p7752_p12 = scmp.ne.s32.totalorder %s602_s18, %s7751_s19  ;;  %s7756_s22 = sshll.u32 %s8047_s30, 4  ;;  %s7757_s22 = int_to_ptr.vmem [resolvable:$false] %s7756_s22 }
  0xe6   : > { %s7758_s26 = scalar_lea.vmem %s7757_s22, 32  ;;  %p7759_p6 = scmp.lt.s32.totalorder %s602_s18, %s7757_s22 }
  0xe7   : > { %p7754_p5 = pnand %p7752_p12, %p8277_p8  ;;  %p7760_p13 = scmp.lt.s32.totalorder %s7758_s26, %s7751_s19 }
  0xe9   : > { %p7755_p0 = pneg %p7754_p5  ;;  %p7761_p2 = por %p7760_p13, %p7759_p6 }
  0xeb   : > { %p7762_p3 = pnand %p7761_p2, %p7755_p0 }
  0xed   : > { %7765 = shalt.err (!%p7762_p3)
}
  0xee   : > { %p10158_p4 = scmp.ne.s32.totalorder %s10149_s21, 0  ;;  %s611_s20 = scalar_lea.vmem [#allocation15], %s8241_s25 }
  0xef   : > { %s618_s13 = sshll.u32 %s611_s20, 4  ;;  %s10122_s2 = sshll.u32 %s8241_s25, 8  ;;  %s619_s13 = int_to_ptr.vmem [resolvable:$true] %s618_s13 }
  0xf0   : > { %7186 = dma.hbm_to_vmem [thread:$0]  (!%p10158_p4), %s8425_s14, 16, %s602_s18, %s8271_s0  }
  0xf1   : > { %s7766_s15 = scalar_lea.hbm %s8450_s4, 16  ;;  %s7771_s3 = scalar_lea.hbm %s10092_s9, 48 }
  0xf2   : > { %p7767_p11 = scmp.ne.s32.totalorder %s8450_s4, %s7766_s15  ;;  %p7772_p9 = scmp.lt.u32.totalorder %s8450_s4, %s10092_s9 }
  0xf3   : > { %p7773_p1 = scmp.lt.u32.totalorder %s7771_s3, %s7766_s15  ;;  %p7775_p12 = scmp.lt.u32.totalorder %s7766_s15, %s8450_s4 }
  0xf4   : > { %p7769_p2 = pnand %p7767_p11, %p8277_p8 }
  0xf5   : > { %p7774_p7 = por %p7773_p1, %p7772_p9 }
  0xf6   : > { %p7770_p10 = pneg %p7769_p2 }
  0xf7   : > { %p7776_p5 = por %p7775_p12, %p7774_p7 }
  0xf9   : > { %p7777_p0 = pnand %p7776_p5, %p7770_p10 }
  0xfb   : > { %7780 = shalt.err (!%p7777_p0)
}
  0xfc   : > { %s7781_s14 = scalar_lea.vmem %s619_s13, 16  ;;  %s8048_s18 = smov [#allocation15]  }
  0xfd   : > { %p7782_p6 = scmp.ne.s32.totalorder %s619_s13, %s7781_s14  ;;  %s7786_s22 = sshll.u32 %s8048_s18, 4  ;;  %s7787_s22 = int_to_ptr.vmem [resolvable:$false] %s7786_s22 }
  0xfe   : > { %s7788_s26 = scalar_lea.vmem %s7787_s22, 32  ;;  %p7789_p11 = scmp.lt.s32.totalorder %s619_s13, %s7787_s22 }
  0xff   : > { %p7784_p13 = pnand %p7782_p6, %p8277_p8  ;;  %p7790_p2 = scmp.lt.s32.totalorder %s7788_s26, %s7781_s14 }
 0x101   : > { %p7785_p3 = pneg %p7784_p13  ;;  %p7791_p4 = por %p7790_p2, %p7789_p11 }
 0x103   : > { %p7792_p1 = pnand %p7791_p4, %p7785_p3 }
 0x105   : > { %7795 = shalt.err (!%p7792_p1)
}
 0x106   : > { %p10159_p9 = scmp.ne.s32.totalorder %s10149_s21, 0  ;;  %s6755_s20 = sshll.u32 %s8028_s17, 12 }
 0x107   : > { %s8496_s16 = scalar_lea.hbm %s10093_s10, %s6755_s20  ;;  %s629_s3 = scalar_lea.vmem [#allocation16], %s10122_s2 }
 0x108   : > { %7189 = dma.hbm_to_vmem [thread:$0]  (!%p10159_p9), %s8450_s4, 16, %s619_s13, %s8271_s0  }
 0x109   : > { %s636_s19 = sshll.u32 %s629_s3, 4  ;;  %s7796_s30 = scalar_lea.hbm %s8496_s16, 4096  ;;  %s8500_s19 = int_to_ptr.vmem [resolvable:$true] %s636_s19 }
 0x10a   : > { %p7797_p4 = scmp.ne.s32.totalorder %s8496_s16, %s7796_s30  ;;  %s7801_s14 = scalar_lea.hbm %s10093_s10, 12288 }
 0x10b   : > { %p7802_p12 = scmp.lt.u32.totalorder %s8496_s16, %s10093_s10  ;;  %p7803_p5 = scmp.lt.u32.totalorder %s7801_s14, %s7796_s30 }
 0x10c   : > { %p7799_p10 = pnand %p7797_p4, %p8277_p8  ;;  %p7805_p6 = scmp.lt.u32.totalorder %s7796_s30, %s8496_s16 }
 0x10d   : > { %p7804_p0 = por %p7803_p5, %p7802_p12 }
 0x10e   : > { %p7800_p7 = pneg %p7799_p10 }
 0x10f   : > { %p7806_p13 = por %p7805_p6, %p7804_p0 }
 0x111   : > { %p7807_p3 = pnand %p7806_p13, %p7800_p7 }
 0x113   : > { %7810 = shalt.err (!%p7807_p3)
}
 0x114   : > { %s7811_s26 = scalar_lea.vmem %s8500_s19, 4096  ;;  %s8049_s15 = smov [#allocation16]  }
 0x115   : > { %p7812_p11 = scmp.ne.s32.totalorder %s8500_s19, %s7811_s26  ;;  %s7816_s28 = sshll.u32 %s8049_s15, 4  ;;  %s7817_s28 = int_to_ptr.vmem [resolvable:$false] %s7816_s28 }
 0x116   : > { %s7818_s3 = scalar_lea.vmem %s7817_s28, 8192  ;;  %p7819_p4 = scmp.lt.s32.totalorder %s8500_s19, %s7817_s28 }
 0x117   : > { %p7814_p2 = pnand %p7812_p11, %p8277_p8  ;;  %p7820_p10 = scmp.lt.s32.totalorder %s7818_s3, %s7811_s26 }
 0x119   : > { %p7815_p1 = pneg %p7814_p2  ;;  %p7821_p12 = por %p7820_p10, %p7819_p4 }
 0x11b   : > { %p7822_p5 = pnand %p7821_p12, %p7815_p1 }
 0x11d   : > { %7825 = shalt.err (!%p7822_p5)
}
 0x11e   : > { %s8050_s30 = smov 256   ;;  %s8051_s4 = smov 16  }
 0x11f   : > { %7192 = dma.hbm_to_vmem [thread:$0]  (!%p10159_p9), %s8496_s16, 4096, %s8500_s19, %s8271_s0, %s8050_s30, %s8050_s30, %s8051_s4  }
 0x120   : > { %s6534_s13 = sshll.u32 %s8241_s25, 2  ;;  %s6756_s14 = sshll.u32 %s8028_s17, 6 }
 0x121   : > { %s8530_s26 = scalar_lea.hbm %s10094_s11, %s6756_s14  ;;  %s650_s15 = scalar_lea.vmem [#allocation17], %s6534_s13 }
 0x122   : > { %s658_s28 = sshll.u32 %s650_s15, 4  ;;  %s8537_s2 = scalar_lea.hbm %s10095_s12, %s6755_s20  ;;  %s659_s28 = int_to_ptr.vmem [resolvable:$true] %s658_s28 }
 0x123   : > { %s7826_s16 = scalar_lea.hbm %s8530_s26, 64  ;;  %s7831_s14 = scalar_lea.hbm %s10094_s11, 192 }
 0x124   : > { %p7827_p7 = scmp.ne.s32.totalorder %s8530_s26, %s7826_s16  ;;  %p7832_p13 = scmp.lt.u32.totalorder %s8530_s26, %s10094_s11 }
 0x125   : > { %p7833_p3 = scmp.lt.u32.totalorder %s7831_s14, %s7826_s16  ;;  %p7835_p2 = scmp.lt.u32.totalorder %s7826_s16, %s8530_s26 }
 0x126   : > { %p7829_p0 = pnand %p7827_p7, %p8277_p8 }
 0x127   : > { %p7834_p11 = por %p7833_p3, %p7832_p13 }
 0x128   : > { %p7830_p6 = pneg %p7829_p0 }
 0x129   : > { %p7836_p1 = por %p7835_p2, %p7834_p11 }
 0x12b   : > { %p7837_p4 = pnand %p7836_p1, %p7830_p6 }
 0x12d   : > { %7840 = shalt.err (!%p7837_p4)
}
 0x12e   : > { %s7841_s24 = scalar_lea.vmem %s659_s28, 64  ;;  %s8052_s20 = smov [#allocation17]  }
 0x12f   : > { %p7842_p10 = scmp.ne.s32.totalorder %s659_s28, %s7841_s24  ;;  %s7846_s13 = sshll.u32 %s8052_s20, 4  ;;  %s7847_s13 = int_to_ptr.vmem [resolvable:$false] %s7846_s13 }
 0x130   : > { %s7848_s15 = scalar_lea.vmem %s7847_s13, 128  ;;  %p7849_p7 = scmp.lt.s32.totalorder %s659_s28, %s7847_s13 }
 0x131   : > { %p7844_p12 = pnand %p7842_p10, %p8277_p8  ;;  %p7850_p0 = scmp.lt.s32.totalorder %s7848_s15, %s7841_s24 }
 0x133   : > { %p7845_p5 = pneg %p7844_p12  ;;  %p7851_p9 = por %p7850_p0, %p7849_p7 }
 0x135   : > { %p7852_p3 = pnand %p7851_p9, %p7845_p5 }
 0x137   : > { %7855 = shalt.err (!%p7852_p3)
}
 0x138   : > { %p10160_p13 = scmp.ne.s32.totalorder %s10149_s21, 0  ;;  %s10161_s3 = sshll.u32 %s8241_s25, 8 }
 0x139   : > { %s669_s16 = scalar_lea.vmem [#allocation18], %s10161_s3  ;;  %s8053_s30 = smov [#allocation6]  }
 0x13a   : > { %7195 = dma.hbm_to_vmem [thread:$0]  (!%p10160_p13), %s8530_s26, 64, %s659_s28, %s8271_s0  }
 0x13b   : > { %s676_s19 = sshll.u32 %s669_s16, 4  ;;  %s8561_s14 = sshll.u32 %s8053_s30, 4  ;;  %s8559_s19 = int_to_ptr.vmem [resolvable:$true] %s676_s19  ;;  %s466_s14 = int_to_ptr.vmem [resolvable:$true] %s8561_s14 }
 0x13c   : > { %s7856_s18 = scalar_lea.hbm %s8537_s2, 4096  ;;  %s7861_s20 = scalar_lea.hbm %s10095_s12, 12288 }
 0x13d   : > { %p7857_p9 = scmp.ne.s32.totalorder %s8537_s2, %s7856_s18  ;;  %p7862_p2 = scmp.lt.u32.totalorder %s8537_s2, %s10095_s12 }
 0x13e   : > { %p7863_p1 = scmp.lt.u32.totalorder %s7861_s20, %s7856_s18  ;;  %p7865_p10 = scmp.lt.u32.totalorder %s7856_s18, %s8537_s2 }
 0x13f   : > { %p7859_p6 = pnand %p7857_p9, %p8277_p8 }
 0x140   : > { %p7864_p4 = por %p7863_p1, %p7862_p2 }
 0x141   : > { %p7860_p11 = pneg %p7859_p6 }
 0x142   : > { %p7866_p12 = por %p7865_p10, %p7864_p4 }
 0x144   : > { %p7867_p5 = pnand %p7866_p12, %p7860_p11 }
 0x146   : > { %7870 = shalt.err (!%p7867_p5)
}
 0x147   : > { %s7871_s26 = scalar_lea.vmem %s8559_s19, 4096  ;;  %s8054_s28 = smov [#allocation18]  }
 0x148   : > { %p7872_p7 = scmp.ne.s32.totalorder %s8559_s19, %s7871_s26  ;;  %s7876_s3 = sshll.u32 %s8054_s28, 4  ;;  %s7877_s3 = int_to_ptr.vmem [resolvable:$false] %s7876_s3 }
 0x149   : > { %s7878_s16 = scalar_lea.vmem %s7877_s3, 8192  ;;  %p7879_p9 = scmp.lt.s32.totalorder %s8559_s19, %s7877_s3 }
 0x14a   : > { %p7874_p0 = pnand %p7872_p7, %p8277_p8  ;;  %p7880_p6 = scmp.lt.s32.totalorder %s7878_s16, %s7871_s26 }
 0x14c   : > { %p7875_p3 = pneg %p7874_p0  ;;  %p7881_p2 = por %p7880_p6, %p7879_p9 }
 0x14e   : > { %p7882_p1 = pnand %p7881_p2, %p7875_p3 }
 0x150   : > { %7885 = shalt.err (!%p7882_p1)
}
 0x151   : > { %s10162_s30 = smov 4   ;;  %s10163_s18 = smov 64  }
 0x152   : > { %7198 = dma.hbm_to_vmem [thread:$0]  (!%p10160_p13), %s8537_s2, 4096, %s8559_s19, %s8271_s0, %s10163_s18, %s10163_s18, %s10162_s30  }
 0x153   : > { %s7886_s20 = scalar_lea.hbm %s10084_s1, 32  ;;  %p10164_p4 = scmp.ne.s32.totalorder %s10145_s29, 0 }
 0x154   : > { %p7887_p11 = scmp.ne.s32.totalorder %s10084_s1, %s7886_s20  ;;  %p7893_p7 = scmp.lt.u32.totalorder %s7886_s20, %s10084_s1 }
 0x155   : > { %p10165_p10 = pneg %p10164_p4 }
 0x157   : > { %p7889_p12 = pnand %p7887_p11, %p10165_p10 }
 0x159   : > { %p7890_p5 = pneg %p7889_p12 }
 0x15b   : > { %p7895_p0 = pnand %p7893_p7, %p7890_p5 }
 0x15d   : > { %7898 = shalt.err (!%p7895_p0)
}
 0x15e   : > { %s7899_s2 = scalar_lea.vmem %s466_s14, 32  ;;  %p10166_p9 = pmov %p10165_p10 }
 0x15f   : > { %p7900_p3 = scmp.ne.s32.totalorder %s466_s14, %s7899_s2  ;;  %p7907_p1 = scmp.lt.s32.totalorder %s466_s14, %s466_s14 }
 0x160   : > { %p7908_p13 = scmp.lt.s32.totalorder %s7899_s2, %s7899_s2 }
 0x161   : > { %p7902_p6 = pnand %p7900_p3, %p10166_p9 }
 0x162   : > { %p7909_p8 = por %p7908_p13, %p7907_p1 }
 0x163   : > { %p7903_p2 = pneg %p7902_p6 }
 0x165   : > { %p7910_p10 = pnand %p7909_p8, %p7903_p2 }
 0x167   : > { %7913 = shalt.err (!%p7910_p10)
}
 0x168   : > { %s8055_s19 = smov 1   ;;  %s10167_s22 = sld [smem:[#allocation38_spill]] }
 0x169   : > { %7164 = dma.hbm_to_vmem [thread:$0]  (!%p10164_p4), %s10084_s1, 32, %s466_s14, [#allocation7], %s8051_s4, %s8051_s4, %s8055_s19  }
 0x16a   : > { %s689_s20 = scalar_lea.vmem [#allocation19], %s8241_s25  ;;  %p10168_p13 = scmp.ne.s32.totalorder %s10153_s27, 0 }
 0x16b   : > { %s696_s29 = sshll.u32 %s689_s20, 4  ;;  %s697_s29 = int_to_ptr.vmem [resolvable:$true] %s696_s29 }
 0x16e   : > { %s8615_s24 = scalar_lea.hbm %s10167_s22, %s8252_s23  ;;  %s7919_s4 = scalar_lea.hbm %s10167_s22, 48 }
 0x16f   : > { %s7914_s13 = scalar_lea.hbm %s8615_s24, 16  ;;  %p7920_p4 = scmp.lt.u32.totalorder %s8615_s24, %s10167_s22 }
 0x170   : > { %p7915_p8 = scmp.ne.s32.totalorder %s8615_s24, %s7914_s13  ;;  %p7921_p5 = scmp.lt.u32.totalorder %s7919_s4, %s7914_s13 }
 0x171   : > { %p7923_p0 = scmp.lt.u32.totalorder %s7914_s13, %s8615_s24 }
 0x172   : > { %p7917_p11 = pnand %p7915_p8, %p10168_p13  ;;  %p7922_p7 = por %p7921_p5, %p7920_p4 }
 0x174   : > { %p7918_p12 = pneg %p7917_p11  ;;  %p7924_p3 = por %p7923_p0, %p7922_p7 }
 0x176   : > { %p7925_p9 = pnand %p7924_p3, %p7918_p12 }
 0x178   : > { %7928 = shalt.err (!%p7925_p9)
}
 0x179   : > { %s7929_s25 = scalar_lea.vmem %s697_s29, 16  ;;  %s8056_s23 = smov [#allocation19]  }
 0x17a   : > { %p7930_p6 = scmp.ne.s32.totalorder %s697_s29, %s7929_s25  ;;  %s7934_s2 = sshll.u32 %s8056_s23, 4  ;;  %s7935_s2 = int_to_ptr.vmem [resolvable:$false] %s7934_s2 }
 0x17b   : > { %s7936_s19 = scalar_lea.vmem %s7935_s2, 32  ;;  %p7937_p10 = scmp.lt.s32.totalorder %s697_s29, %s7935_s2 }
 0x17c   : > { %p7932_p2 = pnand %p7930_p6, %p10168_p13  ;;  %p7938_p8 = scmp.lt.s32.totalorder %s7936_s19, %s7929_s25 }
 0x17e   : > { %p7933_p1 = pneg %p7932_p2  ;;  %p7939_p11 = por %p7938_p8, %p7937_p10 }
 0x180   : > { %p7940_p4 = pnand %p7939_p11, %p7933_p1 }
 0x182   : > { %7943 = shalt.err (!%p7940_p4)
}
 0x183   : > { %p10169_p5 = scmp.ne.s32.totalorder %s10149_s21, 0  ;;  %s10170_s3 = sld [smem:[#allocation33_spill]] }
 0x185   : > { %7201 = dma.hbm_to_vmem [thread:$0]  (!%p10169_p5), %s8615_s24, 16, %s697_s29, %s8271_s0  }
 0x189   : > { %p10171_p12 = scmp.ne.s32.totalorder %s10170_s3, 0 }
 0x18a   : > { %s10172_s27 = sld [smem:[#allocation29_spill]] (!%p10171_p12) }
 0x18b   : > { %705 = sbr.rel (%p10171_p12) target bundleno = 3191 (0xc77), region = 76 }
 0x190   : > { %p10173_p13 = scmp.eq.s32.totalorder (!%p10171_p12), %s10172_s27, 0 }
 0x192   : > { %7995 = dma.done.wait (%p10173_p13), [#allocation4], 256   ;;  %p10174_p7 = pmov %p10173_p13 }
 0x194   : > { %7997 = vsyncadd (%p10174_p7), [#allocation4], 4294967040  ;;  %p10175_p0 = pmov %p10174_p7 }
 0x196   : > { %7999 = dma.done.wait (%p10175_p0), [#allocation7], 32   ;;  %p10176_p3 = pmov %p10175_p0 }
 0x197   : > { %s10177_s21 = sld [smem:[#allocation25_spill]]  ;;  %s10178_s16 = sld [smem:[#allocation31_spill]] }
 0x198   : > { %8001 = vsyncadd (%p10176_p3), [#allocation7], 4294967264  ;;  %s715_s30 = sand.u32 1, %s10172_s27  }
 0x199   : > { %s716_s18 = scalar_lea.sflag [#allocation4], %s715_s30 }
 0x19d   : > { %s8648_s0 = sand.u32 1, %s10177_s21   ;;  %p10179_p9 = scmp.ne.s32.totalorder %s10178_s16, 0 }
 0x19e   : > { %s718_s24 = scalar_lea.vmem [#allocation8], %s8648_s0 }
 0x19f   : > { %8003 = dma.done.wait (%p10179_p9), %s716_s18, 12496  }
 0x1a0   : > { %8005 = vsyncadd (%p10179_p9), %s716_s18, 4294954800  ;;  %s7120_s20 = smul.u32 192, %s8648_s0  ;;  %s6544_s13 = sshll.u32 %s8648_s0, 6 }
 0x1a1   : > { %s7121_s29 = smul.u32 3, %s8648_s0  ;;  %s6545_s15 = sshll.u32 %s8648_s0, 8 }
 0x1a2   : > { %s6546_s26 = sshll.u32 %s8648_s0, 2  ;;  %s726_s4 = scalar_lea.vmem [#allocation9], %s8648_s0 }
 0x1a3   : > { %s8661_s14 = scalar_lea.vmem [#allocation10], %s7120_s20  ;;  %s8663_s28 = scalar_lea.vmem [#allocation11], %s7121_s29 }
 0x1a4   : > { %s8665_s25 = scalar_lea.vmem [#allocation12], %s6544_s13  ;;  %s761_s23 = scalar_lea.vmem [#allocation13], %s8648_s0 }
 0x1a5   : > { %s769_s2 = scalar_lea.vmem [#allocation14], %s8648_s0  ;;  %s777_s19 = scalar_lea.vmem [#allocation15], %s8648_s0 }
 0x1a6   : > { %s8670_s3 = scalar_lea.vmem [#allocation16], %s6545_s15  ;;  %s8672_s27 = scalar_lea.vmem [#allocation17], %s6546_s26 }
 0x1a7   : > { %s8674_s21 = scalar_lea.vmem [#allocation18], %s6545_s15  ;;  %s812_s16 = scalar_lea.vmem [#allocation19], %s8648_s0 }
 0x1a8   : > { %s10180_s30 = sld [smem:[#allocation27_spill]] }
 0x1ae   : > { %p6548_p6 = scmp.ne.s32.totalorder %s10180_s30, 0 }
 0x1af   : > { %v909_v0 = vld [vmem:[#allocation3] sm:$0xff] (!%p6548_p6)  ;;  %v910_v1 = vld [vmem:[#allocation3 + $0x8] sm:$0xff] (!%p6548_p6) }
 0x1b0   : > { %908 = sbr.rel (%p6548_p6) target bundleno = 439 (0x1b7), region = 136  ;;  %911 = vst [vmem:[#allocation2] sm:$0xff] (!%p6548_p6), %v909_v0  ;;  %912 = vst [vmem:[#allocation2 + $0x8] sm:$0xff] (!%p6548_p6), %v910_v1 }
 0x1b7 PF: > { %v913_v2 = vld [vmem:[#allocation2] sm:$0xff]  ;;  %v914_v3 = vld [vmem:[#allocation2 + $0x8] sm:$0xff]  ;;  %v8057_v6 = vmov 0.0   ;;  %v8058_v32 = vmov 0   ;;  %vm8059_vm0 = vmmov 0   ;;  %v991_v55 = vlaneseq  ;;  %s8060_s18 = smov 96  }
 0x1b8   : > { %917 = vadd.xlane.f32.xlu0 %v913_v2  ;;  %v7318_v4 = vld [vmem:[%s8661_s14 + $0x4] ss:$12 sps:$4 sm:$0xff]   ;;  %v7320_v5 = vld [vmem:[%s8661_s14] ss:$12 sps:$4 sm:$0xff]   ;;  %6884 = vmatprep.subr.bf16.mxu1 %v8057_v6  ;;  %v7321_v7 = vld [vmem:[%s8661_s14 + $0x8] ss:$12 sps:$4 sm:$0xff]  }
 0x1b9   : > { %v7322_v8 = vld [vmem:[%s8661_s14 + $0x1c] ss:$12 sps:$4 sm:$0xff]   ;;  %1134 = vmatprep.subr.bf16.mxu0 %v7318_v4  ;;  %6885 = vmatpush3.bf16.msra.mxu1 %v7321_v7  ;;  %v7324_v17 = vld [vmem:[%s8661_s14 + $0x18] ss:$12 sps:$4 sm:$0xff]   ;;  %v7325_v18 = vld [vmem:[%s8661_s14 + $0x20] ss:$12 sps:$4 sm:$0xff]  }
 0x1ba   : > { %1135 = vmatpush1.bf16.msra.mxu0 %v7320_v5  ;;  %6886 = vmatprep.subr.bf16.mxu1 %v8057_v6  ;;  %v7326_v19 = vld [vmem:[%s8661_s14 + $0x34] ss:$12 sps:$4 sm:$0xff]   ;;  %v7328_v20 = vld [vmem:[%s8661_s14 + $0x30] ss:$12 sps:$4 sm:$0xff]   ;;  %v7329_v21 = vld [vmem:[%s8661_s14 + $0x38] ss:$12 sps:$4 sm:$0xff]  }
 0x1bb   : > { %1136 = vmatprep.subr.bf16.mxu0 %v7322_v8  ;;  %v7330_v22 = vld [vmem:[%s8661_s14 + $0x4c] ss:$12 sps:$4 sm:$0xff]   ;;  %v7332_v23 = vld [vmem:[%s8661_s14 + $0x48] ss:$12 sps:$4 sm:$0xff]   ;;  %v7333_v24 = vld [vmem:[%s8661_s14 + $0x50] ss:$12 sps:$4 sm:$0xff]   ;;  %1166 = vmatprep.mubr.bf16.mxu0 %v8058_v32 }
 0x1bc   : > { %919 = vadd.xlane.f32.xlu0 %v914_v3  ;;  %v7334_v25 = vld [vmem:[%s8661_s14 + $0x64] ss:$12 sps:$4 sm:$0xff]   ;;  %v7336_v26 = vld [vmem:[%s8661_s14 + $0x60] ss:$12 sps:$4 sm:$0xff]   ;;  %v7337_v27 = vld [vmem:[%s8661_s14 + $0x68] ss:$12 sps:$4 sm:$0xff]   ;;  %6900 = vmatprep.mubr.msk.bf16.mxu1 %vm8059_vm0, %v8057_v6 }
 0x1bd   : > { %6887 = vmatpush3.bf16.msra.mxu1 %v7325_v18  ;;  %v7338_v28 = vld [vmem:[%s8661_s14 + $0x7c] ss:$12 sps:$4 sm:$0xff]   ;;  %v7340_v29 = vld [vmem:[%s8661_s14 + $0x78] ss:$12 sps:$4 sm:$0xff]   ;;  %v7341_v30 = vld [vmem:[%s8661_s14 + $0x80] ss:$12 sps:$4 sm:$0xff]  }
 0x1be   : > { %1137 = vmatpush1.bf16.msra.mxu0 %v7324_v17  ;;  %6888 = vmatprep.subr.bf16.mxu1 %v8057_v6  ;;  %v7342_v31 = vld [vmem:[%s8661_s14 + $0x94] ss:$12 sps:$4 sm:$0xff]   ;;  %v7344_v33 = vld [vmem:[%s8661_s14 + $0x90] ss:$12 sps:$4 sm:$0xff]   ;;  %v7345_v34 = vld [vmem:[%s8661_s14 + $0x98] ss:$12 sps:$4 sm:$0xff]  }
 0x1bf   : > { %1138 = vmatprep.subr.bf16.mxu0 %v7326_v19  ;;  %v7346_v35 = vld [vmem:[%s8661_s14 + $0xac] ss:$12 sps:$4 sm:$0xff]   ;;  %v7348_v36 = vld [vmem:[%s8661_s14 + $0xa8] ss:$12 sps:$4 sm:$0xff]   ;;  %v7349_v37 = vld [vmem:[%s8661_s14 + $0xb0] ss:$12 sps:$4 sm:$0xff]  }
 0x1c0   : > { %v6549_v46 = vld [vmem:[%s718_s24] ss:$0 sm:$0xff]  ;;  %v8733_v56 = vshrl.u32 %v991_v55, 7  ;;  %v989_v58 = vld [vmem:[%s8663_s28] sm:$0x7]  ;;  %s8061_s24 = smov 112  }
 0x1c1   : > { %6889 = vmatpush3.bf16.msra.mxu1 %v7329_v21  ;;  %v6550_v50 = vld [vmem:[%s726_s4] ss:$0 sm:$0xff]  ;;  %s8062_s20 = smov 80   ;;  %s8063_s29 = smov 64   ;;  %v8067_v17 = vmov 1983009808  }
 0x1c2   : > { %1139 = vmatpush1.bf16.msra.mxu0 %v7328_v20  ;;  %6890 = vmatprep.subr.bf16.mxu1 %v8057_v6  ;;  %v993_v57 = vsub.s32 0, %v8733_v56  ;;  %v997_v60 = vsub.s32 1, %v8733_v56  ;;  %s8064_s13 = smov 48   ;;  %s8065_s15 = smov 32   ;;  %v1353_v18 = vunpack.c.l.s4 %v8067_v17  ;;  %v8068_v19 = vmov 1934713408  }
 0x1c3   : > { %1140 = vmatprep.subr.bf16.mxu0 %v7330_v22  ;;  %s8066_s26 = smov 16   ;;  %v1417_v20 = vunpack.c.l.s4 %v8068_v19  ;;  %vm3044_vm1 = vcmask 130048   ;;  %vm3977_vm2 = vcmask 1043456   ;;  %vm3781_vm3 = vcmask 64512   ;;  %s10181_s0 = sld [smem:[#allocation27_spill]] }
 0x1c4   : > { %v994_v59 = vrot.slane %v989_v58, %v993_v57  ;;  %v998_v0 = vrot.slane %v989_v58, %v997_v60  ;;  %vm5313_vm4 = vcmask 261120   ;;  %vm5316_vm5 = vcmask 392192  }
 0x1c5   : > { %6891 = vmatpush3.bf16.msra.mxu1 %v7333_v24  ;;  %v1418_v24 = vunpack.c.0.s8 %v1417_v20  ;;  %vm5319_vm6 = vcmask 523264   ;;  %vm5322_vm7 = vcmask 654336   ;;  %vm5325_vm8 = vcmask 785408  }
 0x1c6   : > { %1141 = vmatpush1.bf16.msra.mxu0 %v7332_v23  ;;  %6892 = vmatprep.subr.bf16.mxu1 %v8057_v6  ;;  %v1354_v23 = vunpack.c.0.s8 %v1353_v18  ;;  %vm5328_vm9 = vcmask 916480  }
 0x1c7   : > { %1142 = vmatprep.subr.bf16.mxu0 %v7334_v25 }
 0x1c9   : > { %6893 = vmatpush3.bf16.msra.mxu1 %v7337_v27  ;;  %p6749_p2 = scmp.ne.s32.totalorder %s10181_s0, 2 }
 0x1ca   : > { %1143 = vmatpush1.bf16.msra.mxu0 %v7336_v26  ;;  %6894 = vmatprep.subr.bf16.mxu1 %v8057_v6 }
 0x1cb   : > { %1144 = vmatprep.subr.bf16.mxu0 %v7338_v28 }
 0x1cd   : > { %6895 = vmatpush3.bf16.msra.mxu1 %v7341_v30 }
 0x1ce   : > { %1145 = vmatpush1.bf16.msra.mxu0 %v7340_v29  ;;  %6896 = vmatprep.subr.bf16.mxu1 %v8057_v6  ;;  %v8836_v29 = vsub.s32 %v1354_v23, %v8733_v56 }
 0x1cf   : > { %1146 = vmatprep.subr.bf16.mxu0 %v7342_v31 }
 0x1d1   : > { %6897 = vmatpush3.bf16.msra.mxu1 %v7345_v34 }
 0x1d2   : > { %1147 = vmatpush1.bf16.msra.mxu0 %v7344_v33  ;;  %6898 = vmatprep.subr.bf16.mxu1 %v8057_v6  ;;  %v8839_v33 = vsub.s32 %v1418_v24, %v8733_v56 }
 0x1d3   : > { %1148 = vmatprep.subr.bf16.mxu0 %v7346_v35 }
 0x1d5   : > { %6899 = vmatpush3.bf16.msra.mxu1 %v7349_v37 }
 0x1d6   : > { %1149 = vmatpush1.bf16.msra.mxu0 %v7348_v36  ;;  %6904 = vmatprep.subr.bf16.mxu1 %v8057_v6 }
 0x1d7   : > { %6928 = vmatprep.subr.bf16.mxu0 %v8057_v6 }
 0x245   : > { %v918_v9 = vpop.xlane.xlu0 %917 }
 0x246   : > { %v922_v10 = vmul.f32 0.0078125, %v918_v9 }
 0x248   : > { %v8684_v11 = vsub.f32 %v913_v2, %v922_v10 }
 0x249   : > { %v920_v12 = vpop.xlane.xlu0 %919 }
 0x24a   : > { %v923_v13 = vmul.f32 0.0078125, %v920_v12  ;;  %v926_v14 = vmul.f32 %v8684_v11, %v8684_v11 }
 0x24c   : > { %v8688_v15 = vsub.f32 %v914_v3, %v923_v13  ;;  %928 = vadd.xlane.f32.xlu1 %v926_v14 }
 0x24e   : > { %v927_v16 = vmul.f32 %v8688_v15, %v8688_v15 }
 0x250   : > { %930 = vadd.xlane.f32.xlu1 %v927_v16 }
 0x2d9   : > { %v929_v38 = vpop.xlane.xlu1 %928 }
 0x2da   : > { %v932_v39 = vmul.f32 0.0078125, %v929_v38 }
 0x2dc   : > { %v934_v40 = vadd.f32 1e-05, %v932_v39 }
 0x2dd   : > { %v931_v41 = vpop.xlane.xlu1 %930 }
 0x2de   : > { %7438 = vrsqrt.f32 %v934_v40  ;;  %v933_v42 = vmul.f32 0.0078125, %v931_v41 }
 0x2e0   : > { %v935_v43 = vadd.f32 1e-05, %v933_v42 }
 0x2e2   : > { %7440 = vrsqrt.f32 %v935_v43 }
 0x2e8   : > { %v7439_v44 = vpop.eup %7438 }
 0x2e9   : > { %v938_v45 = vmul.f32 %v7439_v44, %v8684_v11  ;;  %v1001_v11 = vsub.s32 2, %v8733_v56 }
 0x2eb   : > { %v946_v49 = vmul.f32 %v6549_v46, %v938_v45  ;;  %v1002_v12 = vrot.slane %v989_v58, %v1001_v11 }
 0x2ec   : > { %v7441_v47 = vpop.eup %7440 }
 0x2ed   : > { %v939_v48 = vmul.f32 %v7441_v47, %v8688_v15  ;;  %v954_v52 = vadd.f32 %v6550_v50, %v946_v49 }
 0x2ef   : > { %v947_v51 = vmul.f32 %v6549_v46, %v939_v48 }
 0x2f1   : > { %v955_v53 = vadd.f32 %v6550_v50, %v947_v51 }
 0x2f3   : > { %v956_v54 = vpack.c.bf16 %v955_v53, %v954_v52 }
 0x2f5   : > { %1167 = vmatmul.mubr.bf16.vlgmr.msra.gmra.mrb[0].mxu0 %v956_v54  ;;  %6901 = vmatmul.mubr.bf16.vlgmr.msra.gmra.mrb[0].mxu1 %v956_v54 }
 0x2f6   : > { %6906 = vmatprep.mubr.msk.bf16.mxu1 %vm8059_vm0, %v8057_v6  ;;  %6930 = vmatprep.mubr.msk.bf16.mxu0 %vm8059_vm0, %v8057_v6 }
 0x3c8   : > { %v1168_v61 = vpop.f32.mrb[0].mxu0  ;;  %v1211_v62 = vpop.f32.mrb[0].mxu1 }
 0x3c9   : > { %v8740_v63 = vadd.f32 %v1168_v61, %v994_v59  ;;  %v1170_v1 = vpop.f32.mrb[1].mxu0  ;;  %v6902_v2 = vpop.f32.mrb[1].mxu1  ;;  %v8805_v13 = vadd.f32 %v1211_v62, %v1002_v12 }
 0x3ca   : > { %v1172_v3 = vpop.f32.mrb[2].mxu0  ;;  %v1214_v4 = vpop.f32.mrb[2].mxu1  ;;  %v8748_v8 = vadd.f32 %v1170_v1, %v998_v0 }
 0x3cb   : > { %v1174_v5 = vpop.f32.mrb[3].mxu0  ;;  %v6903_v7 = vpop.f32.mrb[3].mxu1  ;;  %1226 = vrot.lane.b32.xlu0 %v8740_v63, %s8060_s18  ;;  %1220 = vrot.lane.b32.xlu1 %v8740_v63, %s8061_s24  ;;  %v8764_v10 = vadd.f32 %v1172_v3, %v994_v59  ;;  %v8815_v14 = vadd.f32 %v1214_v4, %v1002_v12 }
 0x3cc   : > { %v8754_v9 = vadd.f32 %v1174_v5, %v998_v0 }
 0x3cf   : > { %1264 = vrot.lane.b32.xlu0 %v8748_v8, %s8061_s24  ;;  %1270 = vrot.lane.b32.xlu1 %v8748_v8, %s8060_s18 }
 0x3d3   : > { %1266 = vrot.lane.b32.xlu0 %v8754_v9, %s8061_s24  ;;  %1276 = vrot.lane.b32.xlu1 %v8748_v8, %s8062_s20 }
 0x3d7   : > { %1278 = vrot.lane.b32.xlu0 %v8754_v9, %s8062_s20  ;;  %1232 = vrot.lane.b32.xlu1 %v8740_v63, %s8062_s20 }
 0x3db   : > { %1228 = vrot.lane.b32.xlu0 %v8764_v10, %s8060_s18  ;;  %1272 = vrot.lane.b32.xlu1 %v8754_v9, %s8060_s18 }
 0x3df   : > { %1282 = vrot.lane.b32.xlu0 %v8748_v8, %s8063_s29  ;;  %1222 = vrot.lane.b32.xlu1 %v8764_v10, %s8061_s24 }
 0x3e3   : > { %1288 = vrot.lane.b32.xlu0 %v8748_v8, %s8064_s13  ;;  %1234 = vrot.lane.b32.xlu1 %v8764_v10, %s8062_s20 }
 0x3e7   : > { %1294 = vrot.lane.b32.xlu0 %v8748_v8, %s8065_s15  ;;  %1240 = vrot.lane.b32.xlu1 %v8764_v10, %s8063_s29 }
 0x3eb   : > { %1300 = vrot.lane.b32.xlu0 %v8748_v8, %s8066_s26  ;;  %1246 = vrot.lane.b32.xlu1 %v8764_v10, %s8064_s13 }
 0x3ef   : > { %1238 = vrot.lane.b32.xlu0 %v8740_v63, %s8063_s29  ;;  %1284 = vrot.lane.b32.xlu1 %v8754_v9, %s8063_s29 }
 0x3f3   : > { %1244 = vrot.lane.b32.xlu0 %v8740_v63, %s8064_s13  ;;  %1290 = vrot.lane.b32.xlu1 %v8754_v9, %s8064_s13 }
 0x3f7   : > { %1250 = vrot.lane.b32.xlu0 %v8740_v63, %s8065_s15  ;;  %1296 = vrot.lane.b32.xlu1 %v8754_v9, %s8065_s15 }
 0x3fb   : > { %1256 = vrot.lane.b32.xlu0 %v8740_v63, %s8066_s26  ;;  %1302 = vrot.lane.b32.xlu1 %v8754_v9, %s8066_s26 }
 0x3ff   : > { %1308 = vrot.lane.b32.xlu0 %v8805_v13, %s8061_s24  ;;  %1252 = vrot.lane.b32.xlu1 %v8764_v10, %s8065_s15 }
 0x403   : > { %1320 = vrot.lane.b32.xlu0 %v8805_v13, %s8062_s20  ;;  %1258 = vrot.lane.b32.xlu1 %v8764_v10, %s8066_s26 }
 0x407   : > { %1326 = vrot.lane.b32.xlu0 %v8805_v13, %s8063_s29  ;;  %1310 = vrot.lane.b32.xlu1 %v8815_v14, %s8061_s24 }
 0x40b   : > { %1314 = vrot.lane.b32.xlu1 %v8805_v13, %s8060_s18 }
 0x40f   : > { %1316 = vrot.lane.b32.xlu1 %v8815_v14, %s8060_s18 }
 0x413   : > { %1322 = vrot.lane.b32.xlu1 %v8815_v14, %s8062_s20 }
 0x417   : > { %1328 = vrot.lane.b32.xlu1 %v8815_v14, %s8063_s29 }
 0x41b   : > { %1332 = vrot.lane.b32.xlu1 %v8805_v13, %s8064_s13 }
 0x41f   : > { %1334 = vrot.lane.b32.xlu1 %v8815_v14, %s8064_s13 }
 0x43d   : > { %v1227_v15 = vpop.permute.xlu0 %1226  ;;  %v1221_v16 = vpop.permute.xlu1 %1220 }
 0x43e   : > { %v1350_v38 = vcombine.low %v8740_v63, %v1227_v15  ;;  %v1351_v39 = vcombine.high %v8740_v63, %v1227_v15 }
 0x440   : > { %v1358_v54 = vrot.slane %v1350_v38, %v8836_v29  ;;  %v1365_v55 = vrot.slane %v1351_v39, %v8836_v29 }
 0x441   : > { %v1265_v21 = vpop.permute.xlu0 %1264  ;;  %v1271_v22 = vpop.permute.xlu1 %1270 }
 0x442   : > { %v1486_v25 = vcombine.low %v8748_v8, %v1271_v22  ;;  %v1487_v26 = vcombine.high %v8748_v8, %v1271_v22 }
 0x444   : > { %v1494_v34 = vrot.slane %v1486_v25, %v8836_v29  ;;  %v1501_v35 = vrot.slane %v1487_v26, %v8836_v29 }
 0x445   : > { %v1267_v27 = vpop.permute.xlu0 %1266  ;;  %v1277_v28 = vpop.permute.xlu1 %1276 }
 0x446   : > { %v1502_v30 = vcombine.low %v1265_v21, %v1277_v28  ;;  %v1503_v31 = vcombine.high %v1265_v21, %v1277_v28 }
 0x448   : > { %v1510_v36 = vrot.slane %v1502_v30, %v8836_v29  ;;  %v1517_v37 = vrot.slane %v1503_v31, %v8836_v29 }
 0x449   : > { %v1279_v40 = vpop.permute.xlu0 %1278  ;;  %v1233_v41 = vpop.permute.xlu1 %1232 }
 0x44a   : > { %v1550_v42 = vcombine.low %v1494_v34, %v1510_v36  ;;  %v1551_v43 = vcombine.high %v1494_v34, %v1510_v36  ;;  %v1566_v44 = vcombine.low %v1501_v35, %v1517_v37  ;;  %v1567_v45 = vcombine.high %v1501_v35, %v1517_v37 }
 0x44b   : > { %v1910_v46 = vcombine.low %v1267_v27, %v1279_v40  ;;  %v1911_v47 = vcombine.high %v1267_v27, %v1279_v40  ;;  %v1366_v48 = vcombine.low %v1221_v16, %v1233_v41  ;;  %v1367_v49 = vcombine.high %v1221_v16, %v1233_v41 }
 0x44c   : > { %v1558_v50 = vrot.slane %v1550_v42, %v8839_v33  ;;  %v1565_v51 = vrot.slane %v1551_v43, %v8839_v33  ;;  %v1574_v52 = vrot.slane %v1566_v44, %v8839_v33  ;;  %v1581_v53 = vrot.slane %v1567_v45, %v8839_v33 }
 0x44d   : > { %v1374_v58 = vrot.slane %v1366_v48, %v8836_v29  ;;  %v1381_v59 = vrot.slane %v1367_v49, %v8836_v29  ;;  %v1229_v61 = vpop.permute.xlu0 %1228  ;;  %v1273_v62 = vpop.permute.xlu1 %1272  ;;  %v1918_v8 = vrot.slane %v1910_v46, %v8836_v29  ;;  %v1925_v12 = vrot.slane %v1911_v47, %v8836_v29 }
 0x44e   : > { %v6591_v63 = vcombine.low %v1558_v50, %v1565_v51  ;;  %v6593_v0 = vcombine.high %v1558_v50, %v1565_v51  ;;  %v6595_v5 = vcombine.low %v1574_v52, %v1581_v53  ;;  %v6597_v7 = vcombine.high %v1574_v52, %v1581_v53 }
 0x44f   : > { %v1414_v1 = vcombine.low %v1358_v54, %v1374_v58  ;;  %v1415_v2 = vcombine.high %v1358_v54, %v1374_v58  ;;  %v1430_v3 = vcombine.low %v1365_v55, %v1381_v59  ;;  %v1431_v4 = vcombine.high %v1365_v55, %v1381_v59 }
 0x450   : > { %v8864_v21 = vrot.slane %v6591_v63, %v8836_v29  ;;  %v8867_v22 = vrot.slane %v6593_v0, %v8836_v29  ;;  %v1894_v23 = vcombine.low %v8754_v9, %v1273_v62  ;;  %v1895_v24 = vcombine.high %v8754_v9, %v1273_v62 }
 0x451   : > { %v1422_v15 = vrot.slane %v1414_v1, %v8839_v33  ;;  %v1429_v16 = vrot.slane %v1415_v2, %v8839_v33  ;;  %v1438_v17 = vrot.slane %v1430_v3, %v8839_v33  ;;  %v1445_v18 = vrot.slane %v1431_v4, %v8839_v33  ;;  %v8861_v19 = vpop.permute.xlu0 %1282  ;;  %v1223_v20 = vpop.permute.xlu1 %1222 }
 0x452   : > { %v8872_v30 = vrot.slane %v6595_v5, %v8836_v29  ;;  %v8875_v31 = vrot.slane %v6597_v7, %v8836_v29  ;;  %v1902_v34 = vrot.slane %v1894_v23, %v8836_v29  ;;  %v1909_v35 = vrot.slane %v1895_v24, %v8836_v29 }
 0x453   : > { %v6575_v25 = vcombine.low %v1422_v15, %v1429_v16  ;;  %v6577_v26 = vcombine.high %v1422_v15, %v1429_v16  ;;  %v6579_v27 = vcombine.low %v1438_v17, %v1445_v18  ;;  %v6581_v28 = vcombine.high %v1438_v17, %v1445_v18 }
 0x454   : > { %v1758_v9 = vcombine.low %v8764_v10, %v1229_v61  ;;  %v1759_v38 = vcombine.high %v8764_v10, %v1229_v61  ;;  %v1958_v41 = vcombine.low %v1902_v34, %v1918_v8  ;;  %v1959_v42 = vcombine.high %v1902_v34, %v1918_v8 }
 0x455   : > { %v8880_v36 = vrot.slane %v6575_v25, %v8836_v29  ;;  %v8883_v37 = vrot.slane %v6577_v26, %v8836_v29  ;;  %v8887_v39 = vpop.permute.xlu0 %1288  ;;  %v1235_v40 = vpop.permute.xlu1 %1234  ;;  %v1974_v43 = vcombine.low %v1909_v35, %v1925_v12  ;;  %v1975_v44 = vcombine.high %v1909_v35, %v1925_v12 }
 0x456   : > { %v8890_v45 = vrot.slane %v6579_v27, %v8836_v29  ;;  %v8893_v46 = vrot.slane %v6581_v28, %v8836_v29  ;;  %v1966_v47 = vrot.slane %v1958_v41, %v8839_v33  ;;  %v1973_v48 = vrot.slane %v1959_v42, %v8839_v33 }
 0x457   : > { %v1982_v49 = vrot.slane %v1974_v43, %v8839_v33  ;;  %v1989_v10 = vrot.slane %v1975_v44, %v8839_v33  ;;  %v1766_v50 = vrot.slane %v1758_v9, %v8836_v29  ;;  %v1773_v51 = vrot.slane %v1759_v38, %v8836_v29 }
 0x458   : > { %v1774_v52 = vcombine.low %v1223_v20, %v1235_v40  ;;  %v1775_v53 = vcombine.high %v1223_v20, %v1235_v40  ;;  %v2230_v58 = vcombine.low %v8880_v36, %v8883_v37  ;;  %v2231_v59 = vcombine.high %v8880_v36, %v8883_v37 }
 0x459   : > { %v1295_v54 = vpop.permute.xlu0 %1294  ;;  %v8901_v55 = vpop.permute.xlu1 %1240  ;;  %v2502_v61 = vcombine.low %v8864_v21, %v8867_v22  ;;  %v2534_v62 = vcombine.low %v8872_v30, %v8875_v31  ;;  %v2262_v63 = vcombine.low %v8890_v45, %v8893_v46  ;;  %v2263_v0 = vcombine.high %v8890_v45, %v8893_v46 }
 0x45a   : > { %v1782_v1 = vrot.slane %v1774_v52, %v8836_v29  ;;  %v1789_v2 = vrot.slane %v1775_v53, %v8836_v29  ;;  %v6599_v3 = vcombine.low %v1966_v47, %v1973_v48  ;;  %v6601_v4 = vcombine.high %v1966_v47, %v1973_v48 }
 0x45b   : > { %v6603_v5 = vcombine.low %v1982_v49, %v1989_v10  ;;  %v6605_v7 = vcombine.high %v1982_v49, %v1989_v10  ;;  %v1518_v20 = vcombine.low %v8861_v19, %v1295_v54  ;;  %v1519_v23 = vcombine.high %v8861_v19, %v1295_v54 }
 0x45c   : > { %v1822_v8 = vcombine.low %v1766_v50, %v1782_v1  ;;  %v1823_v12 = vcombine.high %v1766_v50, %v1782_v1  ;;  %v1838_v15 = vcombine.low %v1773_v51, %v1789_v2  ;;  %v1839_v16 = vcombine.high %v1773_v51, %v1789_v2 }
 0x45d   : > { %v1301_v17 = vpop.permute.xlu0 %1300  ;;  %v8917_v18 = vpop.permute.xlu1 %1246  ;;  %v8922_v24 = vrot.slane %v2502_v61, %v8839_v33  ;;  %v8925_v25 = vrot.slane %v2534_v62, %v8839_v33  ;;  %v2503_v19 = vcombine.high %v8864_v21, %v8867_v22  ;;  %v2535_v36 = vcombine.high %v8872_v30, %v8875_v31 }
 0x45e   : > { %v1830_v26 = vrot.slane %v1822_v8, %v8839_v33  ;;  %v1837_v27 = vrot.slane %v1823_v12, %v8839_v33  ;;  %v1846_v28 = vrot.slane %v1838_v15, %v8839_v33  ;;  %v1853_v34 = vrot.slane %v1839_v16, %v8839_v33 }
 0x45f   : > { %v2566_v35 = vcombine.low %v8922_v24, %v8925_v25  ;;  %v1534_v37 = vcombine.low %v8887_v39, %v1301_v17  ;;  %v8939_v9 = vrot.slane %v6599_v3, %v8836_v29  ;;  %v2517_v47 = vrot.slane %v2503_v19, %v8839_v33 }
 0x460   : > { %v6583_v38 = vcombine.low %v1830_v26, %v1837_v27  ;;  %v6585_v40 = vcombine.high %v1830_v26, %v1837_v27  ;;  %v6587_v41 = vcombine.low %v1846_v28, %v1853_v34  ;;  %v2549_v21 = vrot.slane %v2535_v36, %v8839_v33 }
 0x461   : > { %v8941_v42 = vpop.permute.xlu0 %1238  ;;  %v8943_v43 = vpop.permute.xlu1 %1284  ;;  %v2998_v44 = vpack.c.bf16 %v2566_v35, %v2566_v35  ;;  %v1535_v22 = vcombine.high %v8887_v39, %v1301_v17  ;;  %v8949_v30 = vrot.slane %v6601_v4, %v8836_v29  ;;  %v8952_v31 = vrot.slane %v6603_v5, %v8836_v29 }
 0x462   : > { %v6589_v48 = vcombine.high %v1846_v28, %v1853_v34  ;;  %v1526_v49 = vrot.slane %v1518_v20, %v8836_v29  ;;  %v2568_v50 = vcombine.low %v2517_v47, %v2549_v21  ;;  %v1542_v51 = vrot.slane %v1534_v37, %v8836_v29 }
 0x463   : > { %v3049_v10 = vsel %vm3044_vm1, %v2998_v44, 0  ;;  %v1549_v52 = vrot.slane %v1535_v22, %v8836_v29  ;;  %v8959_v53 = vrot.slane %v6605_v7, %v8836_v29  ;;  %v8962_v39 = vrot.slane %v6583_v38, %v8836_v29 }
 0x464   : > { %v8965_v54 = vrot.slane %v6585_v40, %v8836_v29  ;;  %v1533_v61 = vrot.slane %v1519_v23, %v8836_v29  ;;  %6905 = vmatpush3.bf16.xpose.msra.mxu1 %v3049_v10  ;;  %v8973_v2 = vrot.slane %v6587_v41, %v8836_v29  ;;  %v3002_v3 = vpack.c.bf16 %v2568_v50, %v2568_v50 }
 0x465   : > { %v8968_v62 = vpop.permute.xlu0 %1244  ;;  %v8970_v1 = vpop.permute.xlu1 %1290  ;;  %v1582_v4 = vcombine.low %v1526_v49, %v1542_v51  ;;  %v1583_v5 = vcombine.high %v1526_v49, %v1542_v51  ;;  %6910 = vmatprep.subr.bf16.mxu1 %v8057_v6  ;;  %v8977_v7 = vrot.slane %v6589_v48, %v8836_v29  ;;  %v8980_v8 = vrot.slane %v2230_v58, %v8839_v33 }
 0x466   : > { %v8983_v12 = vrot.slane %v2262_v63, %v8839_v33  ;;  %v2245_v15 = vrot.slane %v2231_v59, %v8839_v33  ;;  %v3233_v16 = vsel %vm3044_vm1, %v3002_v3, 0  ;;  %v1598_v17 = vcombine.low %v1533_v61, %v1549_v52 }
 0x467   : > { %6929 = vmatpush3.bf16.xpose.msra.mxu0 %v3233_v16  ;;  %v1599_v20 = vcombine.high %v1533_v61, %v1549_v52  ;;  %v2277_v26 = vrot.slane %v2263_v0, %v8839_v33  ;;  %v2638_v58 = vcombine.low %v8939_v9, %v8949_v30  ;;  %v8996_v59 = vrot.slane %v1582_v4, %v8839_v33 }
 0x468   : > { %v2294_v23 = vcombine.low %v8980_v8, %v8983_v12  ;;  %v8999_v28 = vrot.slane %v1583_v5, %v8839_v33  ;;  %6940 = vmatprep.subr.bf16.mxu0 %v8057_v6  ;;  %v2670_v34 = vcombine.low %v8952_v31, %v8959_v53  ;;  %v2569_v35 = vcombine.high %v2517_v47, %v2549_v21 }
 0x469   : > { %v1251_v63 = vpop.permute.xlu0 %1250  ;;  %v1297_v27 = vpop.permute.xlu1 %1296  ;;  %v2366_v45 = vcombine.low %v8962_v39, %v8965_v54  ;;  %v2398_v46 = vcombine.low %v8973_v2, %v8977_v7  ;;  %v2296_v19 = vcombine.low %v2245_v15, %v2277_v26  ;;  %v9009_v36 = vrot.slane %v2638_v58, %v8839_v33 }
 0x46a   : > { %v2982_v0 = vpack.c.bf16 %v2294_v23, %v2294_v23  ;;  %v9012_v37 = vrot.slane %v2670_v34, %v8839_v33  ;;  %v9015_v38 = vrot.slane %v1598_v17, %v8839_v33  ;;  %v9018_v40 = vrot.slane %v1599_v20, %v8839_v33 }
 0x46b   : > { %v3004_v41 = vpack.c.bf16 %v2569_v35, %v2569_v35  ;;  %v6592_v47 = vcombine.low %v8996_v59, %v8999_v28  ;;  %v6594_v21 = vcombine.high %v8996_v59, %v8999_v28  ;;  %v2986_v22 = vpack.c.bf16 %v2296_v19, %v2296_v19 }
 0x46c   : > { %6907 = vmatmul.mubr.msk.bf16.vlgmr.msra.gmra.mrb[4].mxu1 %vm3044_vm1, %v2982_v0  ;;  %v2702_v48 = vcombine.low %v9009_v36, %v9012_v37  ;;  %v1382_v49 = vcombine.low %v8941_v42, %v1251_v63  ;;  %v1383_v10 = vcombine.high %v8941_v42, %v1251_v63  ;;  %v9032_v50 = vrot.slane %v2366_v45, %v8839_v33 }
 0x46d   : > { %v1303_v44 = vpop.permute.xlu1 %1302  ;;  %6912 = vmatprep.mubr.msk.bf16.mxu1 %vm8059_vm0, %v8057_v6  ;;  %v9035_v51 = vrot.slane %v2398_v46, %v8839_v33  ;;  %v1257_v52 = vpop.permute.xlu0 %1256  ;;  %v3325_v3 = vsel %vm3044_vm1, %v3004_v41, 0  ;;  %v1926_v4 = vcombine.low %v8943_v43, %v1297_v27  ;;  %v1927_v5 = vcombine.high %v8943_v43, %v1297_v27 }
 0x46e   : > { %6931 = vmatmul.mubr.msk.bf16.vlgmr.msra.gmra.mrb[4].mxu0 %vm3044_vm1, %v2986_v22  ;;  %v2999_v61 = vpack.c.bf16 %v2702_v48, %v2702_v48  ;;  %v6596_v16 = vcombine.low %v9015_v38, %v9018_v40  ;;  %v2297_v17 = vcombine.high %v2245_v15, %v2277_v26  ;;  %v2567_v58 = vcombine.high %v8922_v24, %v8925_v25 }
 0x46f   : > { %6941 = vmatpush3.bf16.xpose.msra.mxu0 %v3325_v3  ;;  %6942 = vmatprep.mubr.msk.bf16.mxu0 %vm8059_vm0, %v8057_v6  ;;  %v2430_v42 = vcombine.low %v9032_v50, %v9035_v51  ;;  %v1398_v43 = vcombine.low %v8968_v62, %v1257_v52  ;;  %v1399_v63 = vcombine.high %v8968_v62, %v1257_v52 }
 0x470   : > { %v3095_v23 = vsel %vm3044_vm1, %v2999_v61, 0  ;;  %6952 = vmatprep.subr.bf16.mxu0 %v8057_v6  ;;  %v1390_v27 = vrot.slane %v1382_v49, %v8836_v29  ;;  %v1397_v34 = vrot.slane %v1383_v10, %v8836_v29  ;;  %v1942_v15 = vcombine.low %v8970_v1, %v1303_v44 }
 0x471   : > { %v9047_v20 = vpop.permute.xlu1 %1252  ;;  %6911 = vmatpush3.bf16.xpose.msra.mxu1 %v3095_v23  ;;  %v1943_v26 = vcombine.high %v8970_v1, %v1303_v44  ;;  %v1934_v35 = vrot.slane %v1926_v4, %v8836_v29  ;;  %v1941_v45 = vrot.slane %v1927_v5, %v8836_v29  ;;  %v1406_v24 = vrot.slane %v1398_v43, %v8836_v29  ;;  %v9080_v43 = vpop.permute.xlu0 %1308 }
 0x472   : > { %6916 = vmatprep.subr.bf16.mxu1 %v8057_v6  ;;  %v1413_v25 = vrot.slane %v1399_v63, %v8836_v29  ;;  %v2983_v62 = vpack.c.bf16 %v2430_v42, %v2430_v42  ;;  %v2988_v46 = vpack.c.bf16 %v2297_v17, %v2297_v17  ;;  %v1950_v0 = vrot.slane %v1942_v15, %v8836_v29 }
 0x473   : > { %v1957_v19 = vrot.slane %v1943_v26, %v8836_v29  ;;  %v3000_v41 = vpack.c.bf16 %v2567_v58, %v2567_v58  ;;  %v1446_v22 = vcombine.low %v1390_v27, %v1406_v24  ;;  %v1447_v48 = vcombine.high %v1390_v27, %v1406_v24 }
 0x474   : > { %v1462_v1 = vcombine.low %v1397_v34, %v1413_v25  ;;  %v1463_v44 = vcombine.high %v1397_v34, %v1413_v25  ;;  %v1990_v49 = vcombine.low %v1934_v35, %v1950_v0  ;;  %v1991_v10 = vcombine.high %v1934_v35, %v1950_v0 }
 0x475   : > { %v2006_v52 = vcombine.low %v1941_v45, %v1957_v19  ;;  %v1259_v61 = vpop.permute.xlu1 %1258  ;;  %v6598_v3 = vcombine.high %v9015_v38, %v9018_v40  ;;  %v1454_v4 = vrot.slane %v1446_v22, %v8839_v33  ;;  %v1461_v5 = vrot.slane %v1447_v48, %v8839_v33  ;;  %v1321_v22 = vpop.permute.xlu0 %1320 }
 0x476   : > { %6943 = vmatmul.mubr.msk.bf16.vlgmr.msra.gmra.mrb[8].mxu0 %vm3044_vm1, %v2988_v46  ;;  %v2007_v42 = vcombine.high %v1941_v45, %v1957_v19  ;;  %v9072_v17 = vrot.slane %v6592_v47, %v8836_v29  ;;  %v9075_v23 = vrot.slane %v1462_v1, %v8839_v33  ;;  %v9078_v58 = vrot.slane %v1463_v44, %v8839_v33 }
 0x477   : > { %6954 = vmatprep.mubr.msk.bf16.mxu0 %vm8059_vm0, %v8057_v6  ;;  %v3141_v38 = vsel %vm3044_vm1, %v3000_v41, 0  ;;  %v9087_v40 = vrot.slane %v1990_v49, %v8839_v33  ;;  %v9090_v47 = vrot.slane %v1991_v10, %v8839_v33  ;;  %v1790_v63 = vcombine.low %v8901_v55, %v9047_v20 }
 0x478   : > { %6913 = vmatmul.mubr.msk.bf16.vlgmr.msra.gmra.mrb[8].mxu1 %vm3044_vm1, %v2983_v62  ;;  %v6576_v27 = vcombine.low %v1454_v4, %v1461_v5  ;;  %v6578_v34 = vcombine.high %v1454_v4, %v1461_v5  ;;  %v9095_v15 = vrot.slane %v2006_v52, %v8839_v33  ;;  %v9098_v26 = vrot.slane %v2007_v42, %v8839_v33 }
 0x479   : > { %6917 = vmatpush3.bf16.xpose.msra.mxu1 %v3141_v38  ;;  %v9104_v35 = vrot.slane %v6594_v21, %v8836_v29  ;;  %v9107_v45 = vrot.slane %v6596_v16, %v8836_v29  ;;  %v9110_v24 = vrot.slane %v6598_v3, %v8836_v29  ;;  %6918 = vmatprep.mubr.msk.bf16.mxu1 %vm8059_vm0, %v8057_v6  ;;  %v9125_v16 = vpop.permute.xlu1 %1310 }
 0x47a   : > { %v2295_v25 = vcombine.high %v8980_v8, %v8983_v12  ;;  %v2367_v62 = vcombine.high %v8962_v39, %v8965_v54  ;;  %v2399_v59 = vcombine.high %v8973_v2, %v8977_v7  ;;  %v6580_v28 = vcombine.low %v9075_v23, %v9078_v58  ;;  %6922 = vmatprep.subr.bf16.mxu1 %v8057_v6 }
 0x47b   : > { %v1791_v21 = vcombine.high %v8901_v55, %v9047_v20  ;;  %v6582_v46 = vcombine.high %v9075_v23, %v9078_v58  ;;  %v6600_v8 = vcombine.low %v9087_v40, %v9090_v47  ;;  %v6602_v12 = vcombine.high %v9087_v40, %v9090_v47 }
 0x47c   : > { %v1798_v0 = vrot.slane %v1790_v63, %v8836_v29  ;;  %v9135_v19 = vrot.slane %v6576_v27, %v8836_v29  ;;  %v9138_v55 = vrot.slane %v6578_v34, %v8836_v29  ;;  %v6604_v20 = vcombine.low %v9095_v15, %v9098_v26 }
 0x47d   : > { %v6606_v41 = vcombine.high %v9095_v15, %v9098_v26  ;;  %v2984_v48 = vpack.c.bf16 %v2295_v25, %v2295_v25  ;;  %v2703_v1 = vcombine.high %v9009_v36, %v9012_v37  ;;  %v2518_v44 = vcombine.low %v9072_v17, %v9104_v35 }
 0x47e   : > { %v2550_v49 = vcombine.low %v9107_v45, %v9110_v24  ;;  %v9151_v10 = vrot.slane %v6580_v28, %v8836_v29  ;;  %v1805_v52 = vrot.slane %v1791_v21, %v8836_v29  ;;  %v1806_v3 = vcombine.low %v8917_v18, %v1259_v61 }
 0x47f   : > { %v1807_v4 = vcombine.high %v8917_v18, %v1259_v61  ;;  %v3001_v5 = vpack.c.bf16 %v2703_v1, %v2703_v1  ;;  %v9158_v36 = vrot.slane %v2518_v44, %v8839_v33  ;;  %v1638_v42 = vcombine.low %v9080_v43, %v1321_v22  ;;  %v1315_v61 = vpop.permute.xlu1 %1314 }
 0x480   : > { %6919 = vmatmul.mubr.msk.bf16.vlgmr.msra.gmra.mrb[12].mxu1 %vm3044_vm1, %v2984_v48  ;;  %v9161_v37 = vrot.slane %v2550_v49, %v8839_v33  ;;  %v1639_v23 = vcombine.high %v9080_v43, %v1321_v22  ;;  %v1814_v58 = vrot.slane %v1806_v3, %v8836_v29  ;;  %v2431_v18 = vcombine.high %v9032_v50, %v9035_v51 }
 0x481   : > { %v1821_v38 = vrot.slane %v1807_v4, %v8836_v29  ;;  %6924 = vmatprep.mubr.msk.bf16.mxu1 %vm8059_vm0, %v8057_v6  ;;  %v3187_v40 = vsel %vm3044_vm1, %v3001_v5, 0  ;;  %v2639_v63 = vcombine.high %v8939_v9, %v8949_v30  ;;  %v2671_v43 = vcombine.high %v8952_v31, %v8959_v53 }
 0x482   : > { %v2570_v47 = vcombine.low %v9158_v36, %v9161_v37  ;;  %6923 = vmatpush3.bf16.xpose.msra.mxu1 %v3187_v40  ;;  %v1854_v27 = vcombine.low %v1798_v0, %v1814_v58  ;;  %v1855_v34 = vcombine.high %v1798_v0, %v1814_v58  ;;  %v1622_v22 = vcombine.low %v8805_v13, %v1315_v61 }
 0x483   : > { %v1870_v25 = vcombine.low %v1805_v52, %v1821_v38  ;;  %v1871_v28 = vcombine.high %v1805_v52, %v1821_v38  ;;  %6934 = vmatprep.subr.bf16.mxu1 %v8057_v6  ;;  %v2653_v50 = vrot.slane %v2639_v63, %v8839_v33  ;;  %v2685_v51 = vrot.slane %v2671_v43, %v8839_v33 }
 0x484   : > { %v3006_v21 = vpack.c.bf16 %v2570_v47, %v2570_v47  ;;  %v1862_v48 = vrot.slane %v1854_v27, %v8839_v33  ;;  %v1869_v9 = vrot.slane %v1855_v34, %v8839_v33  ;;  %v1623_v1 = vcombine.high %v8805_v13, %v1315_v61  ;;  %v1317_v61 = vpop.permute.xlu1 %1316 }
 0x485   : > { %v1878_v30 = vrot.slane %v1870_v25, %v8839_v33  ;;  %v1885_v31 = vrot.slane %v1871_v28, %v8839_v33  ;;  %v2704_v0 = vcombine.low %v2653_v50, %v2685_v51  ;;  %v1630_v44 = vrot.slane %v1622_v22, %v8836_v29 }
 0x486   : > { %v3417_v53 = vsel %vm3044_vm1, %v3006_v21, 0  ;;  %v9190_v49 = vrot.slane %v6582_v46, %v8836_v29  ;;  %v9193_v52 = vrot.slane %v6600_v8, %v8836_v29  ;;  %v6584_v3 = vcombine.low %v1862_v48, %v1869_v9 }
 0x487   : > { %6953 = vmatpush3.bf16.xpose.msra.mxu0 %v3417_v53  ;;  %v6586_v4 = vcombine.high %v1862_v48, %v1869_v9  ;;  %v1646_v5 = vrot.slane %v1638_v42, %v8836_v29  ;;  %v2985_v58 = vpack.c.bf16 %v2431_v18, %v2431_v18  ;;  %v3003_v38 = vpack.c.bf16 %v2704_v0, %v2704_v0 }
 0x488   : > { %v1637_v40 = vrot.slane %v1623_v1, %v8836_v29  ;;  %6964 = vmatprep.subr.bf16.mxu0 %v8057_v6  ;;  %v2246_v47 = vcombine.low %v9135_v19, %v9138_v55  ;;  %v9201_v46 = vrot.slane %v6602_v12, %v8836_v29  ;;  %v6588_v8 = vcombine.low %v1878_v30, %v1885_v31  ;;  %v1323_v0 = vpop.permute.xlu1 %1322 }
 0x489   : > { %v6590_v63 = vcombine.high %v1878_v30, %v1885_v31  ;;  %v1653_v43 = vrot.slane %v1639_v23, %v8836_v29  ;;  %6925 = vmatmul.mubr.msk.bf16.vlgmr.msra.gmra.mrb[16].mxu1 %vm3044_vm1, %v2985_v58  ;;  %v3279_v42 = vsel %vm3044_vm1, %v3003_v38, 0  ;;  %v1686_v18 = vcombine.low %v1630_v44, %v1646_v5 }
 0x48a   : > { %v1687_v27 = vcombine.high %v1630_v44, %v1646_v5  ;;  %v2247_v34 = vcombine.high %v9135_v19, %v9138_v55  ;;  %v2278_v25 = vcombine.low %v9151_v10, %v9190_v49  ;;  %v9211_v28 = vrot.slane %v6584_v3, %v8836_v29  ;;  %6935 = vmatpush3.bf16.xpose.msra.mxu1 %v3279_v42 }
 0x48b   : > { %v9214_v12 = vrot.slane %v6586_v4, %v8836_v29  ;;  %v2279_v23 = vcombine.high %v9151_v10, %v9190_v49  ;;  %v9222_v21 = vrot.slane %v6604_v20, %v8836_v29  ;;  %v9228_v22 = vrot.slane %v6606_v41, %v8836_v29  ;;  %6936 = vmatprep.mubr.msk.bf16.mxu1 %vm8059_vm0, %v8057_v6 }
 0x48c   : > { %v1702_v48 = vcombine.low %v1637_v40, %v1653_v43  ;;  %v9233_v9 = vrot.slane %v6588_v8, %v8836_v29  ;;  %v9236_v30 = vrot.slane %v6590_v63, %v8836_v29  ;;  %v2381_v20 = vrot.slane %v2367_v62, %v8839_v33  ;;  %6946 = vmatprep.subr.bf16.mxu1 %v8057_v6 }
 0x48d   : > { %v2413_v15 = vrot.slane %v2399_v59, %v8839_v33  ;;  %v9248_v26 = vrot.slane %v1686_v18, %v8839_v33  ;;  %v9251_v41 = vrot.slane %v1687_v27, %v8839_v33  ;;  %v2030_v31 = vcombine.low %v8815_v14, %v1317_v61 }
 0x48e   : > { %v2254_v53 = vrot.slane %v2246_v47, %v8839_v33  ;;  %v2382_v39 = vcombine.low %v9211_v28, %v9214_v12  ;;  %v2031_v54 = vcombine.high %v8815_v14, %v1317_v61  ;;  %v2286_v7 = vrot.slane %v2278_v25, %v8839_v33 }
 0x48f   : > { %v2432_v2 = vcombine.low %v2381_v20, %v2413_v15  ;;  %v1703_v62 = vcombine.high %v1637_v40, %v1653_v43  ;;  %v1710_v59 = vrot.slane %v1702_v48, %v8839_v33  ;;  %v2571_v1 = vcombine.high %v9158_v36, %v9161_v37 }
 0x490   : > { %v2705_v44 = vcombine.high %v2653_v50, %v2685_v51  ;;  %v2298_v4 = vcombine.low %v2254_v53, %v2286_v7  ;;  %v2046_v5 = vcombine.low %v9125_v16, %v1323_v0  ;;  %v2047_v58 = vcombine.high %v9125_v16, %v1323_v0 }
 0x491   : > { %v2987_v3 = vpack.c.bf16 %v2432_v2, %v2432_v2  ;;  %v6607_v38 = vcombine.low %v9248_v26, %v9251_v41  ;;  %v2038_v61 = vrot.slane %v2030_v31, %v8836_v29  ;;  %v3008_v47 = vpack.c.bf16 %v2571_v1, %v2571_v1 }
 0x492   : > { %v3005_v8 = vpack.c.bf16 %v2705_v44, %v2705_v44  ;;  %v2045_v40 = vrot.slane %v2031_v54, %v8836_v29  ;;  %v2990_v63 = vpack.c.bf16 %v2298_v4, %v2298_v4  ;;  %v2054_v36 = vrot.slane %v2046_v5, %v8836_v29 }
 0x493   : > { %6937 = vmatmul.mubr.msk.bf16.vlgmr.msra.gmra.mrb[20].mxu1 %vm3044_vm1, %v2987_v3  ;;  %v2061_v37 = vrot.slane %v2047_v58, %v8836_v29  ;;  %v1717_v50 = vrot.slane %v1703_v62, %v8839_v33  ;;  %v6609_v16 = vcombine.high %v9248_v26, %v9251_v41  ;;  %v2519_v43 = vcombine.high %v9072_v17, %v9104_v35 }
 0x494   : > { %v3371_v51 = vsel %vm3044_vm1, %v3005_v8, 0  ;;  %6948 = vmatprep.mubr.msk.bf16.mxu1 %vm8059_vm0, %v8057_v6  ;;  %6955 = vmatmul.mubr.msk.bf16.vlgmr.msra.gmra.mrb[12].mxu0 %vm3044_vm1, %v2990_v63  ;;  %v3509_v42 = vsel %vm3044_vm1, %v3008_v47, 0  ;;  %v2094_v18 = vcombine.low %v2038_v61, %v2054_v36  ;;  %v2095_v27 = vcombine.high %v2038_v61, %v2054_v36 }
 0x495   : > { %6947 = vmatpush3.bf16.xpose.msra.mxu1 %v3371_v51  ;;  %v2110_v25 = vcombine.low %v2045_v40, %v2061_v37  ;;  %6965 = vmatpush3.bf16.xpose.msra.mxu0 %v3509_v42  ;;  %v2111_v48 = vcombine.high %v2045_v40, %v2061_v37  ;;  %v2433_v26 = vcombine.high %v2381_v20, %v2413_v15 }
 0x496   : > { %6966 = vmatprep.mubr.msk.bf16.mxu0 %vm8059_vm0, %v8057_v6  ;;  %v2299_v41 = vcombine.high %v2254_v53, %v2286_v7  ;;  %v2102_v31 = vrot.slane %v2094_v18, %v8839_v33  ;;  %v2109_v0 = vrot.slane %v2095_v27, %v8839_v33  ;;  %6976 = vmatprep.subr.bf16.mxu0 %v8057_v6 }
 0x497   : > { %v2118_v17 = vrot.slane %v2110_v25, %v8839_v33  ;;  %6958 = vmatprep.subr.bf16.mxu1 %v8057_v6  ;;  %v2125_v35 = vrot.slane %v2111_v48, %v8839_v33  ;;  %v2533_v54 = vrot.slane %v2519_v43, %v8839_v33  ;;  %v2551_v2 = vcombine.high %v9107_v45, %v9110_v24 }
 0x498   : > { %v2654_v20 = vcombine.low %v9193_v52, %v9201_v46  ;;  %v2414_v15 = vcombine.low %v9233_v9, %v9236_v30  ;;  %v6611_v53 = vcombine.low %v1710_v59, %v1717_v50  ;;  %v6613_v7 = vcombine.high %v1710_v59, %v1717_v50 }
 0x499   : > { %v2686_v62 = vcombine.low %v9222_v21, %v9228_v22  ;;  %v9299_v1 = vrot.slane %v6607_v38, %v8836_v29  ;;  %v2989_v44 = vpack.c.bf16 %v2433_v26, %v2433_v26  ;;  %v2565_v3 = vrot.slane %v2551_v2, %v8839_v33 }
 0x49a   : > { %v2662_v4 = vrot.slane %v2654_v20, %v8839_v33  ;;  %v6615_v45 = vcombine.low %v2102_v31, %v2109_v0  ;;  %v6617_v24 = vcombine.high %v2102_v31, %v2109_v0  ;;  %v2992_v5 = vpack.c.bf16 %v2299_v41, %v2299_v41 }
 0x49b   : > { %v2694_v58 = vrot.slane %v2686_v62, %v8839_v33  ;;  %v9305_v61 = vrot.slane %v6609_v16, %v8836_v29  ;;  %v6619_v59 = vcombine.low %v2118_v17, %v2125_v35  ;;  %v6621_v47 = vcombine.high %v2118_v17, %v2125_v35 }
 0x49c   : > { %6949 = vmatmul.mubr.msk.bf16.vlgmr.msra.gmra.mrb[24].mxu1 %vm3044_vm1, %v2989_v44  ;;  %v2572_v8 = vcombine.low %v2533_v54, %v2565_v3  ;;  %v9309_v38 = vrot.slane %v6611_v53, %v8836_v29  ;;  %v9312_v40 = vrot.slane %v6613_v7, %v8836_v29  ;;  %6967 = vmatmul.mubr.msk.bf16.vlgmr.msra.gmra.mrb[16].mxu0 %vm3044_vm1, %v2992_v5 }
 0x49d   : > { %v2706_v63 = vcombine.low %v2662_v4, %v2694_v58  ;;  %6960 = vmatprep.mubr.msk.bf16.mxu1 %vm8059_vm0, %v8057_v6  ;;  %6978 = vmatprep.mubr.msk.bf16.mxu0 %vm8059_vm0, %v8057_v6  ;;  %v2390_v37 = vrot.slane %v2382_v39, %v8839_v33  ;;  %v2261_v50 = vrot.slane %v2247_v34, %v8839_v33 }
 0x49e   : > { %v3010_v36 = vpack.c.bf16 %v2572_v8, %v2572_v8  ;;  %v2293_v16 = vrot.slane %v2279_v23, %v8839_v33  ;;  %v2854_v51 = vrot.slane %v6615_v45, %v8836_v29  ;;  %v2870_v43 = vrot.slane %v6617_v24, %v8836_v29 }
 0x49f   : > { %v3007_v42 = vpack.c.bf16 %v2706_v63, %v2706_v63  ;;  %v2422_v18 = vrot.slane %v2414_v15, %v8839_v33  ;;  %v2886_v27 = vrot.slane %v6619_v59, %v8836_v29  ;;  %v2902_v39 = vrot.slane %v6621_v47, %v8836_v29 }
 0x4a0   : > { %v3601_v25 = vsel %vm3044_vm1, %v3010_v36, 0  ;;  %v2573_v19 = vcombine.high %v2533_v54, %v2565_v3  ;;  %v2707_v34 = vcombine.high %v2662_v4, %v2694_v58  ;;  %v2774_v10 = vcombine.low %v9299_v1, %v9305_v61 }
 0x4a1   : > { %6977 = vmatpush3.bf16.xpose.msra.mxu0 %v3601_v25  ;;  %v3463_v55 = vsel %vm3044_vm1, %v3007_v42, 0  ;;  %v2300_v49 = vcombine.low %v2261_v50, %v2293_v16  ;;  %v2806_v23 = vcombine.low %v9309_v38, %v9312_v40  ;;  %v2655_v48 = vcombine.high %v9193_v52, %v9201_v46 }
 0x4a2   : > { %6959 = vmatpush3.bf16.xpose.msra.mxu1 %v3463_v55  ;;  %6988 = vmatprep.subr.bf16.mxu0 %v8057_v6  ;;  %v2434_v26 = vcombine.low %v2390_v37, %v2422_v18  ;;  %v2782_v41 = vrot.slane %v2774_v10, %v8839_v33  ;;  %v2687_v31 = vcombine.high %v9222_v21, %v9228_v22 }
 0x4a3   : > { %6970 = vmatprep.subr.bf16.mxu1 %v8057_v6  ;;  %v3012_v0 = vpack.c.bf16 %v2573_v19, %v2573_v19  ;;  %v2814_v17 = vrot.slane %v2806_v23, %v8839_v33  ;;  %v2910_v35 = vcombine.low %v2854_v51, %v2870_v43  ;;  %v2942_v54 = vcombine.low %v2886_v27, %v2902_v39 }
 0x4a4   : > { %v3009_v2 = vpack.c.bf16 %v2707_v34, %v2707_v34  ;;  %v2669_v20 = vrot.slane %v2655_v48, %v8839_v33  ;;  %v2701_v15 = vrot.slane %v2687_v31, %v8839_v33  ;;  %v2775_v52 = vcombine.high %v9299_v1, %v9305_v61 }
 0x4a5   : > { %v2994_v46 = vpack.c.bf16 %v2300_v49, %v2300_v49  ;;  %v2918_v53 = vrot.slane %v2910_v35, %v8839_v33  ;;  %v2950_v7 = vrot.slane %v2942_v54, %v8839_v33  ;;  %v9356_v62 = vcombine.high %v2782_v41, %v2814_v17 }
 0x4a6   : > { %v2991_v21 = vpack.c.bf16 %v2434_v26, %v2434_v26  ;;  %v3693_v22 = vsel %vm3044_vm1, %v3012_v0, 0  ;;  %v2838_v44 = vcombine.low %v2782_v41, %v2814_v17  ;;  %v2383_v4 = vcombine.high %v9211_v28, %v9214_v12  ;;  %v9410_v26 = vld [vmem:[#allocation6] ss:$0 sm:$0xff] }
 0x4a7   : > { %v9360_v3 = vcombine.high %v2918_v53, %v2950_v7  ;;  %v3555_v1 = vsel %vm3044_vm1, %v3009_v2, 0  ;;  %v2708_v45 = vcombine.low %v2669_v20, %v2701_v15  ;;  %v2415_v24 = vcombine.high %v9233_v9, %v9236_v30 }
 0x4a8   : > { %6979 = vmatmul.mubr.msk.bf16.vlgmr.msra.gmra.mrb[20].mxu0 %vm3044_vm1, %v2994_v46  ;;  %v2435_v5 = vcombine.high %v2390_v37, %v2422_v18  ;;  %v2301_v58 = vcombine.high %v2261_v50, %v2293_v16  ;;  %v2789_v28 = vrot.slane %v2775_v52, %v8839_v33  ;;  %v2807_v12 = vcombine.high %v9309_v38, %v9312_v40 }
 0x4a9   : > { %6961 = vmatmul.mubr.msk.bf16.vlgmr.msra.gmra.mrb[28].mxu1 %vm3044_vm1, %v2991_v21  ;;  %6989 = vmatpush3.bf16.xpose.msra.mxu0 %v3693_v22  ;;  %v2911_v61 = vcombine.high %v2854_v51, %v2870_v43  ;;  %v3014_v9 = vpack.c.bf16 %v2838_v44, %v2838_v44  ;;  %v2943_v30 = vcombine.high %v2886_v27, %v2902_v39  ;;  %v9422_v21 = vld [vmem:[#allocation6 + $0x1] ss:$0 sm:$0xff] }
 0x4aa   : > { %6971 = vmatpush3.bf16.xpose.msra.mxu1 %v3555_v1  ;;  %6972 = vmatprep.mubr.msk.bf16.mxu1 %vm8059_vm0, %v8057_v6  ;;  %v3011_v59 = vpack.c.bf16 %v2708_v45, %v2708_v45  ;;  %v2821_v47 = vrot.slane %v2807_v12, %v8839_v33  ;;  %v2993_v63 = vpack.c.bf16 %v2435_v5, %v2435_v5 }
 0x4ab   : > { %6990 = vmatprep.mubr.msk.bf16.mxu0 %vm8059_vm0, %v8057_v6  ;;  %7000 = vmatprep.subr.bf16.mxu0 %v8057_v6  ;;  %v2925_v8 = vrot.slane %v2911_v61, %v8839_v33  ;;  %v2996_v36 = vpack.c.bf16 %v2301_v58, %v2301_v58  ;;  %v2957_v37 = vrot.slane %v2943_v30, %v8839_v33  ;;  %v3979_v51 = vsel %vm3977_vm2, %v3014_v9, 0 }
 0x4ac   : > { %6982 = vmatprep.subr.bf16.mxu1 %v8057_v6  ;;  %v2397_v50 = vrot.slane %v2383_v4, %v8839_v33  ;;  %v2429_v16 = vrot.slane %v2415_v24, %v8839_v33  ;;  %v9382_v38 = vcombine.low %v2789_v28, %v2821_v47  ;;  %v9384_v40 = vcombine.high %v2789_v28, %v2821_v47 }
 0x4ad   : > { %v9388_v43 = vcombine.low %v2925_v8, %v2957_v37  ;;  %v9390_v42 = vcombine.high %v2925_v8, %v2957_v37  ;;  %v3647_v18 = vsel %vm3044_vm1, %v3011_v59, 0  ;;  %v2709_v27 = vcombine.high %v2669_v20, %v2701_v15 }
 0x4ae   : > { %v2436_v39 = vcombine.low %v2397_v50, %v2429_v16  ;;  %v2974_v34 = vcombine.low %v2918_v53, %v2950_v7  ;;  %v2437_v10 = vcombine.high %v2397_v50, %v2429_v16 }
 0x4af   : > { %v3013_v25 = vpack.c.bf16 %v2709_v27, %v2709_v27 }
 0x4b0   : > { %6991 = vmatmul.mubr.msk.bf16.vlgmr.msra.gmra.mrb[24].mxu0 %vm3044_vm1, %v2996_v36  ;;  %v2995_v19 = vpack.c.bf16 %v2436_v39, %v2436_v39  ;;  %v3015_v49 = vpack.c.bf16 %v2974_v34, %v2974_v34  ;;  %v2997_v23 = vpack.c.bf16 %v2437_v10, %v2437_v10 }
 0x4b1   : > { %6973 = vmatmul.mubr.msk.bf16.vlgmr.msra.gmra.mrb[32].mxu1 %vm3044_vm1, %v2993_v63  ;;  %7001 = vmatpush3.bf16.msra.mxu0 %v3979_v51  ;;  %v3739_v55 = vsel %vm3044_vm1, %v3013_v25, 0 }
 0x4b2   : > { %6983 = vmatpush3.bf16.xpose.msra.mxu1 %v3647_v18  ;;  %6984 = vmatprep.mubr.msk.bf16.mxu1 %vm8059_vm0, %v8057_v6  ;;  %v4025_v48 = vsel %vm3977_vm2, %v3015_v49, 0 }
 0x4b3   : > { %6994 = vmatprep.subr.bf16.mxu1 %v8057_v6  ;;  %7002 = vmatprep.mubr.msk.bf16.mxu0 %vm8059_vm0, %v8057_v6 }
 0x4b4   : > { %7012 = vmatprep.subr.bf16.mxu0 %v8057_v6 }
 0x4b9   : > { %6985 = vmatmul.mubr.msk.bf16.vlgmr.msra.gmra.mrb[36].mxu1 %vm3044_vm1, %v2995_v19 }
 0x4ba   : > { %6995 = vmatpush3.bf16.xpose.msra.mxu1 %v3739_v55  ;;  %6996 = vmatprep.mubr.msk.bf16.mxu1 %vm8059_vm0, %v8057_v6 }
 0x4bb   : > { %7006 = vmatprep.subr.bf16.mxu1 %v8057_v6 }
 0x4c1   : > { %6997 = vmatmul.mubr.msk.bf16.vlgmr.msra.gmra.mrb[40].mxu1 %vm3044_vm1, %v2997_v23 }
 0x4c2   : > { %7007 = vmatpush3.bf16.msra.mxu1 %v4025_v48  ;;  %7008 = vmatprep.mubr.msk.bf16.mxu1 %vm8059_vm0, %v8057_v6 }
 0x4c3   : > { %7018 = vmatprep.subr.bf16.mxu1 %v8057_v6 }
 0x53f   : > { %v3085_v41 = vpop.f32.mrb[4].mxu1 }
 0x540   : > { %v9413_v31 = vadd.f32 %v9410_v26, %v3085_v41  ;;  %v6908_v0 = vpop.f32.mrb[5].mxu1 }
 0x541   : > { %v3088_v17 = vpop.f32.mrb[6].mxu1  ;;  %v3269_v35 = vpop.f32.mrb[4].mxu0 }
 0x542   : > { %v6909_v54 = vpop.f32.mrb[7].mxu1  ;;  %v3782_v2 = vsel %vm3781_vm3, %v9413_v31, -inf  ;;  %v9418_v20 = vadd.f32 %v9410_v26, %v3269_v35  ;;  %v6932_v15 = vpop.f32.mrb[5].mxu0 }
 0x543   : > { %3783 = vmax.xlane.f32.xlu0 %v3782_v2  ;;  %v3272_v52 = vpop.f32.mrb[6].mxu0 }
 0x544   : > { %v6933_v46 = vpop.f32.mrb[7].mxu0  ;;  %v3794_v53 = vsel %vm3781_vm3, %v9418_v20, -inf }
 0x547   : > { %3795 = vmax.xlane.f32.xlu0 %v3794_v53 }
 0x549   : > { %v3361_v7 = vpop.f32.mrb[8].mxu0 }
 0x54a   : > { %v9425_v22 = vadd.f32 %v9410_v26, %v3361_v7  ;;  %v6944_v44 = vpop.f32.mrb[9].mxu0 }
 0x54b   : > { %v3131_v4 = vpop.f32.mrb[8].mxu1  ;;  %v3364_v1 = vpop.f32.mrb[10].mxu0 }
 0x54c   : > { %v9428_v45 = vadd.f32 %v9422_v21, %v3131_v4  ;;  %v6914_v24 = vpop.f32.mrb[9].mxu1  ;;  %v6945_v5 = vpop.f32.mrb[11].mxu0  ;;  %v3800_v58 = vsel %vm3781_vm3, %v9425_v22, -inf }
 0x54d   : > { %v3134_v28 = vpop.f32.mrb[10].mxu1  ;;  %3801 = vmax.xlane.f32.xlu0 %v3800_v58 }
 0x54e   : > { %v6915_v12 = vpop.f32.mrb[11].mxu1  ;;  %v3785_v61 = vsel %vm3781_vm3, %v9428_v45, -inf }
 0x54f   : > { %3786 = vmax.xlane.f32.xlu1 %v3785_v61 }
 0x553   : > { %v3177_v9 = vpop.f32.mrb[12].mxu1 }
 0x554   : > { %v9435_v30 = vadd.f32 %v9410_v26, %v3177_v9  ;;  %v6920_v59 = vpop.f32.mrb[13].mxu1 }
 0x555   : > { %v3180_v47 = vpop.f32.mrb[14].mxu1 }
 0x556   : > { %v6921_v8 = vpop.f32.mrb[15].mxu1  ;;  %v3788_v63 = vsel %vm3781_vm3, %v9435_v30, -inf }
 0x557   : > { %3789 = vmax.xlane.f32.xlu0 %v3788_v63 }
 0x55c   : > { %v3223_v36 = vpop.f32.mrb[16].mxu1 }
 0x55d   : > { %v6926_v37 = vpop.f32.mrb[17].mxu1  ;;  %v9448_v23 = vadd.f32 %v9422_v21, %v3223_v36 }
 0x55e   : > { %v3226_v50 = vpop.f32.mrb[18].mxu1 }
 0x55f   : > { %v6927_v16 = vpop.f32.mrb[19].mxu1  ;;  %v3791_v0 = vsel %vm3781_vm3, %v9448_v23, -inf }
 0x566   : > { %v3315_v51 = vpop.f32.mrb[20].mxu1 }
 0x567   : > { %v9440_v18 = vadd.f32 %v9422_v21, %v3315_v51  ;;  %v6938_v27 = vpop.f32.mrb[21].mxu1  ;;  %v3453_v39 = vpop.f32.mrb[12].mxu0 }
 0x568   : > { %v3318_v25 = vpop.f32.mrb[22].mxu1  ;;  %v9443_v19 = vadd.f32 %v9410_v26, %v3453_v39  ;;  %v6956_v55 = vpop.f32.mrb[13].mxu0 }
 0x569   : > { %v6939_v34 = vpop.f32.mrb[23].mxu1  ;;  %v3797_v10 = vsel %vm3781_vm3, %v9440_v18, -inf  ;;  %v3456_v49 = vpop.f32.mrb[14].mxu0 }
 0x56a   : > { %3798 = vmax.xlane.f32.xlu1 %v3797_v10  ;;  %v6957_v48 = vpop.f32.mrb[15].mxu0  ;;  %v3806_v41 = vsel %vm3781_vm3, %v9443_v19, -inf }
 0x56b   : > { %3807 = vmax.xlane.f32.xlu0 %v3806_v41 }
 0x56f   : > { %v3407_v17 = vpop.f32.mrb[24].mxu1  ;;  %v3545_v35 = vpop.f32.mrb[16].mxu0  ;;  %3792 = vmax.xlane.f32.xlu0 %v3791_v0 }
 0x570   : > { %v9455_v54 = vadd.f32 %v9422_v21, %v3407_v17  ;;  %v6950_v2 = vpop.f32.mrb[25].mxu1  ;;  %v9458_v15 = vadd.f32 %v9410_v26, %v3545_v35  ;;  %v6968_v52 = vpop.f32.mrb[17].mxu0 }
 0x571   : > { %v3410_v46 = vpop.f32.mrb[26].mxu1  ;;  %v3548_v53 = vpop.f32.mrb[18].mxu0 }
 0x572   : > { %v6951_v7 = vpop.f32.mrb[27].mxu1  ;;  %v3803_v44 = vsel %vm3781_vm3, %v9455_v54, -inf  ;;  %v6969_v4 = vpop.f32.mrb[19].mxu0  ;;  %v3812_v1 = vsel %vm3781_vm3, %v9458_v15, -inf }
 0x573   : > { %3804 = vmax.xlane.f32.xlu1 %v3803_v44  ;;  %3813 = vmax.xlane.f32.xlu0 %v3812_v1  ;;  %v9498_v1 = vpop.permute.xlu0 %1326 }
 0x57b   : > { %v3637_v24 = vpop.f32.mrb[20].mxu0 }
 0x57c   : > { %v3499_v5 = vpop.f32.mrb[28].mxu1  ;;  %v6980_v58 = vpop.f32.mrb[21].mxu0  ;;  %v9487_v7 = vadd.f32 %v9410_v26, %v3637_v24 }
 0x57d   : > { %v9465_v28 = vadd.f32 %v9422_v21, %v3499_v5  ;;  %v6962_v12 = vpop.f32.mrb[29].mxu1  ;;  %v3640_v61 = vpop.f32.mrb[22].mxu0 }
 0x57e   : > { %v3502_v9 = vpop.f32.mrb[30].mxu1  ;;  %v6981_v59 = vpop.f32.mrb[23].mxu0  ;;  %v3818_v4 = vsel %vm3781_vm3, %v9487_v7, -inf }
 0x57f   : > { %v6963_v47 = vpop.f32.mrb[31].mxu1  ;;  %v3809_v8 = vsel %vm3781_vm3, %v9465_v28, -inf  ;;  %v9500_v5 = vpop.permute.xlu1 %1328 }
 0x580   : > { %3810 = vmax.xlane.f32.xlu1 %v3809_v8 }
 0x583   : > { %v3729_v63 = vpop.f32.mrb[24].mxu0 }
 0x584   : > { %v3591_v36 = vpop.f32.mrb[32].mxu1  ;;  %v6992_v37 = vpop.f32.mrb[25].mxu0  ;;  %v9490_v44 = vadd.f32 %v9410_v26, %v3729_v63 }
 0x585   : > { %v9470_v50 = vadd.f32 %v9422_v21, %v3591_v36  ;;  %v6974_v16 = vpop.f32.mrb[33].mxu1  ;;  %v3732_v51 = vpop.f32.mrb[26].mxu0 }
 0x586   : > { %v3594_v27 = vpop.f32.mrb[34].mxu1  ;;  %v6993_v39 = vpop.f32.mrb[27].mxu0 }
 0x587   : > { %v6975_v25 = vpop.f32.mrb[35].mxu1  ;;  %v3815_v55 = vsel %vm3781_vm3, %v9470_v50, -inf  ;;  %v9503_v26 = vpop.permute.xlu1 %1332 }
 0x588   : > { %3816 = vmax.xlane.f32.xlu1 %v3815_v55 }
 0x589   : > { %1338 = vrot.lane.b32.xlu0 %v8805_v13, %s8065_s15 }
 0x58b   : > { %v9506_v47 = vpop.permute.xlu1 %1334 }
 0x58c   : > { %v3683_v34 = vpop.f32.mrb[36].mxu1 }
 0x58d   : > { %v9477_v10 = vadd.f32 %v9422_v21, %v3683_v34  ;;  %v6986_v49 = vpop.f32.mrb[37].mxu1 }
 0x58e   : > { %v3686_v48 = vpop.f32.mrb[38].mxu1 }
 0x58f   : > { %v6987_v41 = vpop.f32.mrb[39].mxu1  ;;  %v3821_v0 = vsel %vm3781_vm3, %v9477_v10, -inf }
 0x590   : > { %3822 = vmax.xlane.f32.xlu1 %v3821_v0 }
 0x594   : > { %v3775_v17 = vpop.f32.mrb[40].mxu1 }
 0x595   : > { %v9482_v35 = vadd.f32 %v9422_v21, %v3775_v17  ;;  %v6998_v2 = vpop.f32.mrb[41].mxu1  ;;  %v3824_v21 = vsel %vm3781_vm3, %v9490_v44, -inf }
 0x596   : > { %v3778_v52 = vpop.f32.mrb[42].mxu1 }
 0x597   : > { %v6999_v46 = vpop.f32.mrb[43].mxu1  ;;  %v3827_v53 = vsel %vm3781_vm3, %v9482_v35, -inf }
 0x598   : > { %3828 = vmax.xlane.f32.xlu1 %v3827_v53 }
 0x5a8   : > { %3819 = vmax.xlane.f32.xlu0 %v3818_v4 }
 0x5a9   : > { %1340 = vrot.lane.b32.xlu1 %v8815_v14, %s8065_s15 }
 0x5ac   : > { %3825 = vmax.xlane.f32.xlu0 %v3824_v21 }
 0x5d0   : > { %v3784_v24 = vpop.xlane.xlu0 %3783 }
 0x5d1   : > { %v3830_v58 = vsub.f32 %v9413_v31, %v3784_v24 }
 0x5d3   : > { %v3846_v12 = vmul.f32 1.442695, %v3830_v58 }
 0x5d4   : > { %v3796_v61 = vpop.xlane.xlu0 %3795 }
 0x5d5   : > { %7442 = vpow2.f32 %v3846_v12  ;;  %v3834_v9 = vsub.f32 %v9418_v20, %v3796_v61 }
 0x5d7   : > { %v3854_v59 = vmul.f32 1.442695, %v3834_v9 }
 0x5d9   : > { %7444 = vpow2.f32 %v3854_v59 }
 0x5da   : > { %v3802_v8 = vpop.xlane.xlu0 %3801 }
 0x5db   : > { %v3836_v63 = vsub.f32 %v9425_v22, %v3802_v8 }
 0x5dc   : > { %v3787_v36 = vpop.xlane.xlu1 %3786 }
 0x5dd   : > { %v3858_v37 = vmul.f32 1.442695, %v3836_v63  ;;  %v3831_v16 = vsub.f32 %v9428_v45, %v3787_v36 }
 0x5df   : > { %v9510_v51 = vpop.eup %7442  ;;  %7446 = vpow2.f32 %v3858_v37  ;;  %v3848_v31 = vmul.f32 1.442695, %v3831_v16 }
 0x5e0   : > { %v3878_v27 = vsel %vm3781_vm3, %v9510_v51, 0.0 }
 0x5e1   : > { %3879 = vadd.xlane.f32.xlu0 %v3878_v27  ;;  %7448 = vpow2.f32 %v3848_v31 }
 0x5e3   : > { %v9514_v20 = vpop.eup %7444 }
 0x5e4   : > { %v3890_v39 = vsel %vm3781_vm3, %v9514_v20, 0.0  ;;  %v3790_v25 = vpop.xlane.xlu0 %3789 }
 0x5e5   : > { %3891 = vadd.xlane.f32.xlu0 %v3890_v39  ;;  %v3832_v22 = vsub.f32 %v9435_v30, %v3790_v25 }
 0x5e7   : > { %v3850_v55 = vmul.f32 1.442695, %v3832_v22 }
 0x5e9   : > { %v9519_v45 = vpop.eup %7446  ;;  %7450 = vpow2.f32 %v3850_v55 }
 0x5ea   : > { %v3896_v34 = vsel %vm3781_vm3, %v9519_v45, 0.0 }
 0x5eb   : > { %v9523_v49 = vpop.eup %7448  ;;  %3897 = vadd.xlane.f32.xlu0 %v3896_v34 }
 0x5ec   : > { %v3881_v48 = vsel %vm3781_vm3, %v9523_v49, 0.0 }
 0x5ed   : > { %3882 = vadd.xlane.f32.xlu1 %v3881_v48 }
 0x5f3   : > { %v9527_v41 = vpop.eup %7450 }
 0x5f4   : > { %v3884_v0 = vsel %vm3781_vm3, %v9527_v41, 0.0 }
 0x5f5   : > { %3885 = vadd.xlane.f32.xlu0 %v3884_v0 }
 0x5f7   : > { %v3799_v30 = vpop.xlane.xlu1 %3798 }
 0x5f8   : > { %v3835_v17 = vsub.f32 %v9440_v18, %v3799_v30  ;;  %v3808_v2 = vpop.xlane.xlu0 %3807 }
 0x5f9   : > { %v3838_v52 = vsub.f32 %v9443_v19, %v3808_v2 }
 0x5fa   : > { %v3856_v53 = vmul.f32 1.442695, %v3835_v17 }
 0x5fb   : > { %v3862_v46 = vmul.f32 1.442695, %v3838_v52 }
 0x5fc   : > { %v3793_v4 = vpop.xlane.xlu0 %3792 }
 0x5fd   : > { %7452 = vpow2.f32 %v3862_v46  ;;  %v3833_v21 = vsub.f32 %v9448_v23, %v3793_v4 }
 0x5fe   : > { %7454 = vpow2.f32 %v3856_v53 }
 0x5ff   : > { %v3852_v24 = vmul.f32 1.442695, %v3833_v21 }
 0x600   : > { %v3805_v58 = vpop.xlane.xlu1 %3804  ;;  %v3814_v12 = vpop.xlane.xlu0 %3813 }
 0x601   : > { %v3837_v61 = vsub.f32 %v9455_v54, %v3805_v58  ;;  %7456 = vpow2.f32 %v3852_v24 }
 0x603   : > { %v3860_v9 = vmul.f32 1.442695, %v3837_v61 }
 0x604   : > { %v9535_v59 = vpop.permute.xlu0 %1338 }
 0x605   : > { %7458 = vpow2.f32 %v3860_v9  ;;  %v1654_v18 = vcombine.low %v9498_v1, %v9535_v59  ;;  %v1655_v19 = vcombine.high %v9498_v1, %v9535_v59 }
 0x607   : > { %v9541_v8 = vpop.eup %7452 }
 0x608   : > { %v3902_v23 = vsel %vm3781_vm3, %v9541_v8, 0.0  ;;  %v9545_v63 = vpop.eup %7454 }
 0x609   : > { %3903 = vadd.xlane.f32.xlu0 %v3902_v23  ;;  %v3893_v16 = vsel %vm3781_vm3, %v9545_v63, 0.0 }
 0x60b   : > { %v9547_v54 = vpop.eup %7456 }
 0x60c   : > { %v3887_v37 = vsel %vm3781_vm3, %v9547_v54, 0.0 }
 0x60d   : > { %v3811_v36 = vpop.xlane.xlu1 %3810  ;;  %3888 = vadd.xlane.f32.xlu1 %v3887_v37  ;;  %3894 = vadd.xlane.f32.xlu0 %v3893_v16 }
 0x60e   : > { %v3839_v31 = vsub.f32 %v9465_v28, %v3811_v36  ;;  %v3840_v28 = vsub.f32 %v9458_v15, %v3814_v12 }
 0x60f   : > { %v9554_v27 = vpop.eup %7458 }
 0x610   : > { %v3864_v39 = vmul.f32 1.442695, %v3839_v31  ;;  %v3899_v25 = vsel %vm3781_vm3, %v9554_v27, 0.0  ;;  %v3866_v48 = vmul.f32 1.442695, %v3840_v28 }
 0x611   : > { %3900 = vadd.xlane.f32.xlu1 %v3899_v25 }
 0x612   : > { %7460 = vpow2.f32 %v3864_v39 }
 0x613   : > { %7462 = vpow2.f32 %v3866_v48 }
 0x615   : > { %v3817_v34 = vpop.xlane.xlu1 %3816 }
 0x616   : > { %v3841_v15 = vsub.f32 %v9470_v50, %v3817_v34  ;;  %v3016_v34 = vpack.c.bf16 %v9356_v62, %v9356_v62  ;;  %v3017_v62 = vpack.c.bf16 %v9360_v3, %v9360_v3 }
 0x618   : > { %v3868_v24 = vmul.f32 1.442695, %v3841_v15 }
 0x61c   : > { %v9558_v22 = vpop.eup %7460 }
 0x61d   : > { %v3905_v55 = vsel %vm3781_vm3, %v9558_v22, 0.0  ;;  %v3823_v0 = vpop.xlane.xlu1 %3822 }
 0x61e   : > { %3906 = vadd.xlane.f32.xlu1 %v3905_v55  ;;  %v3843_v30 = vsub.f32 %v9477_v10, %v3823_v0 }
 0x620   : > { %v3872_v52 = vmul.f32 1.442695, %v3843_v30  ;;  %v4071_v30 = vsel %vm3977_vm2, %v3016_v34, 0 }
 0x623   : > { %1344 = vrot.lane.b32.xlu0 %v8805_v13, %s8066_s26 }
 0x625   : > { %v3829_v21 = vpop.xlane.xlu1 %3828 }
 0x626   : > { %v3845_v58 = vsub.f32 %v9482_v35, %v3829_v21 }
 0x628   : > { %v3876_v12 = vmul.f32 1.442695, %v3845_v58 }
 0x629   : > { %v9596_v39 = vpop.permute.xlu1 %1340 }
 0x62f   : > { %1346 = vrot.lane.b32.xlu1 %v8815_v14, %s8066_s26  ;;  %v9571_v14 = vpop.eup %7462 }
 0x630   : > { %v3908_v10 = vsel %vm3781_vm3, %v9571_v14, 0.0 }
 0x635   : > { %v3820_v17 = vpop.xlane.xlu0 %3819 }
 0x636   : > { %v3842_v2 = vsub.f32 %v9487_v7, %v3820_v17 }
 0x638   : > { %v3870_v46 = vmul.f32 1.442695, %v3842_v2 }
 0x639   : > { %v3826_v53 = vpop.xlane.xlu0 %3825 }
 0x63a   : > { %7464 = vpow2.f32 %v3870_v46  ;;  %v3844_v13 = vsub.f32 %v9490_v44, %v3826_v53  ;;  %v4117_v53 = vsel %vm3977_vm2, %v3017_v62, 0 }
 0x63b   : > { %7466 = vpow2.f32 %v3872_v52 }
 0x63c   : > { %v3874_v4 = vmul.f32 1.442695, %v3844_v13 }
 0x63e   : > { %7468 = vpow2.f32 %v3874_v4 }
 0x63f   : > { %7470 = vpow2.f32 %v3868_v24 }
 0x640   : > { %7472 = vpow2.f32 %v3876_v12 }
 0x642   : > { %3909 = vadd.xlane.f32.xlu0 %v3908_v10 }
 0x644   : > { %v9576_v7 = vpop.eup %7464 }
 0x645   : > { %v3914_v50 = vsel %vm3781_vm3, %v9576_v7, 0.0  ;;  %v9580_v44 = vpop.eup %7466 }
 0x646   : > { %3915 = vadd.xlane.f32.xlu0 %v3914_v50  ;;  %v3917_v61 = vsel %vm3781_vm3, %v9580_v44, 0.0 }
 0x648   : > { %v9584_v35 = vpop.eup %7468 }
 0x649   : > { %v3920_v9 = vsel %vm3781_vm3, %v9584_v35, 0.0  ;;  %v9588_v23 = vpop.eup %7470 }
 0x64a   : > { %3918 = vadd.xlane.f32.xlu0 %v3917_v61  ;;  %v3911_v36 = vsel %vm3781_vm3, %v9588_v23, 0.0  ;;  %v9592_v37 = vpop.eup %7472 }
 0x64b   : > { %v3923_v16 = vsel %vm3781_vm3, %v9592_v37, 0.0 }
 0x64e   : > { %3921 = vadd.xlane.f32.xlu0 %v3920_v9 }
 0x653   : > { %3912 = vadd.xlane.f32.xlu1 %v3911_v36 }
 0x657   : > { %3924 = vadd.xlane.f32.xlu1 %v3923_v16 }
 0x66e   : > { %v3880_v31 = vpop.xlane.xlu0 %3879 }
 0x66f   : > { %7474 = vrcp.f32 %v3880_v31  ;;  %v1662_v31 = vrot.slane %v1654_v18, %v8836_v29 }
 0x672   : > { %v3892_v55 = vpop.xlane.xlu0 %3891 }
 0x678   : > { %v3898_v17 = vpop.xlane.xlu0 %3897 }
 0x679   : > { %v7475_v25 = vpop.eup %7474 }
 0x67a   : > { %v3942_v28 = vmul.f32 %v7475_v25, %v9510_v51  ;;  %v3883_v48 = vpop.xlane.xlu1 %3882 }
 0x67b   : > { %7476 = vrcp.f32 %v3883_v48 }
 0x67c   : > { %v3958_v0 = vpack.c.bf16 %v3942_v28, %v3942_v28 }
 0x67e   : > { %7003 = vmatmul.mubr.msk.bf16.vlgmr.msra.gmra.mrb[28].mxu0 %vm3781_vm3, %v3958_v0 }
 0x67f   : > { %7013 = vmatpush3.bf16.msra.mxu0 %v4071_v30  ;;  %7014 = vmatprep.mubr.msk.bf16.mxu0 %vm8059_vm0, %v8057_v6 }
 0x680   : > { %7024 = vmatprep.subr.bf16.mxu0 %v8057_v6 }
 0x682   : > { %v3886_v2 = vpop.xlane.xlu0 %3885 }
 0x683   : > { %7478 = vrcp.f32 %v3886_v2 }
 0x684   : > { %7480 = vrcp.f32 %v3892_v55 }
 0x685   : > { %v7477_v51 = vpop.eup %7476  ;;  %7482 = vrcp.f32 %v3898_v17  ;;  %v3019_v17 = vpack.c.bf16 %v9388_v43, %v9388_v43  ;;  %v2062_v43 = vcombine.low %v9500_v5, %v9596_v39 }
 0x686   : > { %v3943_v52 = vmul.f32 %v7477_v51, %v9523_v49  ;;  %v3018_v49 = vpack.c.bf16 %v9382_v38, %v9382_v38 }
 0x688   : > { %v3959_v46 = vpack.c.bf16 %v3943_v52, %v3943_v52  ;;  %v4163_v21 = vsel %vm3977_vm2, %v3018_v49, 0 }
 0x68a   : > { %7009 = vmatmul.mubr.msk.bf16.vlgmr.msra.gmra.mrb[44].mxu1 %vm3781_vm3, %v3959_v46 }
 0x68b   : > { %7019 = vmatpush3.bf16.msra.mxu1 %v4117_v53  ;;  %7020 = vmatprep.mubr.msk.bf16.mxu1 %vm8059_vm0, %v8057_v6 }
 0x68c   : > { %7030 = vmatprep.subr.bf16.mxu1 %v8057_v6 }
 0x68d   : > { %v7479_v13 = vpop.eup %7478 }
 0x68e   : > { %v3944_v15 = vmul.f32 %v7479_v13, %v9527_v41  ;;  %v7481_v4 = vpop.eup %7480  ;;  %v3020_v41 = vpack.c.bf16 %v9384_v40, %v9384_v40 }
 0x68f   : > { %v3946_v24 = vmul.f32 %v7481_v4, %v9514_v20  ;;  %v7483_v10 = vpop.eup %7482 }
 0x690   : > { %v3960_v3 = vpack.c.bf16 %v3944_v15, %v3944_v15  ;;  %v4255_v12 = vsel %vm3977_vm2, %v3020_v41, 0  ;;  %v3948_v20 = vmul.f32 %v7483_v10, %v9519_v45  ;;  %v1669_v45 = vrot.slane %v1655_v19, %v8836_v29 }
 0x691   : > { %v3962_v38 = vpack.c.bf16 %v3946_v24, %v3946_v24  ;;  %v2063_v10 = vcombine.high %v9500_v5, %v9596_v39 }
 0x692   : > { %7015 = vmatmul.mubr.msk.bf16.vlgmr.msra.gmra.mrb[32].mxu0 %vm3781_vm3, %v3960_v3  ;;  %v3964_v16 = vpack.c.bf16 %v3948_v20, %v3948_v20 }
 0x693   : > { %7025 = vmatpush3.bf16.msra.mxu0 %v4163_v21  ;;  %7026 = vmatprep.mubr.msk.bf16.mxu0 %vm8059_vm0, %v8057_v6 }
 0x694   : > { %7036 = vmatprep.subr.bf16.mxu0 %v8057_v6 }
 0x696   : > { %v3904_v58 = vpop.xlane.xlu0 %3903 }
 0x69a   : > { %7027 = vmatmul.mubr.msk.bf16.vlgmr.msra.gmra.mrb[36].mxu0 %vm3781_vm3, %v3962_v38  ;;  %v3895_v50 = vpop.xlane.xlu0 %3894  ;;  %v3889_v61 = vpop.xlane.xlu1 %3888 }
 0x69b   : > { %7037 = vmatpush3.bf16.msra.mxu0 %v4255_v12  ;;  %7038 = vmatprep.mubr.msk.bf16.mxu0 %vm8059_vm0, %v8057_v6  ;;  %7484 = vrcp.f32 %v3889_v61 }
 0x69c   : > { %7048 = vmatprep.subr.bf16.mxu0 %v8057_v6  ;;  %7486 = vrcp.f32 %v3895_v50 }
 0x69d   : > { %7488 = vrcp.f32 %v3904_v58 }
 0x69e   : > { %v1345_v9 = vpop.permute.xlu0 %1344  ;;  %v3901_v0 = vpop.xlane.xlu1 %3900 }
 0x69f   : > { %v1670_v40 = vcombine.low %v9503_v26, %v1345_v9  ;;  %v1671_v36 = vcombine.high %v9503_v26, %v1345_v9  ;;  %7490 = vrcp.f32 %v3901_v0 }
 0x6a1   : > { %v1678_v25 = vrot.slane %v1670_v40, %v8836_v29  ;;  %v1685_v55 = vrot.slane %v1671_v36, %v8836_v29  ;;  %v3021_v40 = vpack.c.bf16 %v9390_v42, %v9390_v42 }
 0x6a2   : > { %7039 = vmatmul.mubr.msk.bf16.vlgmr.msra.gmra.mrb[40].mxu0 %vm3781_vm3, %v3964_v16 }
 0x6a3   : > { %7050 = vmatprep.mubr.msk.bf16.mxu0 %vm8059_vm0, %v8057_v6  ;;  %v1718_v26 = vcombine.low %v1662_v31, %v1678_v25  ;;  %v1719_v28 = vcombine.high %v1662_v31, %v1678_v25  ;;  %v1734_v34 = vcombine.low %v1669_v45, %v1685_v55  ;;  %v1735_v48 = vcombine.high %v1669_v45, %v1685_v55 }
 0x6a4   : > { %v2070_v31 = vrot.slane %v2062_v43, %v8836_v29 }
 0x6a5   : > { %v1726_v18 = vrot.slane %v1718_v26, %v8839_v33  ;;  %v1733_v1 = vrot.slane %v1719_v28, %v8839_v33  ;;  %v1742_v59 = vrot.slane %v1734_v34, %v8839_v33  ;;  %v1749_v19 = vrot.slane %v1735_v48, %v8839_v33  ;;  %v7485_v30 = vpop.eup %7484 }
 0x6a6   : > { %v3945_v2 = vmul.f32 %v7485_v30, %v9547_v54  ;;  %v7487_v3 = vpop.eup %7486  ;;  %v4209_v54 = vsel %vm3977_vm2, %v3019_v17, 0  ;;  %v2077_v28 = vrot.slane %v2063_v10, %v8836_v29 }
 0x6a7   : > { %v6608_v51 = vcombine.low %v1726_v18, %v1733_v1  ;;  %v6610_v52 = vcombine.high %v1726_v18, %v1733_v1  ;;  %v6612_v62 = vcombine.low %v1742_v59, %v1749_v19  ;;  %v6614_v46 = vcombine.high %v1742_v59, %v1749_v19  ;;  %v7489_v20 = vpop.eup %7488 }
 0x6a8   : > { %v3961_v49 = vpack.c.bf16 %v3945_v2, %v3945_v2  ;;  %v3947_v12 = vmul.f32 %v7487_v3, %v9545_v63  ;;  %v3950_v0 = vmul.f32 %v7489_v20, %v9541_v8  ;;  %v4301_v18 = vsel %vm3977_vm2, %v3021_v40, 0 }
 0x6a9   : > { %v2725_v53 = vrot.slane %v6608_v51, %v8836_v29  ;;  %v2741_v13 = vrot.slane %v6610_v52, %v8836_v29  ;;  %v2757_v15 = vrot.slane %v6612_v62, %v8836_v29  ;;  %v2773_v4 = vrot.slane %v6614_v46, %v8836_v29  ;;  %v7491_v39 = vpop.eup %7490 }
 0x6aa   : > { %7021 = vmatmul.mubr.msk.bf16.vlgmr.msra.gmra.mrb[48].mxu1 %vm3781_vm3, %v3961_v49  ;;  %v3963_v48 = vpack.c.bf16 %v3947_v12, %v3947_v12  ;;  %v3949_v17 = vmul.f32 %v7491_v39, %v9554_v27 }
 0x6ab   : > { %v3907_v21 = vpop.xlane.xlu1 %3906  ;;  %v2790_v24 = vcombine.low %v2725_v53, %v2741_v13  ;;  %v2791_v41 = vcombine.high %v2725_v53, %v2741_v13  ;;  %7031 = vmatpush3.bf16.msra.mxu1 %v4209_v54  ;;  %7032 = vmatprep.mubr.msk.bf16.mxu1 %vm8059_vm0, %v8057_v6  ;;  %v2822_v58 = vcombine.low %v2757_v15, %v2773_v4 }
 0x6ac   : > { %v2823_v38 = vcombine.high %v2757_v15, %v2773_v4  ;;  %7042 = vmatprep.subr.bf16.mxu1 %v8057_v6  ;;  %7492 = vrcp.f32 %v3907_v21  ;;  %v3966_v53 = vpack.c.bf16 %v3950_v0, %v3950_v0  ;;  %v3965_v4 = vpack.c.bf16 %v3949_v17, %v3949_v17 }
 0x6ad   : > { %v2798_v50 = vrot.slane %v2790_v24, %v8839_v33  ;;  %v2805_v61 = vrot.slane %v2791_v41, %v8839_v33  ;;  %v2830_v36 = vrot.slane %v2822_v58, %v8839_v33 }
 0x6ae   : > { %v2837_v16 = vrot.slane %v2823_v38, %v8839_v33 }
 0x6af   : > { %v1347_v9 = vpop.permute.xlu1 %1346  ;;  %v2842_v45 = vcombine.low %v2798_v50, %v2830_v36  ;;  %v2843_v25 = vcombine.high %v2798_v50, %v2830_v36 }
 0x6b0   : > { %v2078_v5 = vcombine.low %v9506_v47, %v1347_v9  ;;  %v2079_v63 = vcombine.high %v9506_v47, %v1347_v9  ;;  %v9676_v55 = vcombine.low %v2805_v61, %v2837_v16  ;;  %v9678_v26 = vcombine.high %v2805_v61, %v2837_v16 }
 0x6b1   : > { %v3022_v1 = vpack.c.bf16 %v2842_v45, %v2842_v45  ;;  %v3024_v51 = vpack.c.bf16 %v2843_v25, %v2843_v25 }
 0x6b2   : > { %v2086_v42 = vrot.slane %v2078_v5, %v8836_v29  ;;  %v2093_v34 = vrot.slane %v2079_v63, %v8836_v29  ;;  %7033 = vmatmul.mubr.msk.bf16.vlgmr.msra.gmra.mrb[52].mxu1 %vm3781_vm3, %v3963_v48 }
 0x6b3   : > { %7043 = vmatpush3.bf16.msra.mxu1 %v4301_v18  ;;  %v4347_v2 = vsel %vm3977_vm2, %v3022_v1, 0  ;;  %7044 = vmatprep.mubr.msk.bf16.mxu1 %vm8059_vm0, %v8057_v6  ;;  %v4439_v3 = vsel %vm3977_vm2, %v3024_v51, 0 }
 0x6b4   : > { %v2126_v47 = vcombine.low %v2070_v31, %v2086_v42  ;;  %v2127_v59 = vcombine.high %v2070_v31, %v2086_v42  ;;  %v2142_v19 = vcombine.low %v2077_v28, %v2093_v34  ;;  %v2143_v30 = vcombine.high %v2077_v28, %v2093_v34  ;;  %7049 = vmatpush3.bf16.msra.mxu0 %v4347_v2 }
 0x6b5   : > { %7060 = vmatprep.subr.bf16.mxu0 %v8057_v6  ;;  %7054 = vmatprep.subr.bf16.mxu1 %v8057_v6  ;;  %v3026_v28 = vpack.c.bf16 %v9676_v55, %v9676_v55  ;;  %v3028_v55 = vpack.c.bf16 %v9678_v26, %v9678_v26 }
 0x6b6   : > { %v2134_v8 = vrot.slane %v2126_v47, %v8839_v33  ;;  %v2141_v52 = vrot.slane %v2127_v59, %v8839_v33  ;;  %v2150_v62 = vrot.slane %v2142_v19, %v8839_v33  ;;  %v2157_v46 = vrot.slane %v2143_v30, %v8839_v33  ;;  %v7493_v12 = vpop.eup %7492 }
 0x6b7   : > { %7051 = vmatmul.mubr.msk.bf16.vlgmr.msra.gmra.mrb[44].mxu0 %vm3781_vm3, %v3966_v53  ;;  %v3951_v20 = vmul.f32 %v7493_v12, %v9558_v22  ;;  %v4531_v0 = vsel %vm3977_vm2, %v3026_v28, 0  ;;  %v4623_v17 = vsel %vm3977_vm2, %v3028_v55, 0 }
 0x6b8   : > { %v6616_v27 = vcombine.low %v2134_v8, %v2141_v52  ;;  %v6618_v13 = vcombine.high %v2134_v8, %v2141_v52  ;;  %v6620_v15 = vcombine.low %v2150_v62, %v2157_v46  ;;  %v6622_v49 = vcombine.high %v2150_v62, %v2157_v46  ;;  %7061 = vmatpush3.bf16.msra.mxu0 %v4439_v3 }
 0x6b9   : > { %7062 = vmatprep.mubr.msk.bf16.mxu0 %vm8059_vm0, %v8057_v6  ;;  %7072 = vmatprep.subr.bf16.mxu0 %v8057_v6  ;;  %v3967_v16 = vpack.c.bf16 %v3951_v20, %v3951_v20 }
 0x6ba   : > { %v2861_v21 = vrot.slane %v6616_v27, %v8836_v29  ;;  %v2877_v43 = vrot.slane %v6618_v13, %v8836_v29  ;;  %v2893_v54 = vrot.slane %v6620_v15, %v8836_v29  ;;  %v2909_v24 = vrot.slane %v6622_v49, %v8836_v29  ;;  %7045 = vmatmul.mubr.msk.bf16.vlgmr.msra.gmra.mrb[56].mxu1 %vm3781_vm3, %v3965_v4 }
 0x6bb   : > { %7056 = vmatprep.mubr.msk.bf16.mxu1 %vm8059_vm0, %v8057_v6 }
 0x6bc   : > { %v2926_v41 = vcombine.low %v2861_v21, %v2877_v43  ;;  %v2958_v58 = vcombine.low %v2893_v54, %v2909_v24  ;;  %v2927_v18 = vcombine.high %v2861_v21, %v2877_v43  ;;  %v2959_v1 = vcombine.high %v2893_v54, %v2909_v24 }
 0x6be   : > { %v2934_v38 = vrot.slane %v2926_v41, %v8839_v33  ;;  %v2966_v10 = vrot.slane %v2958_v58, %v8839_v33  ;;  %v2941_v47 = vrot.slane %v2927_v18, %v8839_v33  ;;  %v2973_v59 = vrot.slane %v2959_v1, %v8839_v33 }
 0x6c0   : > { %v2978_v50 = vcombine.low %v2934_v38, %v2966_v10  ;;  %v2979_v61 = vcombine.high %v2934_v38, %v2966_v10  ;;  %v2980_v2 = vcombine.low %v2941_v47, %v2973_v59  ;;  %v2981_v13 = vcombine.high %v2941_v47, %v2973_v59 }
 0x6c2   : > { %v3023_v9 = vpack.c.bf16 %v2978_v50, %v2978_v50  ;;  %v3025_v36 = vpack.c.bf16 %v2979_v61, %v2979_v61  ;;  %v3027_v52 = vpack.c.bf16 %v2980_v2, %v2980_v2 }
 0x6c4   : > { %v4393_v40 = vsel %vm3977_vm2, %v3023_v9, 0  ;;  %v4485_v31 = vsel %vm3977_vm2, %v3025_v36, 0  ;;  %v4577_v27 = vsel %vm3977_vm2, %v3027_v52, 0 }
 0x6c5   : > { %7055 = vmatpush3.bf16.msra.mxu1 %v4393_v40 }
 0x6c6   : > { %7066 = vmatprep.subr.bf16.mxu1 %v8057_v6 }
 0x6c8   : > { %7057 = vmatmul.mubr.msk.bf16.vlgmr.msra.gmra.mrb[60].mxu1 %vm3781_vm3, %v3967_v16 }
 0x6c9   : > { %7067 = vmatpush3.bf16.msra.mxu1 %v4485_v31  ;;  %7068 = vmatprep.mubr.msk.bf16.mxu1 %vm8059_vm0, %v8057_v6 }
 0x6ca   : > { %7078 = vmatprep.subr.bf16.mxu1 %v8057_v6 }
 0x6cf   : > { %v3910_v5 = vpop.xlane.xlu0 %3909 }
 0x6d0   : > { %7494 = vrcp.f32 %v3910_v5 }
 0x6d3   : > { %v3916_v22 = vpop.xlane.xlu0 %3915 }
 0x6d4   : > { %7496 = vrcp.f32 %v3916_v22 }
 0x6d7   : > { %v3919_v63 = vpop.xlane.xlu0 %3918 }
 0x6da   : > { %v7495_v39 = vpop.eup %7494 }
 0x6db   : > { %v3952_v45 = vmul.f32 %v7495_v39, %v9571_v14  ;;  %v3922_v25 = vpop.xlane.xlu0 %3921 }
 0x6dc   : > { %7498 = vrcp.f32 %v3922_v25 }
 0x6dd   : > { %v3968_v42 = vpack.c.bf16 %v3952_v45, %v3952_v45 }
 0x6de   : > { %v7497_v34 = vpop.eup %7496 }
 0x6df   : > { %7063 = vmatmul.mubr.msk.bf16.vlgmr.msra.gmra.mrb[48].mxu0 %vm3781_vm3, %v3968_v42  ;;  %v3954_v14 = vmul.f32 %v7497_v34, %v9576_v7 }
 0x6e0   : > { %v3913_v48 = vpop.xlane.xlu1 %3912  ;;  %7073 = vmatpush3.bf16.msra.mxu0 %v4531_v0  ;;  %7074 = vmatprep.mubr.msk.bf16.mxu0 %vm8059_vm0, %v8057_v6 }
 0x6e1   : > { %7500 = vrcp.f32 %v3913_v48  ;;  %7084 = vmatprep.subr.bf16.mxu0 %v8057_v6  ;;  %v3970_v19 = vpack.c.bf16 %v3954_v14, %v3954_v14 }
 0x6e2   : > { %7502 = vrcp.f32 %v3919_v63 }
 0x6e4   : > { %v3925_v51 = vpop.xlane.xlu1 %3924 }
 0x6e5   : > { %7504 = vrcp.f32 %v3925_v51 }
 0x6e6   : > { %v7499_v30 = vpop.eup %7498 }
 0x6e7   : > { %7075 = vmatmul.mubr.msk.bf16.vlgmr.msra.gmra.mrb[52].mxu0 %vm3781_vm3, %v3970_v19  ;;  %v3956_v7 = vmul.f32 %v7499_v30, %v9584_v35 }
 0x6e8   : > { %7085 = vmatpush3.bf16.msra.mxu0 %v4623_v17  ;;  %7086 = vmatprep.mubr.msk.bf16.mxu0 %vm8059_vm0, %v8057_v6 }
 0x6e9   : > { %7096 = vmatprep.subr.bf16.mxu0 %v8057_v6  ;;  %v3972_v46 = vpack.c.bf16 %v3956_v7, %v3956_v7 }
 0x6eb   : > { %v7501_v26 = vpop.eup %7500 }
 0x6ec   : > { %v3953_v8 = vmul.f32 %v7501_v26, %v9588_v23  ;;  %v7503_v53 = vpop.eup %7502  ;;  %v3029_v23 = vpack.c.bf16 %v2981_v13, %v2981_v13 }
 0x6ed   : > { %v3955_v35 = vmul.f32 %v7503_v53, %v9580_v44 }
 0x6ee   : > { %v3969_v62 = vpack.c.bf16 %v3953_v8, %v3953_v8  ;;  %v4669_v3 = vsel %vm3977_vm2, %v3029_v23, 0 }
 0x6ef   : > { %7087 = vmatmul.mubr.msk.bf16.vlgmr.msra.gmra.mrb[56].mxu0 %vm3781_vm3, %v3972_v46  ;;  %v3971_v15 = vpack.c.bf16 %v3955_v35, %v3955_v35  ;;  %v7505_v49 = vpop.eup %7504 }
 0x6f0   : > { %7069 = vmatmul.mubr.msk.bf16.vlgmr.msra.gmra.mrb[64].mxu1 %vm3781_vm3, %v3969_v62  ;;  %7112 = vmatprep.mubr.msk.bf16.mxu0 %vm8059_vm0, %v8057_v6  ;;  %v3957_v4 = vmul.f32 %v7505_v49, %v9592_v37 }
 0x6f1   : > { %7079 = vmatpush3.bf16.msra.mxu1 %v4577_v27  ;;  %7080 = vmatprep.mubr.msk.bf16.mxu1 %vm8059_vm0, %v8057_v6 }
 0x6f2   : > { %7090 = vmatprep.subr.bf16.mxu1 %v8057_v6  ;;  %v3973_v21 = vpack.c.bf16 %v3957_v4, %v3957_v4 }
 0x6f8   : > { %7081 = vmatmul.mubr.msk.bf16.vlgmr.msra.gmra.mrb[68].mxu1 %vm3781_vm3, %v3971_v15 }
 0x6f9   : > { %7091 = vmatpush3.bf16.msra.mxu1 %v4669_v3  ;;  %7092 = vmatprep.mubr.msk.bf16.mxu1 %vm8059_vm0, %v8057_v6 }
 0x700   : > { %7093 = vmatmul.mubr.msk.bf16.vlgmr.msra.gmra.mrb[72].mxu1 %vm3781_vm3, %v3973_v21 }
 0x701   : > { %5733 = vmatprep.mubr.bf16.mxu1 %v8058_v32 }
 0x751   : > { %v4015_v44 = vpop.f32.mrb[28].mxu0 }
 0x752   : > { %v7004_v43 = vpop.f32.mrb[29].mxu0 }
 0x753   : > { %v4018_v54 = vpop.f32.mrb[30].mxu0 }
 0x754   : > { %v7005_v24 = vpop.f32.mrb[31].mxu0 }
 0x75d   : > { %v9754_v41 = vpop.f32.mrb[44].mxu1 }
 0x75e   : > { %v7010_v58 = vpop.f32.mrb[45].mxu1 }
 0x75f   : > { %v4064_v38 = vpop.f32.mrb[46].mxu1 }
 0x760   : > { %v7011_v10 = vpop.f32.mrb[47].mxu1 }
 0x765   : > { %v4107_v12 = vpop.f32.mrb[32].mxu0 }
 0x766   : > { %v7016_v50 = vpop.f32.mrb[33].mxu0 }
 0x767   : > { %v4110_v61 = vpop.f32.mrb[34].mxu0 }
 0x768   : > { %v7017_v20 = vpop.f32.mrb[35].mxu0 }
 0x76d   : > { %v4199_v9 = vpop.f32.mrb[36].mxu0 }
 0x76e   : > { %v4711_v37 = vcombine.low %v4015_v44, %v4199_v9  ;;  %v4712_v40 = vcombine.high %v4015_v44, %v4199_v9  ;;  %v7028_v36 = vpop.f32.mrb[37].mxu0 }
 0x76f   : > { %v4202_v16 = vpop.f32.mrb[38].mxu0 }
 0x770   : > { %v7029_v31 = vpop.f32.mrb[39].mxu0  ;;  %v4719_v25 = vrot.slane %v4711_v37, %v8836_v29  ;;  %v4726_v28 = vrot.slane %v4712_v40, %v8836_v29 }
 0x775   : > { %v4291_v5 = vpop.f32.mrb[40].mxu0 }
 0x776   : > { %v4727_v22 = vcombine.low %v4107_v12, %v4291_v5  ;;  %v4728_v63 = vcombine.high %v4107_v12, %v4291_v5  ;;  %v7040_v39 = vpop.f32.mrb[41].mxu0 }
 0x777   : > { %v4294_v45 = vpop.f32.mrb[42].mxu0 }
 0x778   : > { %v4735_v42 = vrot.slane %v4727_v22, %v8836_v29  ;;  %v4742_v34 = vrot.slane %v4728_v63, %v8836_v29  ;;  %v7041_v48 = vpop.f32.mrb[43].mxu0 }
 0x77a   : > { %v4775_v0 = vcombine.low %v4719_v25, %v4735_v42  ;;  %v4776_v18 = vcombine.high %v4719_v25, %v4735_v42  ;;  %v4791_v1 = vcombine.low %v4726_v28, %v4742_v34  ;;  %v4792_v14 = vcombine.high %v4726_v28, %v4742_v34 }
 0x77c   : > { %v4783_v55 = vrot.slane %v4775_v0, %v8839_v33  ;;  %v4790_v47 = vrot.slane %v4776_v18, %v8839_v33  ;;  %v4799_v59 = vrot.slane %v4791_v1, %v8839_v33  ;;  %v4806_v19 = vrot.slane %v4792_v14, %v8839_v33 }
 0x77d   : > { %v4153_v51 = vpop.f32.mrb[48].mxu1 }
 0x77e   : > { %v6657_v30 = vcombine.low %v4783_v55, %v4790_v47  ;;  %v6659_v17 = vcombine.high %v4783_v55, %v4790_v47  ;;  %v6661_v2 = vcombine.low %v4799_v59, %v4806_v19  ;;  %v6663_v7 = vcombine.high %v4799_v59, %v4806_v19  ;;  %v7022_v46 = vpop.f32.mrb[49].mxu1 }
 0x77f   : > { %v4156_v53 = vpop.f32.mrb[50].mxu1 }
 0x780   : > { %v4991_v26 = vrot.slane %v6657_v30, %v8836_v29  ;;  %v5007_v8 = vrot.slane %v6659_v17, %v8836_v29  ;;  %v5023_v52 = vrot.slane %v6661_v2, %v8836_v29  ;;  %v5039_v62 = vrot.slane %v6663_v7, %v8836_v29  ;;  %v7023_v27 = vpop.f32.mrb[51].mxu1 }
 0x781   : > { %v7350_v27 = vld [vmem:[%s8665_s25] sm:$0xff]  }
 0x782   : > { %v5048_v13 = vcombine.high %v4991_v26, %v5007_v8  ;;  %v5080_v35 = vcombine.high %v5023_v52, %v5039_v62  ;;  %v5047_v23 = vcombine.low %v4991_v26, %v5007_v8  ;;  %v5079_v15 = vcombine.low %v5023_v52, %v5039_v62  ;;  %7097 = vmatpush3.bf16.msra.mxu0 %v7350_v27 }
 0x783   : > { %7098 = vmatprep.subr.bf16.mxu0 %v8057_v6 }
 0x784   : > { %v9769_v49 = vrot.slane %v5048_v13, %v8839_v33  ;;  %v9772_v3 = vrot.slane %v5080_v35, %v8839_v33  ;;  %v9775_v4 = vrot.slane %v5047_v23, %v8839_v33  ;;  %v9778_v21 = vrot.slane %v5079_v15, %v8839_v33 }
 0x785   : > { %v4245_v58 = vpop.f32.mrb[52].mxu1 }
 0x786   : > { %v5113_v44 = vcombine.low %v9769_v49, %v9772_v3  ;;  %v5111_v43 = vcombine.low %v9775_v4, %v9778_v21  ;;  %v5112_v54 = vcombine.high %v9775_v4, %v9778_v21  ;;  %v5114_v24 = vcombine.high %v9769_v49, %v9772_v3  ;;  %v7034_v12 = vpop.f32.mrb[53].mxu1  ;;  %v7351_v3 = vld [vmem:[%s8665_s25 + $0x8] sm:$0xff]  }
 0x787   : > { %v4847_v38 = vcombine.low %v9754_v41, %v4245_v58  ;;  %v4848_v10 = vcombine.high %v9754_v41, %v4245_v58  ;;  %v4248_v50 = vpop.f32.mrb[54].mxu1  ;;  %7099 = vmatpush3.bf16.msra.mxu0 %v7351_v3 }
 0x788   : > { %v7035_v61 = vpop.f32.mrb[55].mxu1  ;;  %7100 = vmatprep.subr.bf16.mxu0 %v8057_v6 }
 0x789   : > { %v4855_v63 = vrot.slane %v4847_v38, %v8836_v29  ;;  %v4862_v39 = vrot.slane %v4848_v10, %v8836_v29 }
 0x78a   : > { %v9790_v20 = vpop.f32.mrb[44].mxu0 }
 0x78b   : > { %v7052_v9 = vpop.f32.mrb[45].mxu0 }
 0x78c   : > { %v4386_v37 = vpop.f32.mrb[46].mxu0 }
 0x78d   : > { %v4337_v40 = vpop.f32.mrb[56].mxu1  ;;  %v7053_v36 = vpop.f32.mrb[47].mxu0  ;;  %v7352_v37 = vld [vmem:[%s8665_s25 + $0x10] sm:$0xff]  }
 0x78e   : > { %v4863_v16 = vcombine.low %v4153_v51, %v4337_v40  ;;  %v4864_v31 = vcombine.high %v4153_v51, %v4337_v40  ;;  %v7046_v5 = vpop.f32.mrb[57].mxu1  ;;  %7101 = vmatpush3.bf16.msra.mxu0 %v7352_v37  ;;  %v7353_v40 = vld [vmem:[%s8665_s25 + $0x18] sm:$0xff]   ;;  %v7354_v36 = vld [vmem:[%s8665_s25 + $0x20] sm:$0xff]  }
 0x78f   : > { %v4340_v22 = vpop.f32.mrb[58].mxu1  ;;  %7102 = vmatprep.subr.bf16.mxu0 %v8057_v6 }
 0x790   : > { %v4871_v45 = vrot.slane %v4863_v16, %v8836_v29  ;;  %v4878_v41 = vrot.slane %v4864_v31, %v8836_v29  ;;  %v7047_v25 = vpop.f32.mrb[59].mxu1 }
 0x792   : > { %v4911_v28 = vcombine.low %v4855_v63, %v4871_v45  ;;  %v4912_v42 = vcombine.high %v4855_v63, %v4871_v45  ;;  %v4927_v34 = vcombine.low %v4862_v39, %v4878_v41  ;;  %v4928_v48 = vcombine.high %v4862_v39, %v4878_v41  ;;  %7103 = vmatpush3.bf16.msra.mxu0 %v7353_v40 }
 0x793   : > { %7104 = vmatprep.subr.bf16.mxu0 %v8057_v6 }
 0x794   : > { %v4919_v0 = vrot.slane %v4911_v28, %v8839_v33  ;;  %v4926_v18 = vrot.slane %v4912_v42, %v8839_v33  ;;  %v4935_v1 = vrot.slane %v4927_v34, %v8839_v33  ;;  %v4942_v14 = vrot.slane %v4928_v48, %v8839_v33 }
 0x796   : > { %v6665_v55 = vcombine.low %v4919_v0, %v4926_v18  ;;  %v6667_v47 = vcombine.high %v4919_v0, %v4926_v18  ;;  %v6669_v59 = vcombine.low %v4935_v1, %v4942_v14  ;;  %v6671_v19 = vcombine.high %v4935_v1, %v4942_v14  ;;  %7105 = vmatpush3.bf16.msra.mxu0 %v7354_v36 }
 0x797   : > { %7106 = vmatprep.subr.bf16.mxu0 %v8057_v6 }
 0x798   : > { %v5127_v30 = vrot.slane %v6665_v55, %v8836_v29  ;;  %v5143_v17 = vrot.slane %v6667_v47, %v8836_v29  ;;  %v5159_v2 = vrot.slane %v6669_v59, %v8836_v29  ;;  %v5175_v7 = vrot.slane %v6671_v19, %v8836_v29 }
 0x79a   : > { %v5184_v8 = vcombine.high %v5127_v30, %v5143_v17  ;;  %v5216_v52 = vcombine.high %v5159_v2, %v5175_v7  ;;  %v5183_v62 = vcombine.low %v5127_v30, %v5143_v17  ;;  %v5215_v46 = vcombine.low %v5159_v2, %v5175_v7 }
 0x79b   : > { %v9804_v51 = vpop.f32.mrb[60].mxu1 }
 0x79c   : > { %v7058_v26 = vpop.f32.mrb[61].mxu1  ;;  %v5198_v35 = vrot.slane %v5184_v8, %v8839_v33  ;;  %v5230_v23 = vrot.slane %v5216_v52, %v8839_v33  ;;  %v9810_v15 = vrot.slane %v5183_v62, %v8839_v33  ;;  %v9813_v49 = vrot.slane %v5215_v46, %v8839_v33 }
 0x79d   : > { %v4432_v53 = vpop.f32.mrb[62].mxu1 }
 0x79e   : > { %v7059_v13 = vpop.f32.mrb[63].mxu1  ;;  %v5249_v58 = vcombine.low %v5198_v35, %v5230_v23  ;;  %v5248_v38 = vcombine.high %v9810_v15, %v9813_v49  ;;  %v5247_v10 = vcombine.low %v9810_v15, %v9813_v49  ;;  %v5250_v12 = vcombine.high %v5198_v35, %v5230_v23 }
 0x7a0   : > { %v7288_v50 = vpack.i.bf16 %v5249_v58, %v5113_v44  ;;  %v7283_v61 = vpack.i.bf16 %v5248_v38, %v5112_v54  ;;  %v7293_v9 = vpack.i.bf16 %v5250_v12, %v5114_v24  ;;  %v7355_v44 = vld [vmem:[%s8665_s25 + $0x28] sm:$0xff]  }
 0x7a1   : > { %7107 = vmatpush3.bf16.msra.mxu0 %v7355_v44 }
 0x7a2   : > { %7289 = vrot.lane.b32.xlu1 %v7288_v50, %s8065_s15  ;;  %7284 = vrot.lane.b32.xlu0 %v7283_v61, %s8066_s26 }
 0x7a3   : > { %7108 = vmatprep.subr.bf16.mxu0 %v8057_v6 }
 0x7a6   : > { %7294 = vrot.lane.b32.xlu1 %v7293_v9, %s8064_s13 }
 0x7b2   : > { %v4475_v54 = vpop.f32.mrb[48].mxu0 }
 0x7b3   : > { %v7064_v24 = vpop.f32.mrb[49].mxu0 }
 0x7b4   : > { %v4478_v16 = vpop.f32.mrb[50].mxu0 }
 0x7b5   : > { %v7065_v31 = vpop.f32.mrb[51].mxu0 }
 0x7ba   : > { %v4567_v5 = vpop.f32.mrb[52].mxu0 }
 0x7bb   : > { %v4743_v22 = vcombine.low %v9790_v20, %v4567_v5  ;;  %v4744_v63 = vcombine.high %v9790_v20, %v4567_v5  ;;  %v7076_v39 = vpop.f32.mrb[53].mxu0 }
 0x7bc   : > { %v4570_v45 = vpop.f32.mrb[54].mxu0 }
 0x7bd   : > { %v7077_v41 = vpop.f32.mrb[55].mxu0  ;;  %v4751_v14 = vrot.slane %v4743_v22, %v8836_v29  ;;  %v4758_v55 = vrot.slane %v4744_v63, %v8836_v29 }
 0x7c2   : > { %v4659_v28 = vpop.f32.mrb[56].mxu0 }
 0x7c3   : > { %v4521_v25 = vpop.f32.mrb[64].mxu1  ;;  %v4759_v34 = vcombine.low %v4475_v54, %v4659_v28  ;;  %v4760_v48 = vcombine.high %v4475_v54, %v4659_v28  ;;  %v7088_v0 = vpop.f32.mrb[57].mxu0 }
 0x7c4   : > { %v7070_v42 = vpop.f32.mrb[65].mxu1  ;;  %v4662_v1 = vpop.f32.mrb[58].mxu0 }
 0x7c5   : > { %v4524_v18 = vpop.f32.mrb[66].mxu1  ;;  %v4767_v59 = vrot.slane %v4759_v34, %v8836_v29  ;;  %v4774_v20 = vrot.slane %v4760_v48, %v8836_v29  ;;  %v7089_v19 = vpop.f32.mrb[59].mxu0 }
 0x7c6   : > { %v7071_v47 = vpop.f32.mrb[67].mxu1 }
 0x7c7   : > { %v4807_v30 = vcombine.low %v4751_v14, %v4767_v59  ;;  %v4808_v17 = vcombine.high %v4751_v14, %v4767_v59  ;;  %v4823_v2 = vcombine.low %v4758_v55, %v4774_v20  ;;  %v4824_v7 = vcombine.high %v4758_v55, %v4774_v20 }
 0x7c9   : > { %v4815_v26 = vrot.slane %v4807_v30, %v8839_v33  ;;  %v4822_v8 = vrot.slane %v4808_v17, %v8839_v33  ;;  %v4831_v52 = vrot.slane %v4823_v2, %v8839_v33  ;;  %v4838_v62 = vrot.slane %v4824_v7, %v8839_v33 }
 0x7cb   : > { %v4613_v46 = vpop.f32.mrb[68].mxu1  ;;  %v6658_v53 = vcombine.low %v4815_v26, %v4822_v8  ;;  %v6660_v27 = vcombine.high %v4815_v26, %v4822_v8  ;;  %v6662_v13 = vcombine.low %v4831_v52, %v4838_v62  ;;  %v6664_v35 = vcombine.high %v4831_v52, %v4838_v62  ;;  %v7356_v52 = vld [vmem:[%s8665_s25 + $0x30] sm:$0xff]  }
 0x7cc   : > { %v7082_v23 = vpop.f32.mrb[69].mxu1  ;;  %v4879_v3 = vcombine.low %v9804_v51, %v4613_v46  ;;  %v4880_v58 = vcombine.high %v9804_v51, %v4613_v46  ;;  %7109 = vmatpush3.bf16.msra.mxu0 %v7356_v52 }
 0x7cd   : > { %v4616_v38 = vpop.f32.mrb[70].mxu1  ;;  %v4998_v12 = vrot.slane %v6658_v53, %v8836_v29  ;;  %v5014_v50 = vrot.slane %v6660_v27, %v8836_v29  ;;  %v5030_v61 = vrot.slane %v6662_v13, %v8836_v29  ;;  %v5046_v9 = vrot.slane %v6664_v35, %v8836_v29  ;;  %7110 = vmatprep.subr.bf16.mxu0 %v8057_v6 }
 0x7ce   : > { %v7083_v37 = vpop.f32.mrb[71].mxu1  ;;  %v4887_v48 = vrot.slane %v4879_v3, %v8836_v29  ;;  %v4894_v0 = vrot.slane %v4880_v58, %v8836_v29  ;;  %v7357_v58 = vld [vmem:[%s8665_s25 + $0x38] sm:$0xff]  }
 0x7cf   : > { %v5063_v40 = vcombine.low %v4998_v12, %v5014_v50  ;;  %v5095_v36 = vcombine.low %v5030_v61, %v5046_v9  ;;  %v5064_v44 = vcombine.high %v4998_v12, %v5014_v50  ;;  %v5096_v54 = vcombine.high %v5030_v61, %v5046_v9 }
 0x7d0   : > { %7111 = vmatpush3.bf16.msra.mxu0 %v7357_v58 }
 0x7d1   : > { %v5071_v24 = vrot.slane %v5063_v40, %v8839_v33  ;;  %v5103_v16 = vrot.slane %v5095_v36, %v8839_v33  ;;  %v5078_v51 = vrot.slane %v5064_v44, %v8839_v33  ;;  %v5110_v31 = vrot.slane %v5096_v54, %v8839_v33 }
 0x7d3   : > { %v4705_v5 = vpop.f32.mrb[72].mxu1  ;;  %v5116_v45 = vcombine.high %v5071_v24, %v5103_v16  ;;  %v5115_v41 = vcombine.low %v5071_v24, %v5103_v16  ;;  %v5118_v42 = vcombine.high %v5078_v51, %v5110_v31  ;;  %v5117_v34 = vcombine.low %v5078_v51, %v5110_v31 }
 0x7d4   : > { %v4895_v22 = vcombine.low %v4521_v25, %v4705_v5  ;;  %v4896_v63 = vcombine.high %v4521_v25, %v4705_v5  ;;  %v7094_v39 = vpop.f32.mrb[73].mxu1 }
 0x7d5   : > { %v4708_v28 = vpop.f32.mrb[74].mxu1 }
 0x7d6   : > { %v4903_v18 = vrot.slane %v4895_v22, %v8836_v29  ;;  %v4910_v1 = vrot.slane %v4896_v63, %v8836_v29  ;;  %v7095_v14 = vpop.f32.mrb[75].mxu1 }
 0x7d8   : > { %v4943_v55 = vcombine.low %v4887_v48, %v4903_v18  ;;  %v4944_v47 = vcombine.high %v4887_v48, %v4903_v18  ;;  %v4959_v59 = vcombine.low %v4894_v0, %v4910_v1  ;;  %v4960_v25 = vcombine.high %v4894_v0, %v4910_v1 }
 0x7da   : > { %v4951_v20 = vrot.slane %v4943_v55, %v8839_v33  ;;  %v4958_v19 = vrot.slane %v4944_v47, %v8839_v33  ;;  %v4967_v30 = vrot.slane %v4959_v59, %v8839_v33  ;;  %v4974_v17 = vrot.slane %v4960_v25, %v8839_v33 }
 0x7dc   : > { %v6666_v2 = vcombine.low %v4951_v20, %v4958_v19  ;;  %v6668_v7 = vcombine.high %v4951_v20, %v4958_v19  ;;  %v6670_v26 = vcombine.low %v4967_v30, %v4974_v17  ;;  %v6672_v8 = vcombine.high %v4967_v30, %v4974_v17 }
 0x7de   : > { %v5134_v62 = vrot.slane %v6666_v2, %v8836_v29  ;;  %v5150_v46 = vrot.slane %v6668_v7, %v8836_v29  ;;  %v5166_v53 = vrot.slane %v6670_v26, %v8836_v29  ;;  %v5182_v27 = vrot.slane %v6672_v8, %v8836_v29  ;;  %v6673_v8 = vld [vmem:[%s761_s23] ss:$0 sm:$0xff] }
 0x7e0   : > { %v5199_v13 = vcombine.low %v5134_v62, %v5150_v46  ;;  %v5231_v35 = vcombine.low %v5166_v53, %v5182_v27  ;;  %v5200_v23 = vcombine.high %v5134_v62, %v5150_v46  ;;  %v5232_v3 = vcombine.high %v5166_v53, %v5182_v27  ;;  %v7526_v27 = vld [vmem:[#allocation2] sm:$0xff] }
 0x7e2   : > { %v5207_v38 = vrot.slane %v5199_v13, %v8839_v33  ;;  %v5239_v12 = vrot.slane %v5231_v35, %v8839_v33  ;;  %v5214_v50 = vrot.slane %v5200_v23, %v8839_v33  ;;  %v5246_v61 = vrot.slane %v5232_v3, %v8839_v33  ;;  %v7527_v3 = vld [vmem:[#allocation2 + $0x8] sm:$0xff] }
 0x7e4   : > { %v5252_v9 = vcombine.high %v5207_v38, %v5239_v12  ;;  %v5251_v37 = vcombine.low %v5207_v38, %v5239_v12  ;;  %v5254_v29 = vcombine.high %v5214_v50, %v5246_v61  ;;  %v5253_v40 = vcombine.low %v5214_v50, %v5246_v61  ;;  %v7360_v38 = vld [vmem:[%s8670_s3 + $0x4] ss:$16 sps:$4 sm:$0xff]   ;;  %v7361_v12 = vld [vmem:[%s8670_s3 + $0x8] ss:$16 sps:$4 sm:$0xff]   ;;  %v7363_v50 = vld [vmem:[%s8670_s3 + $0xc] ss:$16 sps:$4 sm:$0xff]  }
 0x7e5   : > { %v7366_v61 = vld [vmem:[%s8670_s3 + $0x24] ss:$16 sps:$4 sm:$0xff]   ;;  %5701 = vmatprep.subr.bf16.mxu1 %v7360_v38  ;;  %5744 = vmatprep.subr.bf16.mxu0 %v7363_v50  ;;  %v7408_v38 = vld [vmem:[%s8674_s21] sm:$0xff]  }
 0x7e6   : > { %v7303_v36 = vpack.i.bf16 %v5252_v9, %v5116_v45  ;;  %v7298_v44 = vpack.i.bf16 %v5251_v37, %v5115_v41  ;;  %v7313_v54 = vpack.i.bf16 %v5254_v29, %v5118_v42  ;;  %v7308_v24 = vpack.i.bf16 %v5253_v40, %v5117_v34  ;;  %v7369_v9 = vld [vmem:[%s8670_s3 + $0x2c] ss:$16 sps:$4 sm:$0xff]   ;;  %v7364_v37 = vld [vmem:[%s8670_s3 + $0x20] ss:$16 sps:$4 sm:$0xff]   ;;  %v7367_v29 = vld [vmem:[%s8670_s3 + $0x28] ss:$16 sps:$4 sm:$0xff]  }
 0x7e7   : > { %v7410_v50 = vld [vmem:[%s8674_s21 + $0x48] sm:$0xff]  }
 0x7e8   : > { %7304 = vrot.lane.b32.xlu0 %v7303_v36, %s8062_s20  ;;  %7299 = vrot.lane.b32.xlu1 %v7298_v44, %s8063_s29 }
 0x7ec   : > { %7314 = vrot.lane.b32.xlu0 %v7313_v54, %s8061_s24  ;;  %7309 = vrot.lane.b32.xlu1 %v7308_v24, %s8060_s18 }
 0x814   : > { %v7290_v6 = vpop.permute.xlu1 %7289  ;;  %v7285_v16 = vpop.permute.xlu0 %7284 }
 0x815   : > { %v7287_v33 = vunpack.i.h.bf16 %v7285_v16  ;;  %v7286_v51 = vunpack.i.l.bf16 %v7285_v16  ;;  %v7292_v5 = vunpack.i.h.bf16 %v7290_v6  ;;  %v7291_v22 = vunpack.i.l.bf16 %v7290_v6 }
 0x817   : > { %v5311_v63 = vsel %vm3044_vm1, %v5111_v43, %v7286_v51  ;;  %v5312_v39 = vsel %vm3044_vm1, %v5247_v10, %v7287_v33  ;;  %v7370_v51 = vld [vmem:[%s8670_s3 + $0x40] ss:$16 sps:$4 sm:$0xff]  }
 0x818   : > { %v7295_v31 = vpop.permute.xlu1 %7294  ;;  %v5315_v34 = vsel %vm5313_vm4, %v5312_v39, %v7292_v5  ;;  %v5314_v48 = vsel %vm5313_vm4, %v5311_v63, %v7291_v22  ;;  %v7373_v5 = vld [vmem:[%s8670_s3 + $0x48] ss:$16 sps:$4 sm:$0xff]   ;;  %v7375_v22 = vld [vmem:[%s8670_s3 + $0x4c] ss:$16 sps:$4 sm:$0xff]   ;;  %v7376_v63 = vld [vmem:[%s8670_s3 + $0x60] ss:$16 sps:$4 sm:$0xff]  }
 0x819   : > { %v7297_v45 = vunpack.i.h.bf16 %v7295_v31  ;;  %v7296_v41 = vunpack.i.l.bf16 %v7295_v31  ;;  %v7372_v31 = vld [vmem:[%s8670_s3 + $0x44] ss:$16 sps:$4 sm:$0xff]  }
 0x81a   : > { %v7378_v39 = vld [vmem:[%s8670_s3 + $0x64] ss:$16 sps:$4 sm:$0xff]  }
 0x81b   : > { %v5317_v1 = vsel %vm5316_vm5, %v5314_v48, %v7296_v41  ;;  %v5318_v14 = vsel %vm5316_vm5, %v5315_v34, %v7297_v45  ;;  %v7379_v45 = vld [vmem:[%s8670_s3 + $0x68] ss:$16 sps:$4 sm:$0xff]   ;;  %v7381_v41 = vld [vmem:[%s8670_s3 + $0x6c] ss:$16 sps:$4 sm:$0xff]   ;;  %v7382_v34 = vld [vmem:[%s8670_s3 + $0x80] ss:$16 sps:$4 sm:$0xff]  }
 0x81c   : > { %v7385_v48 = vld [vmem:[%s8670_s3 + $0x88] ss:$16 sps:$4 sm:$0xff]  }
 0x85a   : > { %v7305_v28 = vpop.permute.xlu0 %7304  ;;  %v7300_v42 = vpop.permute.xlu1 %7299 }
 0x85b   : > { %v7302_v0 = vunpack.i.h.bf16 %v7300_v42  ;;  %v7301_v18 = vunpack.i.l.bf16 %v7300_v42  ;;  %v7307_v4 = vunpack.i.h.bf16 %v7305_v28  ;;  %v7306_v21 = vunpack.i.l.bf16 %v7305_v28  ;;  %v7384_v28 = vld [vmem:[%s8670_s3 + $0x84] ss:$16 sps:$4 sm:$0xff]   ;;  %v7387_v42 = vld [vmem:[%s8670_s3 + $0x8c] ss:$16 sps:$4 sm:$0xff]  }
 0x85d   : > { %v5320_v43 = vsel %vm5319_vm6, %v5317_v1, %v7301_v18  ;;  %v5321_v55 = vsel %vm5319_vm6, %v5318_v14, %v7302_v0  ;;  %v7390_v0 = vld [vmem:[%s8670_s3 + $0xa4] ss:$16 sps:$4 sm:$0xff]   ;;  %v7393_v18 = vld [vmem:[%s8670_s3 + $0xac] ss:$16 sps:$4 sm:$0xff]   ;;  %v7388_v1 = vld [vmem:[%s8670_s3 + $0xa0] ss:$16 sps:$4 sm:$0xff]  }
 0x85e   : > { %v7315_v15 = vpop.permute.xlu0 %7314  ;;  %v7310_v49 = vpop.permute.xlu1 %7309  ;;  %v5323_v20 = vsel %vm5322_vm7, %v5320_v43, %v7306_v21  ;;  %v5324_v19 = vsel %vm5322_vm7, %v5321_v55, %v7307_v4  ;;  %v7391_v14 = vld [vmem:[%s8670_s3 + $0xa8] ss:$16 sps:$4 sm:$0xff]   ;;  %v7396_v4 = vld [vmem:[%s8670_s3 + $0xc4] ss:$16 sps:$4 sm:$0xff]   ;;  %v7399_v21 = vld [vmem:[%s8670_s3 + $0xcc] ss:$16 sps:$4 sm:$0xff]  }
 0x85f   : > { %v7317_v10 = vunpack.i.h.bf16 %v7315_v15  ;;  %v7316_v47 = vunpack.i.l.bf16 %v7315_v15  ;;  %v7312_v59 = vunpack.i.h.bf16 %v7310_v49  ;;  %v7311_v25 = vunpack.i.l.bf16 %v7310_v49  ;;  %v7394_v43 = vld [vmem:[%s8670_s3 + $0xc0] ss:$16 sps:$4 sm:$0xff]   ;;  %v7397_v55 = vld [vmem:[%s8670_s3 + $0xc8] ss:$16 sps:$4 sm:$0xff]   ;;  %v7402_v15 = vld [vmem:[%s8670_s3 + $0xe4] ss:$16 sps:$4 sm:$0xff]  }
 0x860   : > { %v7405_v49 = vld [vmem:[%s8670_s3 + $0xec] ss:$16 sps:$4 sm:$0xff]  }
 0x861   : > { %v5326_v30 = vsel %vm5325_vm8, %v5323_v20, %v7311_v25  ;;  %v5327_v17 = vsel %vm5325_vm8, %v5324_v19, %v7312_v59 }
 0x862   : > { %v5329_v2 = vsel %vm5328_vm9, %v5326_v30, %v7316_v47  ;;  %v5330_v7 = vsel %vm5328_vm9, %v5327_v17, %v7317_v10  ;;  %v7400_v10 = vld [vmem:[%s8670_s3 + $0xe0] ss:$16 sps:$4 sm:$0xff]   ;;  %v7403_v47 = vld [vmem:[%s8670_s3 + $0xe8] ss:$16 sps:$4 sm:$0xff]  }
 0x863   : > { %v5331_v26 = vpack.c.bf16 %v5330_v7, %v5329_v2 }
 0x865   : > { %7113 = vmatmul.mubr.bf16.vlgmr.msra.gmra.mrb[60].mxu0 %v5331_v26  ;;  %v6682_v26 = vld [vmem:[%s769_s2] ss:$0 sm:$0xff] }
 0x866   : > { %5776 = vmatprep.mubr.bf16.mxu0 %v8058_v32  ;;  %v7358_v32 = vld [vmem:[%s8670_s3] ss:$16 sps:$4 sm:$0xff]   ;;  %5745 = vmatpush1.bf16.msra.mxu0 %v7361_v12  ;;  %v7409_v12 = vld [vmem:[%s8674_s21 + $0x80] sm:$0xff]  }
 0x867   : > { %5702 = vmatpush1.bf16.msra.mxu1 %v7358_v32  ;;  %5746 = vmatprep.subr.bf16.mxu0 %v7369_v9  ;;  %v7407_v32 = vld [vmem:[%s8674_s21 + $0xc0] sm:$0xff]   ;;  %v7412_v9 = vld [vmem:[%s8674_s21 + $0x8] sm:$0xff]  }
 0x868   : > { %5703 = vmatprep.subr.bf16.mxu1 %v7366_v61  ;;  %v7411_v61 = vld [vmem:[%s8674_s21 + $0xc8] sm:$0xff]  }
 0x86a   : > { %5747 = vmatpush1.bf16.msra.mxu0 %v7367_v29  ;;  %v7414_v29 = vld [vmem:[%s8674_s21 + $0x50] sm:$0xff]  }
 0x86b   : > { %5704 = vmatpush1.bf16.msra.mxu1 %v7364_v37  ;;  %5748 = vmatprep.subr.bf16.mxu0 %v7375_v22  ;;  %v7413_v37 = vld [vmem:[%s8674_s21 + $0x88] sm:$0xff]  }
 0x86c   : > { %5705 = vmatprep.subr.bf16.mxu1 %v7372_v31  ;;  %v7424_v31 = vld [vmem:[%s8674_s21 + $0x20] sm:$0xff]   ;;  %v7426_v22 = vld [vmem:[%s8674_s21 + $0x68] sm:$0xff]  }
 0x86e   : > { %5749 = vmatpush1.bf16.msra.mxu0 %v7373_v5  ;;  %v7425_v5 = vld [vmem:[%s8674_s21 + $0xa0] sm:$0xff]  }
 0x86f   : > { %5706 = vmatpush1.bf16.msra.mxu1 %v7370_v51  ;;  %5750 = vmatprep.subr.bf16.mxu0 %v7381_v41  ;;  %v7423_v51 = vld [vmem:[%s8674_s21 + $0xe0] sm:$0xff]   ;;  %v7430_v41 = vld [vmem:[%s8674_s21 + $0x70] sm:$0xff]  }
 0x870   : > { %5707 = vmatprep.subr.bf16.mxu1 %v7378_v39  ;;  %v7428_v39 = vld [vmem:[%s8674_s21 + $0x28] sm:$0xff]  }
 0x872   : > { %5751 = vmatpush1.bf16.msra.mxu0 %v7379_v45  ;;  %v7429_v45 = vld [vmem:[%s8674_s21 + $0xa8] sm:$0xff]  }
 0x873   : > { %5708 = vmatpush1.bf16.msra.mxu1 %v7376_v63  ;;  %5752 = vmatprep.subr.bf16.mxu0 %v7387_v42  ;;  %v7427_v63 = vld [vmem:[%s8674_s21 + $0xe8] sm:$0xff]   ;;  %v7432_v42 = vld [vmem:[%s8674_s21 + $0x30] sm:$0xff]  }
 0x874   : > { %5709 = vmatprep.subr.bf16.mxu1 %v7384_v28  ;;  %v7431_v28 = vld [vmem:[%s8674_s21 + $0xf0] sm:$0xff]  }
 0x876   : > { %5753 = vmatpush1.bf16.msra.mxu0 %v7385_v48  ;;  %v7434_v48 = vld [vmem:[%s8674_s21 + $0x78] sm:$0xff]  }
 0x877   : > { %5710 = vmatpush1.bf16.msra.mxu1 %v7382_v34  ;;  %5754 = vmatprep.subr.bf16.mxu0 %v7393_v18  ;;  %v7433_v34 = vld [vmem:[%s8674_s21 + $0xb0] sm:$0xff]   ;;  %v7436_v18 = vld [vmem:[%s8674_s21 + $0x38] sm:$0xff]  }
 0x878   : > { %5711 = vmatprep.subr.bf16.mxu1 %v7390_v0  ;;  %v7435_v0 = vld [vmem:[%s8674_s21 + $0xf8] sm:$0xff]  }
 0x87a   : > { %5755 = vmatpush1.bf16.msra.mxu0 %v7391_v14  ;;  %v5519_v14 = vld [vmem:[%s8672_s27] sm:$0xf] }
 0x87b   : > { %5712 = vmatpush1.bf16.msra.mxu1 %v7388_v1  ;;  %5756 = vmatprep.subr.bf16.mxu0 %v7399_v21  ;;  %v7437_v1 = vld [vmem:[%s8674_s21 + $0xb8] sm:$0xff]   ;;  %v5524_v21 = vrot.slane %v5519_v14, %v993_v57 }
 0x87c   : > { %5713 = vmatprep.subr.bf16.mxu1 %v7396_v4  ;;  %v5535_v4 = vsub.s32 3, %v8733_v56 }
 0x87e   : > { %5757 = vmatpush1.bf16.msra.mxu0 %v7397_v55  ;;  %v5528_v55 = vrot.slane %v5519_v14, %v997_v60 }
 0x87f   : > { %5714 = vmatpush1.bf16.msra.mxu1 %v7394_v43  ;;  %5758 = vmatprep.subr.bf16.mxu0 %v7405_v49  ;;  %v5532_v43 = vrot.slane %v5519_v14, %v1001_v11 }
 0x880   : > { %5715 = vmatprep.subr.bf16.mxu1 %v7402_v15  ;;  %v5536_v15 = vrot.slane %v5519_v14, %v5535_v4 }
 0x882   : > { %5759 = vmatpush1.bf16.msra.mxu0 %v7403_v47 }
 0x883   : > { %5716 = vmatpush1.bf16.msra.mxu1 %v7400_v10  ;;  %6862 = vmatprep.subr.bf16.mxu0 %v7407_v32 }
 0x938   : > { %v5437_v52 = vpop.f32.mrb[60].mxu0 }
 0x939   : > { %v5438_v62 = vadd.f32 %v6673_v8, %v5437_v52  ;;  %v7114_v46 = vpop.f32.mrb[61].mxu0 }
 0x93a   : > { %v5440_v53 = vpop.f32.mrb[62].mxu0  ;;  %v6683_v46 = vld [vmem:[%s777_s19] ss:$0 sm:$0xff] }
 0x93b   : > { %v9887_v13 = vadd.f32 %v7526_v27, %v5438_v62  ;;  %v5441_v35 = vadd.f32 %v6673_v8, %v5440_v53  ;;  %v7115_v23 = vpop.f32.mrb[63].mxu0 }
 0x93d   : > { %v9889_v58 = vadd.f32 %v7527_v3, %v5441_v35  ;;  %5448 = vadd.xlane.f32.xlu1 %v9887_v13  ;;  %v7406_v3 = vld [vmem:[%s8674_s21 + $0x40] sm:$0xff]  }
 0x93e   : > { %6840 = vmatprep.subr.bf16.mxu1 %v7406_v3 }
 0x93f   : > { %5450 = vadd.xlane.f32.xlu0 %v9889_v58 }
 0x9ca   : > { %v5449_v40 = vpop.xlane.xlu1 %5448 }
 0x9cb   : > { %v5452_v36 = vmul.f32 0.0078125, %v5449_v40  ;;  %v7415_v40 = vld [vmem:[%s8674_s21 + $0xd0] sm:$0xff]  }
 0x9cc   : > { %v5451_v44 = vpop.xlane.xlu0 %5450 }
 0x9cd   : > { %v9902_v54 = vsub.f32 %v9887_v13, %v5452_v36  ;;  %v5453_v24 = vmul.f32 0.0078125, %v5451_v44  ;;  %v7416_v36 = vld [vmem:[%s8674_s21 + $0x10] sm:$0xff]  }
 0x9ce   : > { %v7417_v44 = vld [vmem:[%s8674_s21 + $0x90] sm:$0xff]  }
 0x9cf   : > { %v9905_v6 = vsub.f32 %v9889_v58, %v5453_v24  ;;  %v5456_v16 = vmul.f32 %v9902_v54, %v9902_v54  ;;  %v7419_v24 = vld [vmem:[%s8674_s21 + $0xd8] sm:$0xff]  }
 0x9d1   : > { %5458 = vadd.xlane.f32.xlu0 %v5456_v16  ;;  %v5457_v33 = vmul.f32 %v9905_v6, %v9905_v6  ;;  %v7421_v16 = vld [vmem:[%s8674_s21 + $0x98] sm:$0xff]  }
 0x9d5   : > { %5460 = vadd.xlane.f32.xlu0 %v5457_v33  ;;  %v7422_v33 = vld [vmem:[%s8674_s21 + $0x60] sm:$0xff]  }
 0xa5e   : > { %v5459_v59 = vpop.xlane.xlu0 %5458 }
 0xa5f   : > { %v5462_v25 = vmul.f32 0.0078125, %v5459_v59 }
 0xa61   : > { %v5464_v20 = vadd.f32 1e-05, %v5462_v25 }
 0xa62   : > { %v5461_v19 = vpop.xlane.xlu0 %5460 }
 0xa63   : > { %7506 = vrsqrt.f32 %v5464_v20  ;;  %v5463_v30 = vmul.f32 0.0078125, %v5461_v19 }
 0xa65   : > { %v5465_v17 = vadd.f32 1e-05, %v5463_v30 }
 0xa67   : > { %7508 = vrsqrt.f32 %v5465_v17 }
 0xa6d   : > { %v7507_v2 = vpop.eup %7506 }
 0xa6e   : > { %v5468_v7 = vmul.f32 %v7507_v2, %v9902_v54  ;;  %v7418_v54 = vld [vmem:[%s8674_s21 + $0x58] sm:$0xff]  }
 0xa70   : > { %v5476_v62 = vmul.f32 %v6682_v26, %v5468_v7 }
 0xa71   : > { %v7509_v8 = vpop.eup %7508 }
 0xa72   : > { %v5469_v52 = vmul.f32 %v7509_v8, %v9905_v6  ;;  %v5484_v27 = vadd.f32 %v6683_v46, %v5476_v62  ;;  %v7420_v6 = vld [vmem:[%s8674_s21 + $0x18] sm:$0xff]  }
 0xa74   : > { %v5477_v53 = vmul.f32 %v6682_v26, %v5469_v52 }
 0xa76   : > { %v5485_v35 = vadd.f32 %v6683_v46, %v5477_v53 }
 0xa78   : > { %v5486_v23 = vpack.c.bf16 %v5485_v35, %v5484_v27 }
 0xa7a   : > { %5734 = vmatmul.mubr.bf16.vlgmr.msra.gmra.mrb[76].mxu1 %v5486_v23  ;;  %5777 = vmatmul.mubr.bf16.vlgmr.msra.gmra.mrb[64].mxu0 %v5486_v23 }
 0xa7b   : > { %6841 = vmatpush3.bf16.msra.mxu1 %v7408_v38  ;;  %6863 = vmatpush3.bf16.msra.mxu0 %v7409_v12 }
 0xa7c   : > { %6842 = vmatprep.subr.bf16.mxu1 %v7410_v50  ;;  %6864 = vmatprep.subr.bf16.mxu0 %v7411_v61 }
 0xa7f   : > { %6843 = vmatpush3.bf16.msra.mxu1 %v7412_v9  ;;  %6865 = vmatpush3.bf16.msra.mxu0 %v7413_v37 }
 0xa80   : > { %6844 = vmatprep.subr.bf16.mxu1 %v7414_v29  ;;  %6866 = vmatprep.subr.bf16.mxu0 %v7415_v40 }
 0xa83   : > { %6845 = vmatpush3.bf16.msra.mxu1 %v7416_v36  ;;  %6867 = vmatpush3.bf16.msra.mxu0 %v7417_v44 }
 0xa84   : > { %6846 = vmatprep.subr.bf16.mxu1 %v7418_v54  ;;  %6868 = vmatprep.subr.bf16.mxu0 %v7419_v24 }
 0xa87   : > { %6847 = vmatpush3.bf16.msra.mxu1 %v7420_v6  ;;  %6869 = vmatpush3.bf16.msra.mxu0 %v7421_v16 }
 0xa88   : > { %6848 = vmatprep.subr.bf16.mxu1 %v7422_v33  ;;  %6870 = vmatprep.subr.bf16.mxu0 %v7423_v51 }
 0xa8b   : > { %6849 = vmatpush3.bf16.msra.mxu1 %v7424_v31  ;;  %6871 = vmatpush3.bf16.msra.mxu0 %v7425_v5 }
 0xa8c   : > { %6850 = vmatprep.subr.bf16.mxu1 %v7426_v22  ;;  %6872 = vmatprep.subr.bf16.mxu0 %v7427_v63 }
 0xa8f   : > { %6851 = vmatpush3.bf16.msra.mxu1 %v7428_v39  ;;  %6873 = vmatpush3.bf16.msra.mxu0 %v7429_v45 }
 0xa90   : > { %6852 = vmatprep.subr.bf16.mxu1 %v7430_v41  ;;  %6874 = vmatprep.subr.bf16.mxu0 %v7431_v28 }
 0xa93   : > { %6853 = vmatpush3.bf16.msra.mxu1 %v7432_v42  ;;  %6875 = vmatpush3.bf16.msra.mxu0 %v7433_v34 }
 0xa94   : > { %6854 = vmatprep.subr.bf16.mxu1 %v7434_v48  ;;  %6876 = vmatprep.subr.bf16.mxu0 %v7435_v0 }
 0xa97   : > { %6855 = vmatpush3.bf16.msra.mxu1 %v7436_v18  ;;  %6877 = vmatpush3.bf16.msra.mxu0 %v7437_v1 }
 0xb4d   : > { %v5735_v49 = vpop.f32.mrb[76].mxu1  ;;  %v5778_v10 = vpop.f32.mrb[64].mxu0 }
 0xb4e   : > { %v9981_v47 = vadd.f32 %v5735_v49, %v5524_v21  ;;  %v9983_v59 = vadd.f32 %v5778_v10, %v5532_v43  ;;  %v5737_v25 = vpop.f32.mrb[77].mxu1  ;;  %v5780_v20 = vpop.f32.mrb[65].mxu0 }
 0xb4f   : > { %v9985_v19 = vadd.f32 %v5737_v25, %v5528_v55  ;;  %v9987_v30 = vadd.f32 %v5780_v20, %v5536_v15  ;;  %v5739_v57 = vpop.f32.mrb[78].mxu1  ;;  %v5782_v17 = vpop.f32.mrb[66].mxu0 }
 0xb50   : > { %v5787_v11 = vmul.f32 %v9981_v47, %v9981_v47  ;;  %v5789_v56 = vmul.f32 %v9983_v59, %v9983_v59  ;;  %v9993_v60 = vadd.f32 %v5739_v57, %v5524_v21  ;;  %v9995_v2 = vadd.f32 %v5782_v17, %v5532_v43  ;;  %v5741_v7 = vpop.f32.mrb[79].mxu1  ;;  %v5784_v26 = vpop.f32.mrb[67].mxu0 }
 0xb51   : > { %v5788_v8 = vmul.f32 %v9985_v19, %v9985_v19  ;;  %v5790_v52 = vmul.f32 %v9987_v30, %v9987_v30  ;;  %v10001_v62 = vadd.f32 %v5741_v7, %v5528_v55  ;;  %v10003_v46 = vadd.f32 %v5784_v26, %v5536_v15 }
 0xb52   : > { %v5795_v53 = vmul.f32 %v5787_v11, %v9981_v47  ;;  %v5797_v27 = vmul.f32 %v5789_v56, %v9983_v59  ;;  %v5791_v35 = vmul.f32 %v9993_v60, %v9993_v60  ;;  %v5793_v23 = vmul.f32 %v9995_v2, %v9995_v2 }
 0xb53   : > { %v5796_v3 = vmul.f32 %v5788_v8, %v9985_v19  ;;  %v5798_v32 = vmul.f32 %v5790_v52, %v9987_v30  ;;  %v5792_v38 = vmul.f32 %v10001_v62, %v10001_v62  ;;  %v5794_v12 = vmul.f32 %v10003_v46, %v10003_v46 }
 0xb54   : > { %v5803_v50 = vmul.f32 0.044715, %v5795_v53  ;;  %v5805_v61 = vmul.f32 0.044715, %v5797_v27  ;;  %v5799_v9 = vmul.f32 %v5791_v35, %v9993_v60  ;;  %v5801_v37 = vmul.f32 %v5793_v23, %v9995_v2 }
 0xb55   : > { %v5804_v29 = vmul.f32 0.044715, %v5796_v3  ;;  %v5806_v40 = vmul.f32 0.044715, %v5798_v32  ;;  %v5800_v36 = vmul.f32 %v5792_v38, %v10001_v62  ;;  %v5802_v44 = vmul.f32 %v5794_v12, %v10003_v46 }
 0xb56   : > { %v5811_v54 = vadd.f32 %v5803_v50, %v9981_v47  ;;  %v5813_v24 = vadd.f32 %v5805_v61, %v9983_v59  ;;  %v5807_v6 = vmul.f32 0.044715, %v5799_v9  ;;  %v5809_v16 = vmul.f32 0.044715, %v5801_v37 }
 0xb57   : > { %v5812_v33 = vadd.f32 %v5804_v29, %v9985_v19  ;;  %v5814_v51 = vadd.f32 %v5806_v40, %v9987_v30  ;;  %v5808_v31 = vmul.f32 0.044715, %v5800_v36  ;;  %v5810_v5 = vmul.f32 0.044715, %v5802_v44 }
 0xb58   : > { %v5819_v22 = vmul.f32 0.7978846, %v5811_v54  ;;  %v5821_v63 = vmul.f32 0.7978846, %v5813_v24  ;;  %v5815_v39 = vadd.f32 %v5807_v6, %v9993_v60  ;;  %v5817_v45 = vadd.f32 %v5809_v16, %v9995_v2 }
 0xb59   : > { %v5820_v41 = vmul.f32 0.7978846, %v5812_v33  ;;  %v5822_v28 = vmul.f32 0.7978846, %v5814_v51  ;;  %v5816_v42 = vadd.f32 %v5808_v31, %v10001_v62  ;;  %v5818_v34 = vadd.f32 %v5810_v5, %v10003_v46 }
 0xb5a   : > { %7510 = vtanh.f32 %v5819_v22  ;;  %v5823_v48 = vmul.f32 0.7978846, %v5815_v39  ;;  %v5825_v0 = vmul.f32 0.7978846, %v5817_v45 }
 0xb5b   : > { %7512 = vtanh.f32 %v5821_v63  ;;  %v5824_v18 = vmul.f32 0.7978846, %v5816_v42  ;;  %v5826_v1 = vmul.f32 0.7978846, %v5818_v34 }
 0xb5c   : > { %7514 = vtanh.f32 %v5820_v41 }
 0xb5d   : > { %7516 = vtanh.f32 %v5822_v28 }
 0xb5e   : > { %7518 = vtanh.f32 %v5823_v48 }
 0xb5f   : > { %7520 = vtanh.f32 %v5825_v0 }
 0xb60   : > { %7522 = vtanh.f32 %v5824_v18 }
 0xb61   : > { %7524 = vtanh.f32 %v5826_v1 }
 0xb64   : > { %v7511_v14 = vpop.eup %7510 }
 0xb65   : > { %v7513_v4 = vpop.eup %7512  ;;  %v5835_v21 = vadd.f32 1.0, %v7511_v14 }
 0xb66   : > { %v7515_v43 = vpop.eup %7514  ;;  %v5837_v55 = vadd.f32 1.0, %v7513_v4 }
 0xb67   : > { %v7517_v15 = vpop.eup %7516  ;;  %v5836_v49 = vadd.f32 1.0, %v7515_v43  ;;  %v5843_v57 = vmul.f32 0.5, %v5835_v21 }
 0xb68   : > { %v7519_v10 = vpop.eup %7518  ;;  %v5838_v25 = vadd.f32 1.0, %v7517_v15  ;;  %v5845_v56 = vmul.f32 0.5, %v5837_v55 }
 0xb69   : > { %v7521_v20 = vpop.eup %7520  ;;  %v5839_v17 = vadd.f32 1.0, %v7519_v10  ;;  %v5844_v53 = vmul.f32 0.5, %v5836_v49  ;;  %v5851_v3 = vmul.f32 %v5843_v57, %v9981_v47 }
 0xb6a   : > { %v7523_v11 = vpop.eup %7522  ;;  %v5841_v7 = vadd.f32 1.0, %v7521_v20  ;;  %v5846_v23 = vmul.f32 0.5, %v5838_v25  ;;  %v5853_v12 = vmul.f32 %v5845_v56, %v9983_v59 }
 0xb6b   : > { %v7525_v26 = vpop.eup %7524  ;;  %v5847_v8 = vmul.f32 0.5, %v5839_v17  ;;  %v5840_v52 = vadd.f32 1.0, %v7523_v11  ;;  %v5852_v9 = vmul.f32 %v5844_v53, %v9985_v19 }
 0xb6c   : > { %v5849_v27 = vmul.f32 0.5, %v5841_v7  ;;  %v5842_v35 = vadd.f32 1.0, %v7525_v26  ;;  %v5854_v40 = vmul.f32 %v5846_v23, %v9987_v30 }
 0xb6d   : > { %v5855_v32 = vmul.f32 %v5847_v8, %v9993_v60  ;;  %v5848_v38 = vmul.f32 0.5, %v5840_v52 }
 0xb6e   : > { %v5857_v50 = vmul.f32 %v5849_v27, %v9995_v2  ;;  %v5850_v61 = vmul.f32 0.5, %v5842_v35  ;;  %v6716_v2 = vld [vmem:[%s812_s16] ss:$0 sm:$0xff] }
 0xb6f   : > { %v5856_v37 = vmul.f32 %v5848_v38, %v10001_v62  ;;  %v5859_v29 = vpack.c.bf16 %v5855_v32, %v5851_v3 }
 0xb70   : > { %v5858_v36 = vmul.f32 %v5850_v61, %v10003_v46  ;;  %v5861_v44 = vpack.c.bf16 %v5857_v50, %v5853_v12 }
 0xb71   : > { %v5860_v47 = vpack.c.bf16 %v5856_v37, %v5852_v9 }
 0xb72   : > { %v5862_v54 = vpack.c.bf16 %v5858_v36, %v5854_v40 }
 0xb73   : > { %6158 = vmatprep.mubr.bf16.mxu1 %v5860_v47 }
 0xb74   : > { %6199 = vmatprep.mubr.bf16.mxu0 %v5862_v54  ;;  %6159 = vmatmul.mubr.bf16.vlgmr.msra.gmra.mrb[80].mxu1 %v5859_v29 }
 0xb75   : > { %6200 = vmatmul.mubr.bf16.vlgmr.msra.gmra.mrb[68].mxu0 %v5861_v44 }
 0xc47   : > { %v6856_v59 = vpop.f32.mrb[80].mxu1 }
 0xc48   : > { %v6878_v60 = vpop.f32.mrb[68].mxu0  ;;  %v6857_v24 = vpop.f32.mrb[81].mxu1 }
 0xc49   : > { %v6858_v19 = vadd.f32 %v6857_v24, %v6856_v59  ;;  %v6879_v6 = vpop.f32.mrb[69].mxu0  ;;  %v6859_v62 = vpop.f32.mrb[82].mxu1 }
 0xc4a   : > { %v6880_v16 = vadd.f32 %v6879_v6, %v6878_v60  ;;  %v6881_v33 = vpop.f32.mrb[70].mxu0  ;;  %v6860_v30 = vpop.f32.mrb[83].mxu1 }
 0xc4b   : > { %v6161_v51 = vadd.f32 %v6858_v19, %v6716_v2  ;;  %v6861_v46 = vadd.f32 %v6860_v30, %v6859_v62  ;;  %v6882_v31 = vpop.f32.mrb[71].mxu0 }
 0xc4c   : > { %v6883_v5 = vadd.f32 %v6882_v31, %v6881_v33 }
 0xc4d   : > { %v6202_v22 = vadd.f32 %v6880_v16, %v6161_v51  ;;  %v6164_v63 = vadd.f32 %v6861_v46, %v6716_v2  ;;  %6215 = sbr.rel (%p6749_p2) target bundleno = 3156 (0xc54), region = 140 }
 0xc4f   : > { %v6208_v39 = vadd.f32 %v6202_v22, %v9887_v13  ;;  %v6205_v45 = vadd.f32 %v6883_v5, %v6164_v63 }
 0xc51   : > { %6210 = vst [vmem:[#allocation2] sm:$0xff] %v6208_v39  ;;  %v6209_v41 = vadd.f32 %v6205_v45, %v9889_v58  ;;  %6216 = vst [vmem:[#allocation20] sm:$0xff] (!%p6749_p2), %v6208_v39 }
 0xc53   : > { %6211 = vst [vmem:[#allocation2 + $0x8] sm:$0xff] %v6209_v41  ;;  %6217 = vst [vmem:[#allocation20 + $0x8] sm:$0xff] (!%p6749_p2), %v6209_v41 }
 0xc54 PF: > { %s10182_s4 = sld [smem:[#allocation29_spill]]  ;;  %s8069_s14 = smov [#allocation20]  }
 0xc55   : > { %s6227_s28 = sshll.u32 %s8069_s14, 4  ;;  %s6228_s28 = int_to_ptr.vmem [resolvable:$true] %s6227_s28 }
 0xc56   : > { %s7944_s25 = scalar_lea.vmem %s6228_s28, 256  ;;  %p7951_p4 = scmp.lt.s32.totalorder %s6228_s28, %s6228_s28 }
 0xc57   : > { %p7945_p10 = scmp.ne.s32.totalorder %s6228_s28, %s7944_s25  ;;  %p7952_p5 = scmp.lt.s32.totalorder %s7944_s25, %s7944_s25 }
 0xc59   : > { %p7953_p12 = por %p7952_p5, %p7951_p4 }
 0xc5a   : > { %p7207_p1 = scmp.eq.s32.totalorder %s10182_s4, 2 }
 0xc5c   : > { %p7946_p8 = pnand %p7945_p10, %p7207_p1 }
 0xc5e   : > { %p7947_p11 = pneg %p7946_p8 }
 0xc60   : > { %p7954_p13 = pnand %p7953_p12, %p7947_p11 }
 0xc62   : > { %7957 = shalt.err (!%p7954_p13)
}
 0xc63   : > { %s10183_s19 = sld [smem:[#allocation39_spill]] }
 0xc69   : > { %s7958_s3 = scalar_lea.hbm %s10183_s19, 256 }
 0xc6a   : > { %p7959_p7 = scmp.ne.s32.totalorder %s10183_s19, %s7958_s3  ;;  %p7964_p9 = scmp.lt.u32.totalorder %s7958_s3, %s10183_s19 }
 0xc6c   : > { %p7960_p0 = pnand %p7959_p7, %p7207_p1 }
 0xc6e   : > { %p7961_p3 = pneg %p7960_p0 }
 0xc70   : > { %p7966_p6 = pnand %p7964_p9, %p7961_p3 }
 0xc72   : > { %7969 = shalt.err (!%p7966_p6)
}
 0xc73   : > { %s8070_s18 = smov 128   ;;  %s8071_s24 = smov 8  }
 0xc74   : > { %7155 = dma.vmem_to_hbm [thread:$0]  (%p7207_p1), %s6228_s28, 256, %s10183_s19, [#allocation5], %s8070_s18, %s8070_s18, %s8071_s24  }
 0xc75   : > { %8007 = dma.done.wait (%p7207_p1), [#allocation5], 256  }
 0xc76   : > { %8009 = vsyncadd (%p7207_p1), [#allocation5], 4294967040 }
 0xc77 PF: > { %s10184_s13 = sld [smem:[#allocation28_spill]]  ;;  %s10185_s29 = sld [smem:[#allocation25_spill]] }
 0xc78   : > { %s10186_s30 = sld [smem:[#allocation26_spill]]  ;;  %s10187_s15 = sld [smem:[#allocation32_spill]] }
 0xc79   : > { %s10188_s26 = sld [smem:[#allocation30_spill]]  ;;  %s10189_s16 = smov %s8028_s17 }
 0xc7d   : > { %s27_s18 = sadd.s32 1, %s10184_s13  }
 0xc7e   : > { %p24_p2 = scmp.ge.s32.totalorder %s27_s18, 5  }
 0xc7f   : > { %s10190_s17 = smov %s10188_s26 }
 0xc80   :  { %26 = sbr.rel (!%p24_p2) target bundleno = 12 (0xc), region = 252 }
 0xc87   :  { %6243 = vsyncpa [#allocation4], 1 }
 0xc88   :  { %6245 = vsyncpa [#allocation4 + $0x1], 1 }
 0xc89   :  { %6246 = vsyncpa [#allocation7], 1 }
 0xc8a   :  { %6247 = vsyncpa [#allocation5], 1 }
 0xc8b   :  { %6249 = vsyncpa [#allocation5 + $0x1], 1 }

</bundles_post_ra>
